<compile_context>
chip_gen: v6e
topology: v6e:2x2x1
jax: 0.10.0
libtpu: 0.0.40
codegen_flags: <defaults>
</compile_context>

<pallas_src>
import math
import functools
from dataclasses import dataclass

import numpy as np
import jax
import jax.numpy as jnp
from jax.experimental import pallas as pl
from jax.experimental.pallas import tpu as pltpu

LN_EPS = 1e-5                      # torch.nn.LayerNorm default
FRAG_N = 3200
TREE_N = 3000
TREE_NP = ((TREE_N + 127) // 128) * 128     # 3072 (lane-dense)
NEG_PAD = -1e30


# --------------------------------------------------------------------------- helpers
def _full_spec(shape):
    nd = len(shape)
    return pl.BlockSpec(shape, lambda *_: (0,) * nd)


def pos_embed_sine_np(L, num_pos_feats, temperature=10000.0):
    x_embed = np.arange(1, L + 1, dtype=np.float32)           # cumsum of ones
    dim_t = np.arange(num_pos_feats, dtype=np.float32)
    dim_t = temperature ** (2.0 * np.floor(dim_t / 2.0) / num_pos_feats)
    pos_x = x_embed[:, None] / dim_t[None, :]
    pos = np.stack([np.sin(pos_x[:, 0::2]), np.cos(pos_x[:, 1::2])], axis=2)
    return pos.reshape(L, num_pos_feats).astype(np.float32)


def cross_entropy(logits, targets):
    logz = jax.scipy.special.logsumexp(logits, axis=-1)
    tgt = jnp.take_along_axis(logits, targets[:, None].astype(jnp.int32), axis=-1)[:, 0]
    return jnp.mean(logz - tgt)


# --------------------------------------------------------------------------- the single fused kernel
def _mse_kernel(xp_ref, pos_ref, gsp_ref, pn_ref, bsel_ref, rmeta_ref, psel_ref,
                xe_ref,
                sw1_ref, sc1_ref, sw2_ref, sc2_ref,
                g1_ref, b1_ref, wv_ref, bv_ref, wo_ref, bo_ref,
                w1f_ref, c1f_ref, w2_ref, c2_ref, g3_ref, b3_ref,
                hw1_ref, hb1_ref, hw2_ref, hb2_ref, hw3_ref, hb3_ref,
                pw_ref, pb_ref,
                slab_ref, pred_ref, *, d, l_e, ln_eps):
    f32 = jnp.float32
    bf16 = jnp.bfloat16

    def ln(v, g, b):
        mu = jnp.mean(v, axis=-1, keepdims=True)
        var = jnp.mean(jnp.square(v - mu), axis=-1, keepdims=True)
        return (v - mu) * jax.lax.rsqrt(var + ln_eps) * g + b

    # ---- struct_proj on the node rows (both LayerNorms folded into the Linears).
    #      LinearLayer(2, d, relu=True) -> LinearLayer(d, d, relu=False)
    xr = xp_ref[...]                                  # (Np, 2) f32, pad rows = 0
    x0, x1 = xr[:, 0:1], xr[:, 1:2]
    mu = (x0 + x1) * 0.5
    var = (jnp.square(x0 - mu) + jnp.square(x1 - mu)) * 0.5
    inv = jax.lax.rsqrt(var + ln_eps)
    sw1 = sw1_ref[...]
    # K = 2 contraction -> broadcast-accumulate on the VPU instead of a matmul
    h1 = (x0 - mu) * inv * sw1[0:1, :] + (x1 - mu) * inv * sw1[1:2, :] + sc1_ref[...]
    h1 = jnp.maximum(h1, 0.0)
    mu = jnp.mean(h1, axis=-1, keepdims=True)
    var = jnp.mean(jnp.square(h1 - mu), axis=-1, keepdims=True)
    h1n = (h1 - mu) * jax.lax.rsqrt(var + ln_eps)
    h = jnp.dot(h1n.astype(bf16), sw2_ref[...], preferred_element_type=f32) + sc2_ref[...]
    # h == x_g node features (use_gnn=False)          # (Np, d)

    # ---- per-graph node mean -> feat_s_raw and the frag/tree prediction input
    pooled = jnp.dot(pn_ref[...], h, preferred_element_type=f32)          # (bs, d)

    # ---- pack struct rows + the constant elec rows into the fused sequence.
    #      gsp is a static 0/1 node->packed-row spread matrix; xe_row is the
    #      input-independent elec_proj row (LayerNorm(1) zeroes its input).
    rmeta = rmeta_ref[...]
    w_val, m_e = rmeta[:, 0:1], rmeta[:, 1:2]
    src = jnp.dot(gsp_ref[...], h, preferred_element_type=f32) + m_e * xe_ref[...]  # (R, d)

    # ---- MFuser: seq-len-1 attention == out_proj(v_proj(.)); dropouts are identity.
    s2 = ln(src, g1_ref[...], b1_ref[...]) + pos_ref[...]
    v = jnp.dot(s2.astype(bf16), wv_ref[...], preferred_element_type=f32) + bv_ref[...]
    a = jnp.dot(v.astype(bf16), wo_ref[...], preferred_element_type=f32) + bo_ref[...]
    s2 = s2 + a                                       # src2 = src2 + attn
    x = src + s2                                      # src  = src  + src2
    mu = jnp.mean(x, axis=-1, keepdims=True)
    var = jnp.mean(jnp.square(x - mu), axis=-1, keepdims=True)
    xh = (x - mu) * jax.lax.rsqrt(var + ln_eps)       # norm2 (scale/shift folded into w1f)
    ff = jnp.maximum(jnp.dot(xh.astype(bf16), w1f_ref[...],
                             preferred_element_type=f32) + c1f_ref[...], 0.0)
    s2 = jnp.dot(ff.astype(bf16), w2_ref[...], preferred_element_type=f32) + c2_ref[...]
    x = x + s2
    mem = ln(x, g3_ref[...], b3_ref[...])             # (R, d)  memory

    # ---- fused mlp / mlp_e heads: lanes [0:d/2] = mlp, [d/2:d] = mlp_e
    z1 = jnp.maximum(jnp.dot(mem.astype(bf16), hw1_ref[...],
                             preferred_element_type=f32) + hb1_ref[...], 0.0)
    z2 = jnp.maximum(jnp.dot(z1.astype(bf16), hw2_ref[...],
                             preferred_element_type=f32) + hb2_ref[...], 0.0)
    z3 = jnp.dot(z2.astype(bf16), hw3_ref[...], preferred_element_type=f32) + hb3_ref[...]
    e_rows = z3[:, 1:2]                               # per-row self.mlp_e output

    # ---- per-graph reductions as lane-dense matmuls, packed into one output slab
    bsel = bsel_ref[...]                              # (bs, R) graph membership (0/1)
    p_oe = jnp.dot(bsel, z3 * w_val, preferred_element_type=f32)          # (bs, 2)
    p_feat = jnp.dot(bsel, mem * w_val, preferred_element_type=f32)       # (bs, d)
    p_rese = jnp.dot(bsel, e_rows * psel_ref[...], preferred_element_type=f32)  # (bs, l_e)

    slab_ref[...] = jnp.zeros(slab_ref.shape, f32)
    slab_ref[:, 0:1] = p_oe[:, 0:1]                   # out   = mean(mlp(memory))
    slab_ref[:, 1:1 + d] = p_feat                     # feat_all
    slab_ref[:, 1 + d:1 + d + l_e] = p_rese           # mlp_e(memory[:l_e])
    slab_ref[:, 1 + d + l_e:1 + 2 * d + l_e] = pooled  # feat_s_raw / pooled x_g

    # ---- frag_pred / tree_pred, hoisted after the mean pool (exact identity);
    #      tree padded to 3072 lanes with a -1e30 f32 pad bias (added post-matmul).
    pred_ref[...] = (jnp.dot(pooled.astype(bf16), pw_ref[...],
                             preferred_element_type=f32) + pb_ref[...])


# --------------------------------------------------------------------------- params / args
@dataclass
class Args:
    d_model: int = 32
    use_gnn: bool = False
    use_frag_gnn: bool = False
    use_graph_mamba: bool = False
    use_fusion: bool = True
    mask_ratio: float = 0.5
    mask_e: bool = False
    drop: float = 0.1


def build_params(key, args):
    """Initialise torch-equivalent params and pre-fold them into the kernel layout."""
    d = args.d_model
    dh = 1024                                         # MFuser default d_hidden
    keys = iter(jax.random.split(key, 64))

    def xav(shape):
        bound = math.sqrt(6.0 / (shape[0] + shape[1]))
        return jax.random.uniform(next(keys), shape, jnp.float32, -bound, bound)

    def fold_ln_linear(in_dim, out_dim):
        # LinearLayer(in,out,layer_norm=True): y = LN(x) @ W + b, with the LN
        # scale/shift folded into W/b (exact; identity at init since g=1, beta=0).
        g = jnp.ones((in_dim,)); be = jnp.zeros((in_dim,))
        w = xav((in_dim, out_dim)); b = jnp.zeros((out_dim,))
        return g[:, None] * w, (be @ w + b)[None, :]

    p = {}
    # struct_proj = [LinearLayer(2,d,relu=True), LinearLayer(d,d,relu=False)]
    p['sw1'], p['sc1'] = fold_ln_linear(2, d)
    sw2, sc2 = fold_ln_linear(d, d)
    p['sw2'], p['sc2'] = sw2.astype(jnp.bfloat16), sc2

    # elec_proj: LayerNorm(1) zeroes its input, so in eval mode x_e is the
    # input-independent row Linear2(LN(relu(Linear1(LN1.beta)))) - precomputed here.
    e1w = xav((1, d)); e1b = jnp.zeros((d,)); e1_ln_b = jnp.zeros((1,))
    xe1 = jnp.maximum(e1_ln_b[None, :] @ e1w + e1b[None, :], 0.0)
    e2w = xav((d, d)); e2b = jnp.zeros((d,))
    mu = xe1.mean(-1, keepdims=True)
    var = jnp.mean(jnp.square(xe1 - mu), -1, keepdims=True)
    xe1n = (xe1 - mu) * jax.lax.rsqrt(var + LN_EPS)   # * gamma(=1) + beta(=0)
    p['xe_row'] = xe1n @ e2w + e2b[None, :]           # (1, d) f32

    # MFuser (heads=1 -> seq-len-1 attention collapses to out_proj(v_proj(.)))
    p['g1'], p['b1'] = jnp.ones((1, d)), jnp.zeros((1, d))
    p['wv'], p['bv'] = xav((d, d)).astype(jnp.bfloat16), jnp.zeros((1, d))
    p['wo'], p['bo'] = xav((d, d)).astype(jnp.bfloat16), jnp.zeros((1, d))
    n2g = jnp.ones((d,)); n2b = jnp.zeros((d,))
    w1 = xav((d, dh)); bb1 = jnp.zeros((dh,))
    p['w1f'] = (n2g[:, None] * w1).astype(jnp.bfloat16)       # norm2 folded into linear1
    p['c1f'] = (n2b @ w1 + bb1)[None, :]
    p['w2'], p['c2'] = xav((dh, d)).astype(jnp.bfloat16), jnp.zeros((1, d))
    p['g3'], p['b3'] = jnp.ones((1, d)), jnp.zeros((1, d))

    # mlp / mlp_e heads, fused (layer-1 concatenated, layers 2/3 block-diagonal)
    h2, h4 = d // 2, d // 4

    def head():
        return (xav((d, h2)), jnp.zeros((h2,)), xav((h2, h4)), jnp.zeros((h4,)),
                xav((h4, 1)), jnp.zeros((1,)))
    mw1, mb1, mw2, mb2, mw3, mb3 = head()             # self.mlp
    ew1, eb1, ew2, eb2, ew3, eb3 = head()             # self.mlp_e
    p['hw1'] = jnp.concatenate([mw1, ew1], axis=1).astype(jnp.bfloat16)
    p['hb1'] = jnp.concatenate([mb1, eb1])[None, :]
    w2blk = jnp.zeros((2 * h2, 2 * h4), jnp.float32)
    w2blk = w2blk.at[:h2, :h4].set(mw2).at[h2:, h4:].set(ew2)
    p['hw2'] = w2blk.astype(jnp.bfloat16)
    p['hb2'] = jnp.concatenate([mb2, eb2])[None, :]
    w3blk = jnp.zeros((2 * h4, 2), jnp.float32)
    w3blk = w3blk.at[:h4, 0:1].set(mw3).at[h4:, 1:2].set(ew3)
    p['hw3'] = w3blk.astype(jnp.bfloat16)
    p['hb3'] = jnp.concatenate([mb3, eb3])[None, :]

    # frag_pred (d,3200) and tree_pred (d,3000) fused along N; tree padded 3000->3072
    # with zero weight columns and a -1e30 f32 bias so pad logits vanish in CE.
    frag_w, frag_b = xav((d, FRAG_N)), jnp.zeros((FRAG_N,))
    tree_w, tree_b = xav((d, TREE_N)), jnp.zeros((TREE_N,))
    tree_w = jnp.concatenate([tree_w, jnp.zeros((d, TREE_NP - TREE_N), jnp.float32)], 1)
    tree_b = jnp.concatenate([tree_b, jnp.full((TREE_NP - TREE_N,), NEG_PAD, jnp.float32)])
    p['pw'] = jnp.concatenate([frag_w, tree_w], axis=1).astype(jnp.bfloat16)   # (d, 6272)
    p['pb'] = jnp.concatenate([frag_b, tree_b])[None, :]                       # f32
    return p


# --------------------------------------------------------------------------- MSE.forward
def make_forward(args, node_batch_np, frag_map_np, bs, l_e):
    # frag_map only feeds the disabled frag-gnn / graph-mamba branches -> dead here.
    del frag_map_np
    d = args.d_model
    N = int(len(node_batch_np))
    Np = ((N + 7) // 8) * 8
    idx_list = [np.nonzero(node_batch_np == i)[0] for i in range(bs)]
    Ns_list = [len(ix) for ix in idx_list]
    L_list = [ns + l_e for ns in Ns_list]
    L_max = ((max(L_list) + 7) // 8) * 8
    R = bs * L_max
    slab_cols = 1 + 2 * d + l_e
    SLAB_W = ((slab_cols + 127) // 128) * 128

    # Static packing / pooling matrices: the whole gather + segment-mean pipeline
    # becomes a few tiny in-kernel matmuls against these 0/1 constants.
    gsp = np.zeros((R, Np), np.float32)        # packed row <- node row (one-hot)
    pn = np.zeros((bs, Np), np.float32)        # per-graph node mean
    bsel = np.zeros((bs, R), np.float32)       # per-graph packed-row membership
    rmeta = np.zeros((R, 2), np.float32)       # [:,0]=1/L_i on valid rows, [:,1]=elec mask
    psel = np.zeros((R, l_e), np.float32)      # packed row -> results_e lane
    pos_np = np.zeros((R, d), np.float32)
    p_e = pos_embed_sine_np(l_e, d)
    for i in range(bs):
        ns, L = Ns_list[i], L_list[i]
        base = i * L_max
        for k, srow in enumerate(idx_list[i]):
            gsp[base + k, srow] = 1.0
        if ns > 0:
            pn[i, idx_list[i]] = 1.0 / ns
            pos_np[base:base + ns] = pos_embed_sine_np(ns, d)
        bsel[i, base:base + L_max] = 1.0
        rmeta[base:base + L, 0] = 1.0 / max(L, 1)
        rmeta[base + ns:base + L, 1] = 1.0
        for j in range(l_e):                   # memory[:l_e] quirk of the reference
            psel[base + j, j] = 1.0
        pos_np[base + ns:base + L] = p_e

    c_pos, c_gsp = jnp.asarray(pos_np), jnp.asarray(gsp)
    c_pn, c_bsel = jnp.asarray(pn), jnp.asarray(bsel)
    c_rmeta, c_psel = jnp.asarray(rmeta), jnp.asarray(psel)

    num_mask = int(l_e * args.mask_ratio)
    # torch.randperm is redrawn every call in the reference; frozen here (eval determinism)
    mask_idx = np.random.default_rng(1).permutation(l_e)[:num_mask]

    kernel = functools.partial(_mse_kernel, d=d, l_e=l_e, ln_eps=LN_EPS)

    def run_kernel(xp, fp):
        args_ = (xp, c_pos, c_gsp, c_pn, c_bsel, c_rmeta, c_psel,
                 fp['xe_row'],
                 fp['sw1'], fp['sc1'], fp['sw2'], fp['sc2'],
                 fp['g1'], fp['b1'], fp['wv'], fp['bv'], fp['wo'], fp['bo'],
                 fp['w1f'], fp['c1f'], fp['w2'], fp['c2'], fp['g3'], fp['b3'],
                 fp['hw1'], fp['hb1'], fp['hw2'], fp['hb2'], fp['hw3'], fp['hb3'],
                 fp['pw'], fp['pb'])
        pred_n = fp['pw'].shape[1]
        out_shape = (jax.ShapeDtypeStruct((bs, SLAB_W), jnp.float32),
                     jax.ShapeDtypeStruct((bs, pred_n), jnp.float32))
        return pl.pallas_call(
            kernel,
            out_shape=out_shape,
            grid=(1,),
            in_specs=[_full_spec(a.shape) for a in args_],
            out_specs=(_full_spec((bs, SLAB_W)), _full_spec((bs, pred_n))),
            compiler_params=pltpu.CompilerParams(dimension_semantics=("arbitrary",)),
        )(*args_)

    def forward(params, x, descriptors, frag_unique, tree, y):
        xp = jnp.pad(x.astype(jnp.float32), ((0, Np - N), (0, 0)))
        slab, preds = run_kernel(xp, params)

        # -------- unpack the lane-dense slab
        out = slab[:, 0:1]
        feat_all = slab[:, 1:1 + d][:, None, :]                       # (bs, 1, d)
        results_e = slab[:, 1 + d:1 + d + l_e][:, :, None]            # (bs, l_e, 1)
        feat_s_raw = slab[:, 1 + d + l_e:1 + 2 * d + l_e][:, None, :]  # (bs, 1, d)
        results = jnp.where(jnp.isfinite(out), out, 0.0).reshape(y.shape)

        # -------- frag / tree losses
        pred_frag = preds[:, :FRAG_N]
        tree_logits = preds[:, FRAG_N:]                               # 3072 lanes, pads -1e30
        loss_frag_div = jnp.zeros((1,), jnp.float32)                  # both div branches off
        loss_frag = jnp.mean(jnp.abs(pred_frag - frag_unique.reshape(pred_frag.shape)))
        loss_tree = cross_entropy(tree_logits, tree)

        # TODO(synk): FragEmbedding/GIN (use_frag_gnn) and Graph_Mamba (use_graph_mamba)
        # are disabled in this config; the reference would call global_mean_pool(None, ...)
        # here, so these stay zero placeholders (x_g_frag softmax is dead code as well).
        feat_s_frag = jnp.zeros((bs, 1, d), jnp.float32)
        feat_s_mam = jnp.zeros((bs, 1, d), jnp.float32)

        # -------- masked-descriptor loss (mask_e=False -> x_e unmasked inside the kernel)
        input_e = descriptors.reshape(bs, l_e, 1)
        r_e = results_e[:, mask_idx]
        i_e = input_e[:, mask_idx]
        r_e = jnp.where(jnp.isfinite(r_e), r_e, 0.0)
        r_e = jnp.where(jnp.isfinite(i_e), r_e, 0.0)
        loss_mask = jnp.mean(jnp.square(jax.nn.softmax(r_e, axis=1)
                                        - jax.nn.softmax(i_e, axis=1)))

        feats = [feat_s_raw, feat_s_frag, feat_s_mam, feat_all]
        losses = [loss_frag_div, loss_frag, loss_tree, loss_mask]
        return results, feats, losses

    return jax.jit(forward)


# --------------------------------------------------------------------------- main
if __name__ == "__main__":
    args = Args()
    key = jax.random.PRNGKey(0)
    kp, kd = jax.random.split(key)
    params = build_params(kp, args)

    k1, k2, k3 = jax.random.split(kd, 3)
    N, bs, l_e = 12, 2, 8
    node_batch_np = np.array([0] * 6 + [1] * 6, np.int32)
    frag_map_np = np.array([0, 0, 0, 1, 1, 1, 2, 2, 2, 3, 3, 3], np.int32)

    x = jax.random.normal(k1, (N, 2), jnp.float32)
    descriptors = jax.random.normal(k2, (bs * l_e,), jnp.float32)
    frag_unique = jax.random.normal(k3, (bs, FRAG_N), jnp.float32)
    tree = jnp.array([5, 42], jnp.int32)
    y = jnp.zeros((bs, 1), jnp.float32)

    forward = make_forward(args, node_batch_np, frag_map_np, bs, l_e)
    results, feats, losses = forward(params, x, descriptors, frag_unique, tree, y)
    jax.block_until_ready((results, feats, losses))
    print("KERNEL_OK")
</pallas_src>

<mosaic_0001>
module attributes {stable_mosaic.version = 11 : i64} {
  func.func @_mse_kernel(%arg0: i32, %arg1: memref<16x2xf32, #tpu.memory_space<vmem>>, %arg2: memref<32x32xf32, #tpu.memory_space<vmem>>, %arg3: memref<32x16xf32, #tpu.memory_space<vmem>>, %arg4: memref<2x16xf32, #tpu.memory_space<vmem>>, %arg5: memref<2x32xf32, #tpu.memory_space<vmem>>, %arg6: memref<32x2xf32, #tpu.memory_space<vmem>>, %arg7: memref<32x8xf32, #tpu.memory_space<vmem>>, %arg8: memref<1x32xf32, #tpu.memory_space<vmem>>, %arg9: memref<2x32xf32, #tpu.memory_space<vmem>>, %arg10: memref<1x32xf32, #tpu.memory_space<vmem>>, %arg11: memref<32x32xbf16, #tpu.memory_space<vmem>>, %arg12: memref<1x32xf32, #tpu.memory_space<vmem>>, %arg13: memref<1x32xf32, #tpu.memory_space<vmem>>, %arg14: memref<1x32xf32, #tpu.memory_space<vmem>>, %arg15: memref<32x32xbf16, #tpu.memory_space<vmem>>, %arg16: memref<1x32xf32, #tpu.memory_space<vmem>>, %arg17: memref<32x32xbf16, #tpu.memory_space<vmem>>, %arg18: memref<1x32xf32, #tpu.memory_space<vmem>>, %arg19: memref<32x1024xbf16, #tpu.memory_space<vmem>>, %arg20: memref<1x1024xf32, #tpu.memory_space<vmem>>, %arg21: memref<1024x32xbf16, #tpu.memory_space<vmem>>, %arg22: memref<1x32xf32, #tpu.memory_space<vmem>>, %arg23: memref<1x32xf32, #tpu.memory_space<vmem>>, %arg24: memref<1x32xf32, #tpu.memory_space<vmem>>, %arg25: memref<32x32xbf16, #tpu.memory_space<vmem>>, %arg26: memref<1x32xf32, #tpu.memory_space<vmem>>, %arg27: memref<32x16xbf16, #tpu.memory_space<vmem>>, %arg28: memref<1x16xf32, #tpu.memory_space<vmem>>, %arg29: memref<16x2xbf16, #tpu.memory_space<vmem>>, %arg30: memref<1x2xf32, #tpu.memory_space<vmem>>, %arg31: memref<32x6272xbf16, #tpu.memory_space<vmem>>, %arg32: memref<1x6272xf32, #tpu.memory_space<vmem>>, %arg33: memref<2x128xf32, #tpu.memory_space<vmem>>, %arg34: memref<2x6272xf32, #tpu.memory_space<vmem>>) attributes {dimension_semantics = [#tpu.dimension_semantics<arbitrary>], iteration_bounds = array<i64: 1>, scalar_prefetch = 0 : i64, scratch_operands = 0 : i64, tpu.core_type = #tpu.core_type<tc>, window_params = [{pipeline_mode = #tpu.pipeline_mode<synchronous>, transform_indices = @transform_0, window_bounds = array<i64: 16, 2>}, {pipeline_mode = #tpu.pipeline_mode<synchronous>, transform_indices = @transform_1, window_bounds = array<i64: 32, 32>}, {pipeline_mode = #tpu.pipeline_mode<synchronous>, transform_indices = @transform_2, window_bounds = array<i64: 32, 16>}, {pipeline_mode = #tpu.pipeline_mode<synchronous>, transform_indices = @transform_3, window_bounds = array<i64: 2, 16>}, {pipeline_mode = #tpu.pipeline_mode<synchronous>, transform_indices = @transform_4, window_bounds = array<i64: 2, 32>}, {pipeline_mode = #tpu.pipeline_mode<synchronous>, transform_indices = @transform_5, window_bounds = array<i64: 32, 2>}, {pipeline_mode = #tpu.pipeline_mode<synchronous>, transform_indices = @transform_6, window_bounds = array<i64: 32, 8>}, {pipeline_mode = #tpu.pipeline_mode<synchronous>, transform_indices = @transform_7, window_bounds = array<i64: 1, 32>}, {pipeline_mode = #tpu.pipeline_mode<synchronous>, transform_indices = @transform_8, window_bounds = array<i64: 2, 32>}, {pipeline_mode = #tpu.pipeline_mode<synchronous>, transform_indices = @transform_9, window_bounds = array<i64: 1, 32>}, {pipeline_mode = #tpu.pipeline_mode<synchronous>, transform_indices = @transform_10, window_bounds = array<i64: 32, 32>}, {pipeline_mode = #tpu.pipeline_mode<synchronous>, transform_indices = @transform_11, window_bounds = array<i64: 1, 32>}, {pipeline_mode = #tpu.pipeline_mode<synchronous>, transform_indices = @transform_12, window_bounds = array<i64: 1, 32>}, {pipeline_mode = #tpu.pipeline_mode<synchronous>, transform_indices = @transform_13, window_bounds = array<i64: 1, 32>}, {pipeline_mode = #tpu.pipeline_mode<synchronous>, transform_indices = @transform_14, window_bounds = array<i64: 32, 32>}, {pipeline_mode = #tpu.pipeline_mode<synchronous>, transform_indices = @transform_15, window_bounds = array<i64: 1, 32>}, {pipeline_mode = #tpu.pipeline_mode<synchronous>, transform_indices = @transform_16, window_bounds = array<i64: 32, 32>}, {pipeline_mode = #tpu.pipeline_mode<synchronous>, transform_indices = @transform_17, window_bounds = array<i64: 1, 32>}, {pipeline_mode = #tpu.pipeline_mode<synchronous>, transform_indices = @transform_18, window_bounds = array<i64: 32, 1024>}, {pipeline_mode = #tpu.pipeline_mode<synchronous>, transform_indices = @transform_19, window_bounds = array<i64: 1, 1024>}, {pipeline_mode = #tpu.pipeline_mode<synchronous>, transform_indices = @transform_20, window_bounds = array<i64: 1024, 32>}, {pipeline_mode = #tpu.pipeline_mode<synchronous>, transform_indices = @transform_21, window_bounds = array<i64: 1, 32>}, {pipeline_mode = #tpu.pipeline_mode<synchronous>, transform_indices = @transform_22, window_bounds = array<i64: 1, 32>}, {pipeline_mode = #tpu.pipeline_mode<synchronous>, transform_indices = @transform_23, window_bounds = array<i64: 1, 32>}, {pipeline_mode = #tpu.pipeline_mode<synchronous>, transform_indices = @transform_24, window_bounds = array<i64: 32, 32>}, {pipeline_mode = #tpu.pipeline_mode<synchronous>, transform_indices = @transform_25, window_bounds = array<i64: 1, 32>}, {pipeline_mode = #tpu.pipeline_mode<synchronous>, transform_indices = @transform_26, window_bounds = array<i64: 32, 16>}, {pipeline_mode = #tpu.pipeline_mode<synchronous>, transform_indices = @transform_27, window_bounds = array<i64: 1, 16>}, {pipeline_mode = #tpu.pipeline_mode<synchronous>, transform_indices = @transform_28, window_bounds = array<i64: 16, 2>}, {pipeline_mode = #tpu.pipeline_mode<synchronous>, transform_indices = @transform_29, window_bounds = array<i64: 1, 2>}, {pipeline_mode = #tpu.pipeline_mode<synchronous>, transform_indices = @transform_30, window_bounds = array<i64: 32, 6272>}, {pipeline_mode = #tpu.pipeline_mode<synchronous>, transform_indices = @transform_31, window_bounds = array<i64: 1, 6272>}, {pipeline_mode = #tpu.pipeline_mode<synchronous>, transform_indices = @transform_32, window_bounds = array<i64: 2, 128>}, {pipeline_mode = #tpu.pipeline_mode<synchronous>, transform_indices = @transform_33, window_bounds = array<i64: 2, 6272>}]} {
    %c0 = arith.constant 0 : index
    %c0_0 = arith.constant 0 : index
    %0 = vector.load %arg1[%c0, %c0_0] : memref<16x2xf32, #tpu.memory_space<vmem>>, vector<16x2xf32>
    %1 = vector.extract_strided_slice %0 {offsets = [0, 0], sizes = [16, 1], strides = [1, 1]} : vector<16x2xf32> to vector<16x1xf32>
    %2 = vector.extract_strided_slice %0 {offsets = [0, 1], sizes = [16, 1], strides = [1, 1]} : vector<16x2xf32> to vector<16x1xf32>
    %3 = arith.addf %1, %2 : vector<16x1xf32>
    %cst = arith.constant 5.000000e-01 : f32
    %4 = vector.broadcast %cst : f32 to vector<16x1xf32>
    %5 = arith.mulf %3, %4 : vector<16x1xf32>
    %6 = arith.subf %1, %5 : vector<16x1xf32>
    %7 = arith.mulf %6, %6 : vector<16x1xf32>
    %8 = arith.subf %2, %5 : vector<16x1xf32>
    %9 = arith.mulf %8, %8 : vector<16x1xf32>
    %10 = arith.addf %7, %9 : vector<16x1xf32>
    %cst_1 = arith.constant 5.000000e-01 : f32
    %11 = vector.broadcast %cst_1 : f32 to vector<16x1xf32>
    %12 = arith.mulf %10, %11 : vector<16x1xf32>
    %cst_2 = arith.constant 9.99999974E-6 : f32
    %13 = vector.broadcast %cst_2 : f32 to vector<16x1xf32>
    %14 = arith.addf %12, %13 : vector<16x1xf32>
    %15 = math.rsqrt %14 : vector<16x1xf32>
    %c0_3 = arith.constant 0 : index
    %c0_4 = arith.constant 0 : index
    %16 = vector.load %arg9[%c0_3, %c0_4] : memref<2x32xf32, #tpu.memory_space<vmem>>, vector<2x32xf32>
    %17 = arith.subf %1, %5 : vector<16x1xf32>
    %18 = arith.mulf %17, %15 : vector<16x1xf32>
    %19 = vector.extract_strided_slice %16 {offsets = [0, 0], sizes = [1, 32], strides = [1, 1]} : vector<2x32xf32> to vector<1x32xf32>
    %20 = vector.broadcast %18 : vector<16x1xf32> to vector<16x32xf32>
    %21 = vector.broadcast %19 : vector<1x32xf32> to vector<16x32xf32>
    %22 = arith.mulf %20, %21 : vector<16x32xf32>
    %23 = arith.subf %2, %5 : vector<16x1xf32>
    %24 = arith.mulf %23, %15 : vector<16x1xf32>
    %25 = vector.extract_strided_slice %16 {offsets = [1, 0], sizes = [1, 32], strides = [1, 1]} : vector<2x32xf32> to vector<1x32xf32>
    %26 = vector.broadcast %24 : vector<16x1xf32> to vector<16x32xf32>
    %27 = vector.broadcast %25 : vector<1x32xf32> to vector<16x32xf32>
    %28 = arith.mulf %26, %27 : vector<16x32xf32>
    %29 = arith.addf %22, %28 : vector<16x32xf32>
    %c0_5 = arith.constant 0 : index
    %c0_6 = arith.constant 0 : index
    %30 = vector.load %arg10[%c0_5, %c0_6] : memref<1x32xf32, #tpu.memory_space<vmem>>, vector<1x32xf32>
    %31 = vector.broadcast %30 : vector<1x32xf32> to vector<16x32xf32>
    %32 = arith.addf %29, %31 : vector<16x32xf32>
    %cst_7 = arith.constant 0.000000e+00 : f32
    %33 = vector.broadcast %cst_7 : f32 to vector<16x32xf32>
    %34 = arith.maximumf %32, %33 : vector<16x32xf32>
    %cst_8 = arith.constant dense<0.000000e+00> : vector<16xf32>
    %35 = vector.multi_reduction <add>, %34, %cst_8 [1] : vector<16x32xf32> to vector<16xf32>
    %36 = vector.shape_cast %35 : vector<16xf32> to vector<16x1xf32>
    %cst_9 = arith.constant 3.200000e+01 : f32
    %37 = vector.broadcast %cst_9 : f32 to vector<16x1xf32>
    %38 = arith.divf %36, %37 : vector<16x1xf32>
    %39 = vector.broadcast %38 : vector<16x1xf32> to vector<16x32xf32>
    %40 = arith.subf %34, %39 : vector<16x32xf32>
    %41 = arith.mulf %40, %40 : vector<16x32xf32>
    %cst_10 = arith.constant dense<0.000000e+00> : vector<16xf32>
    %42 = vector.multi_reduction <add>, %41, %cst_10 [1] : vector<16x32xf32> to vector<16xf32>
    %43 = vector.shape_cast %42 : vector<16xf32> to vector<16x1xf32>
    %cst_11 = arith.constant 3.200000e+01 : f32
    %44 = vector.broadcast %cst_11 : f32 to vector<16x1xf32>
    %45 = arith.divf %43, %44 : vector<16x1xf32>
    %46 = vector.broadcast %38 : vector<16x1xf32> to vector<16x32xf32>
    %47 = arith.subf %34, %46 : vector<16x32xf32>
    %cst_12 = arith.constant 9.99999974E-6 : f32
    %48 = vector.broadcast %cst_12 : f32 to vector<16x1xf32>
    %49 = arith.addf %45, %48 : vector<16x1xf32>
    %50 = math.rsqrt %49 : vector<16x1xf32>
    %51 = vector.broadcast %50 : vector<16x1xf32> to vector<16x32xf32>
    %52 = arith.mulf %47, %51 : vector<16x32xf32>
    %53 = arith.truncf %52 : vector<16x32xf32> to vector<16x32xbf16>
    %c0_13 = arith.constant 0 : index
    %c0_14 = arith.constant 0 : index
    %54 = vector.load %arg11[%c0_13, %c0_14] : memref<32x32xbf16, #tpu.memory_space<vmem>>, vector<32x32xbf16>
    %cst_15 = arith.constant dense<0.000000e+00> : vector<16x32xf32>
    %55 = tpu.matmul %53, %54, %cst_15 {dimension_numbers = #tpu.dot_dimension_numbers<[1], [0], [0], [1], [0, 0, 1, 1], [], []>} : vector<16x32xbf16>, vector<32x32xbf16>, vector<16x32xf32> -> vector<16x32xf32>
    %c0_16 = arith.constant 0 : index
    %c0_17 = arith.constant 0 : index
    %56 = vector.load %arg12[%c0_16, %c0_17] : memref<1x32xf32, #tpu.memory_space<vmem>>, vector<1x32xf32>
    %57 = vector.broadcast %56 : vector<1x32xf32> to vector<16x32xf32>
    %58 = arith.addf %55, %57 : vector<16x32xf32>
    %c0_18 = arith.constant 0 : index
    %c0_19 = arith.constant 0 : index
    %59 = vector.load %arg4[%c0_18, %c0_19] : memref<2x16xf32, #tpu.memory_space<vmem>>, vector<2x16xf32>
    %cst_20 = arith.constant dense<0.000000e+00> : vector<2x32xf32>
    %60 = tpu.matmul %59, %58, %cst_20 {dimension_numbers = #tpu.dot_dimension_numbers<[1], [0], [0], [1], [0, 0, 1, 1], [], []>} : vector<2x16xf32>, vector<16x32xf32>, vector<2x32xf32> -> vector<2x32xf32>
    %c0_21 = arith.constant 0 : index
    %c0_22 = arith.constant 0 : index
    %61 = vector.load %arg6[%c0_21, %c0_22] : memref<32x2xf32, #tpu.memory_space<vmem>>, vector<32x2xf32>
    %62 = vector.extract_strided_slice %61 {offsets = [0, 0], sizes = [32, 1], strides = [1, 1]} : vector<32x2xf32> to vector<32x1xf32>
    %63 = vector.extract_strided_slice %61 {offsets = [0, 1], sizes = [32, 1], strides = [1, 1]} : vector<32x2xf32> to vector<32x1xf32>
    %c0_23 = arith.constant 0 : index
    %c0_24 = arith.constant 0 : index
    %64 = vector.load %arg3[%c0_23, %c0_24] : memref<32x16xf32, #tpu.memory_space<vmem>>, vector<32x16xf32>
    %cst_25 = arith.constant dense<0.000000e+00> : vector<32x32xf32>
    %65 = tpu.matmul %64, %58, %cst_25 {dimension_numbers = #tpu.dot_dimension_numbers<[1], [0], [0], [1], [0, 0, 1, 1], [], []>} : vector<32x16xf32>, vector<16x32xf32>, vector<32x32xf32> -> vector<32x32xf32>
    %c0_26 = arith.constant 0 : index
    %c0_27 = arith.constant 0 : index
    %66 = vector.load %arg8[%c0_26, %c0_27] : memref<1x32xf32, #tpu.memory_space<vmem>>, vector<1x32xf32>
    %67 = vector.broadcast %63 : vector<32x1xf32> to vector<32x32xf32>
    %68 = vector.broadcast %66 : vector<1x32xf32> to vector<32x32xf32>
    %69 = arith.mulf %67, %68 : vector<32x32xf32>
    %70 = arith.addf %65, %69 : vector<32x32xf32>
    %c0_28 = arith.constant 0 : index
    %c0_29 = arith.constant 0 : index
    %71 = vector.load %arg13[%c0_28, %c0_29] : memref<1x32xf32, #tpu.memory_space<vmem>>, vector<1x32xf32>
    %c0_30 = arith.constant 0 : index
    %c0_31 = arith.constant 0 : index
    %72 = vector.load %arg14[%c0_30, %c0_31] : memref<1x32xf32, #tpu.memory_space<vmem>>, vector<1x32xf32>
    %cst_32 = arith.constant dense<0.000000e+00> : vector<32xf32>
    %73 = vector.multi_reduction <add>, %70, %cst_32 [1] : vector<32x32xf32> to vector<32xf32>
    %74 = vector.shape_cast %73 : vector<32xf32> to vector<32x1xf32>
    %cst_33 = arith.constant 3.200000e+01 : f32
    %75 = vector.broadcast %cst_33 : f32 to vector<32x1xf32>
    %76 = arith.divf %74, %75 : vector<32x1xf32>
    %77 = vector.broadcast %76 : vector<32x1xf32> to vector<32x32xf32>
    %78 = arith.subf %70, %77 : vector<32x32xf32>
    %79 = arith.mulf %78, %78 : vector<32x32xf32>
    %cst_34 = arith.constant dense<0.000000e+00> : vector<32xf32>
    %80 = vector.multi_reduction <add>, %79, %cst_34 [1] : vector<32x32xf32> to vector<32xf32>
    %81 = vector.shape_cast %80 : vector<32xf32> to vector<32x1xf32>
    %cst_35 = arith.constant 3.200000e+01 : f32
    %82 = vector.broadcast %cst_35 : f32 to vector<32x1xf32>
    %83 = arith.divf %81, %82 : vector<32x1xf32>
    %84 = vector.broadcast %76 : vector<32x1xf32> to vector<32x32xf32>
    %85 = arith.subf %70, %84 : vector<32x32xf32>
    %cst_36 = arith.constant 9.99999974E-6 : f32
    %86 = vector.broadcast %cst_36 : f32 to vector<32x1xf32>
    %87 = arith.addf %83, %86 : vector<32x1xf32>
    %88 = math.rsqrt %87 : vector<32x1xf32>
    %89 = vector.broadcast %88 : vector<32x1xf32> to vector<32x32xf32>
    %90 = arith.mulf %85, %89 : vector<32x32xf32>
    %91 = vector.broadcast %71 : vector<1x32xf32> to vector<32x32xf32>
    %92 = arith.mulf %90, %91 : vector<32x32xf32>
    %93 = vector.broadcast %72 : vector<1x32xf32> to vector<32x32xf32>
    %94 = arith.addf %92, %93 : vector<32x32xf32>
    %c0_37 = arith.constant 0 : index
    %c0_38 = arith.constant 0 : index
    %95 = vector.load %arg2[%c0_37, %c0_38] : memref<32x32xf32, #tpu.memory_space<vmem>>, vector<32x32xf32>
    %96 = arith.addf %94, %95 : vector<32x32xf32>
    %97 = arith.truncf %96 : vector<32x32xf32> to vector<32x32xbf16>
    %c0_39 = arith.constant 0 : index
    %c0_40 = arith.constant 0 : index
    %98 = vector.load %arg15[%c0_39, %c0_40] : memref<32x32xbf16, #tpu.memory_space<vmem>>, vector<32x32xbf16>
    %cst_41 = arith.constant dense<0.000000e+00> : vector<32x32xf32>
    %99 = tpu.matmul %97, %98, %cst_41 {dimension_numbers = #tpu.dot_dimension_numbers<[1], [0], [0], [1], [0, 0, 1, 1], [], []>} : vector<32x32xbf16>, vector<32x32xbf16>, vector<32x32xf32> -> vector<32x32xf32>
    %c0_42 = arith.constant 0 : index
    %c0_43 = arith.constant 0 : index
    %100 = vector.load %arg16[%c0_42, %c0_43] : memref<1x32xf32, #tpu.memory_space<vmem>>, vector<1x32xf32>
    %101 = vector.broadcast %100 : vector<1x32xf32> to vector<32x32xf32>
    %102 = arith.addf %99, %101 : vector<32x32xf32>
    %103 = arith.truncf %102 : vector<32x32xf32> to vector<32x32xbf16>
    %c0_44 = arith.constant 0 : index
    %c0_45 = arith.constant 0 : index
    %104 = vector.load %arg17[%c0_44, %c0_45] : memref<32x32xbf16, #tpu.memory_space<vmem>>, vector<32x32xbf16>
    %cst_46 = arith.constant dense<0.000000e+00> : vector<32x32xf32>
    %105 = tpu.matmul %103, %104, %cst_46 {dimension_numbers = #tpu.dot_dimension_numbers<[1], [0], [0], [1], [0, 0, 1, 1], [], []>} : vector<32x32xbf16>, vector<32x32xbf16>, vector<32x32xf32> -> vector<32x32xf32>
    %c0_47 = arith.constant 0 : index
    %c0_48 = arith.constant 0 : index
    %106 = vector.load %arg18[%c0_47, %c0_48] : memref<1x32xf32, #tpu.memory_space<vmem>>, vector<1x32xf32>
    %107 = vector.broadcast %106 : vector<1x32xf32> to vector<32x32xf32>
    %108 = arith.addf %105, %107 : vector<32x32xf32>
    %109 = arith.addf %96, %108 : vector<32x32xf32>
    %110 = arith.addf %70, %109 : vector<32x32xf32>
    %cst_49 = arith.constant dense<0.000000e+00> : vector<32xf32>
    %111 = vector.multi_reduction <add>, %110, %cst_49 [1] : vector<32x32xf32> to vector<32xf32>
    %112 = vector.shape_cast %111 : vector<32xf32> to vector<32x1xf32>
    %cst_50 = arith.constant 3.200000e+01 : f32
    %113 = vector.broadcast %cst_50 : f32 to vector<32x1xf32>
    %114 = arith.divf %112, %113 : vector<32x1xf32>
    %115 = vector.broadcast %114 : vector<32x1xf32> to vector<32x32xf32>
    %116 = arith.subf %110, %115 : vector<32x32xf32>
    %117 = arith.mulf %116, %116 : vector<32x32xf32>
    %cst_51 = arith.constant dense<0.000000e+00> : vector<32xf32>
    %118 = vector.multi_reduction <add>, %117, %cst_51 [1] : vector<32x32xf32> to vector<32xf32>
    %119 = vector.shape_cast %118 : vector<32xf32> to vector<32x1xf32>
    %cst_52 = arith.constant 3.200000e+01 : f32
    %120 = vector.broadcast %cst_52 : f32 to vector<32x1xf32>
    %121 = arith.divf %119, %120 : vector<32x1xf32>
    %122 = vector.broadcast %114 : vector<32x1xf32> to vector<32x32xf32>
    %123 = arith.subf %110, %122 : vector<32x32xf32>
    %cst_53 = arith.constant 9.99999974E-6 : f32
    %124 = vector.broadcast %cst_53 : f32 to vector<32x1xf32>
    %125 = arith.addf %121, %124 : vector<32x1xf32>
    %126 = math.rsqrt %125 : vector<32x1xf32>
    %127 = vector.broadcast %126 : vector<32x1xf32> to vector<32x32xf32>
    %128 = arith.mulf %123, %127 : vector<32x32xf32>
    %129 = arith.truncf %128 : vector<32x32xf32> to vector<32x32xbf16>
    %c0_54 = arith.constant 0 : index
    %c0_55 = arith.constant 0 : index
    %130 = vector.load %arg19[%c0_54, %c0_55] : memref<32x1024xbf16, #tpu.memory_space<vmem>>, vector<32x1024xbf16>
    %cst_56 = arith.constant dense<0.000000e+00> : vector<32x1024xf32>
    %131 = tpu.matmul %129, %130, %cst_56 {dimension_numbers = #tpu.dot_dimension_numbers<[1], [0], [0], [1], [0, 0, 1, 1], [], []>} : vector<32x32xbf16>, vector<32x1024xbf16>, vector<32x1024xf32> -> vector<32x1024xf32>
    %c0_57 = arith.constant 0 : index
    %c0_58 = arith.constant 0 : index
    %132 = vector.load %arg20[%c0_57, %c0_58] : memref<1x1024xf32, #tpu.memory_space<vmem>>, vector<1x1024xf32>
    %133 = vector.broadcast %132 : vector<1x1024xf32> to vector<32x1024xf32>
    %134 = arith.addf %131, %133 : vector<32x1024xf32>
    %cst_59 = arith.constant 0.000000e+00 : f32
    %135 = vector.broadcast %cst_59 : f32 to vector<32x1024xf32>
    %136 = arith.maximumf %134, %135 : vector<32x1024xf32>
    %137 = arith.truncf %136 : vector<32x1024xf32> to vector<32x1024xbf16>
    %c0_60 = arith.constant 0 : index
    %c0_61 = arith.constant 0 : index
    %138 = vector.load %arg21[%c0_60, %c0_61] : memref<1024x32xbf16, #tpu.memory_space<vmem>>, vector<1024x32xbf16>
    %cst_62 = arith.constant dense<0.000000e+00> : vector<32x32xf32>
    %139 = tpu.matmul %137, %138, %cst_62 {dimension_numbers = #tpu.dot_dimension_numbers<[1], [0], [0], [1], [0, 0, 1, 1], [], []>} : vector<32x1024xbf16>, vector<1024x32xbf16>, vector<32x32xf32> -> vector<32x32xf32>
    %c0_63 = arith.constant 0 : index
    %c0_64 = arith.constant 0 : index
    %140 = vector.load %arg22[%c0_63, %c0_64] : memref<1x32xf32, #tpu.memory_space<vmem>>, vector<1x32xf32>
    %141 = vector.broadcast %140 : vector<1x32xf32> to vector<32x32xf32>
    %142 = arith.addf %139, %141 : vector<32x32xf32>
    %143 = arith.addf %110, %142 : vector<32x32xf32>
    %c0_65 = arith.constant 0 : index
    %c0_66 = arith.constant 0 : index
    %144 = vector.load %arg23[%c0_65, %c0_66] : memref<1x32xf32, #tpu.memory_space<vmem>>, vector<1x32xf32>
    %c0_67 = arith.constant 0 : index
    %c0_68 = arith.constant 0 : index
    %145 = vector.load %arg24[%c0_67, %c0_68] : memref<1x32xf32, #tpu.memory_space<vmem>>, vector<1x32xf32>
    %cst_69 = arith.constant dense<0.000000e+00> : vector<32xf32>
    %146 = vector.multi_reduction <add>, %143, %cst_69 [1] : vector<32x32xf32> to vector<32xf32>
    %147 = vector.shape_cast %146 : vector<32xf32> to vector<32x1xf32>
    %cst_70 = arith.constant 3.200000e+01 : f32
    %148 = vector.broadcast %cst_70 : f32 to vector<32x1xf32>
    %149 = arith.divf %147, %148 : vector<32x1xf32>
    %150 = vector.broadcast %149 : vector<32x1xf32> to vector<32x32xf32>
    %151 = arith.subf %143, %150 : vector<32x32xf32>
    %152 = arith.mulf %151, %151 : vector<32x32xf32>
    %cst_71 = arith.constant dense<0.000000e+00> : vector<32xf32>
    %153 = vector.multi_reduction <add>, %152, %cst_71 [1] : vector<32x32xf32> to vector<32xf32>
    %154 = vector.shape_cast %153 : vector<32xf32> to vector<32x1xf32>
    %cst_72 = arith.constant 3.200000e+01 : f32
    %155 = vector.broadcast %cst_72 : f32 to vector<32x1xf32>
    %156 = arith.divf %154, %155 : vector<32x1xf32>
    %157 = vector.broadcast %149 : vector<32x1xf32> to vector<32x32xf32>
    %158 = arith.subf %143, %157 : vector<32x32xf32>
    %cst_73 = arith.constant 9.99999974E-6 : f32
    %159 = vector.broadcast %cst_73 : f32 to vector<32x1xf32>
    %160 = arith.addf %156, %159 : vector<32x1xf32>
    %161 = math.rsqrt %160 : vector<32x1xf32>
    %162 = vector.broadcast %161 : vector<32x1xf32> to vector<32x32xf32>
    %163 = arith.mulf %158, %162 : vector<32x32xf32>
    %164 = vector.broadcast %144 : vector<1x32xf32> to vector<32x32xf32>
    %165 = arith.mulf %163, %164 : vector<32x32xf32>
    %166 = vector.broadcast %145 : vector<1x32xf32> to vector<32x32xf32>
    %167 = arith.addf %165, %166 : vector<32x32xf32>
    %168 = arith.truncf %167 : vector<32x32xf32> to vector<32x32xbf16>
    %c0_74 = arith.constant 0 : index
    %c0_75 = arith.constant 0 : index
    %169 = vector.load %arg25[%c0_74, %c0_75] : memref<32x32xbf16, #tpu.memory_space<vmem>>, vector<32x32xbf16>
    %cst_76 = arith.constant dense<0.000000e+00> : vector<32x32xf32>
    %170 = tpu.matmul %168, %169, %cst_76 {dimension_numbers = #tpu.dot_dimension_numbers<[1], [0], [0], [1], [0, 0, 1, 1], [], []>} : vector<32x32xbf16>, vector<32x32xbf16>, vector<32x32xf32> -> vector<32x32xf32>
    %c0_77 = arith.constant 0 : index
    %c0_78 = arith.constant 0 : index
    %171 = vector.load %arg26[%c0_77, %c0_78] : memref<1x32xf32, #tpu.memory_space<vmem>>, vector<1x32xf32>
    %172 = vector.broadcast %171 : vector<1x32xf32> to vector<32x32xf32>
    %173 = arith.addf %170, %172 : vector<32x32xf32>
    %cst_79 = arith.constant 0.000000e+00 : f32
    %174 = vector.broadcast %cst_79 : f32 to vector<32x32xf32>
    %175 = arith.maximumf %173, %174 : vector<32x32xf32>
    %176 = arith.truncf %175 : vector<32x32xf32> to vector<32x32xbf16>
    %c0_80 = arith.constant 0 : index
    %c0_81 = arith.constant 0 : index
    %177 = vector.load %arg27[%c0_80, %c0_81] : memref<32x16xbf16, #tpu.memory_space<vmem>>, vector<32x16xbf16>
    %cst_82 = arith.constant dense<0.000000e+00> : vector<32x16xf32>
    %178 = tpu.matmul %176, %177, %cst_82 {dimension_numbers = #tpu.dot_dimension_numbers<[1], [0], [0], [1], [0, 0, 1, 1], [], []>} : vector<32x32xbf16>, vector<32x16xbf16>, vector<32x16xf32> -> vector<32x16xf32>
    %c0_83 = arith.constant 0 : index
    %c0_84 = arith.constant 0 : index
    %179 = vector.load %arg28[%c0_83, %c0_84] : memref<1x16xf32, #tpu.memory_space<vmem>>, vector<1x16xf32>
    %180 = vector.broadcast %179 : vector<1x16xf32> to vector<32x16xf32>
    %181 = arith.addf %178, %180 : vector<32x16xf32>
    %cst_85 = arith.constant 0.000000e+00 : f32
    %182 = vector.broadcast %cst_85 : f32 to vector<32x16xf32>
    %183 = arith.maximumf %181, %182 : vector<32x16xf32>
    %184 = arith.truncf %183 : vector<32x16xf32> to vector<32x16xbf16>
    %c0_86 = arith.constant 0 : index
    %c0_87 = arith.constant 0 : index
    %185 = vector.load %arg29[%c0_86, %c0_87] : memref<16x2xbf16, #tpu.memory_space<vmem>>, vector<16x2xbf16>
    %cst_88 = arith.constant dense<0.000000e+00> : vector<32x2xf32>
    %186 = tpu.matmul %184, %185, %cst_88 {dimension_numbers = #tpu.dot_dimension_numbers<[1], [0], [0], [1], [0, 0, 1, 1], [], []>} : vector<32x16xbf16>, vector<16x2xbf16>, vector<32x2xf32> -> vector<32x2xf32>
    %c0_89 = arith.constant 0 : index
    %c0_90 = arith.constant 0 : index
    %187 = vector.load %arg30[%c0_89, %c0_90] : memref<1x2xf32, #tpu.memory_space<vmem>>, vector<1x2xf32>
    %188 = vector.broadcast %187 : vector<1x2xf32> to vector<32x2xf32>
    %189 = arith.addf %186, %188 : vector<32x2xf32>
    %190 = vector.extract_strided_slice %189 {offsets = [0, 1], sizes = [32, 1], strides = [1, 1]} : vector<32x2xf32> to vector<32x1xf32>
    %c0_91 = arith.constant 0 : index
    %c0_92 = arith.constant 0 : index
    %191 = vector.load %arg5[%c0_91, %c0_92] : memref<2x32xf32, #tpu.memory_space<vmem>>, vector<2x32xf32>
    %192 = vector.broadcast %62 : vector<32x1xf32> to vector<32x2xf32>
    %193 = arith.mulf %189, %192 : vector<32x2xf32>
    %cst_93 = arith.constant dense<0.000000e+00> : vector<2x2xf32>
    %194 = tpu.matmul %191, %193, %cst_93 {dimension_numbers = #tpu.dot_dimension_numbers<[1], [0], [0], [1], [0, 0, 1, 1], [], []>} : vector<2x32xf32>, vector<32x2xf32>, vector<2x2xf32> -> vector<2x2xf32>
    %195 = vector.broadcast %62 : vector<32x1xf32> to vector<32x32xf32>
    %196 = arith.mulf %167, %195 : vector<32x32xf32>
    %cst_94 = arith.constant dense<0.000000e+00> : vector<2x32xf32>
    %197 = tpu.matmul %191, %196, %cst_94 {dimension_numbers = #tpu.dot_dimension_numbers<[1], [0], [0], [1], [0, 0, 1, 1], [], []>} : vector<2x32xf32>, vector<32x32xf32>, vector<2x32xf32> -> vector<2x32xf32>
    %c0_95 = arith.constant 0 : index
    %c0_96 = arith.constant 0 : index
    %198 = vector.load %arg7[%c0_95, %c0_96] : memref<32x8xf32, #tpu.memory_space<vmem>>, vector<32x8xf32>
    %199 = vector.broadcast %190 : vector<32x1xf32> to vector<32x8xf32>
    %200 = arith.mulf %199, %198 : vector<32x8xf32>
    %cst_97 = arith.constant dense<0.000000e+00> : vector<2x8xf32>
    %201 = tpu.matmul %191, %200, %cst_97 {dimension_numbers = #tpu.dot_dimension_numbers<[1], [0], [0], [1], [0, 0, 1, 1], [], []>} : vector<2x32xf32>, vector<32x8xf32>, vector<2x8xf32> -> vector<2x8xf32>
    %cst_98 = arith.constant 0.000000e+00 : f32
    %202 = vector.broadcast %cst_98 : f32 to vector<2x128xf32>
    %c0_99 = arith.constant 0 : index
    %c0_100 = arith.constant 0 : index
    %203 = vector.load %arg33[%c0_99, %c0_100] : memref<2x128xf32, #tpu.memory_space<vmem>>, vector<2x128xf32>
    tpu.vector_store %arg33[%c0_99, %c0_100], %202 {strides = array<i32>} : memref<2x128xf32, #tpu.memory_space<vmem>>, vector<2x128xf32>,
    %204 = vector.extract_strided_slice %194 {offsets = [0, 0], sizes = [2, 1], strides = [1, 1]} : vector<2x2xf32> to vector<2x1xf32>
    %c0_101 = arith.constant 0 : index
    %c0_102 = arith.constant 0 : index
    %205 = vector.load %arg33[%c0_101, %c0_102] : memref<2x128xf32, #tpu.memory_space<vmem>>, vector<2x1xf32>
    tpu.vector_store %arg33[%c0_101, %c0_102], %204 {strides = array<i32>} : memref<2x128xf32, #tpu.memory_space<vmem>>, vector<2x1xf32>,
    %c0_103 = arith.constant 0 : index
    %c1 = arith.constant 1 : index
    %206 = vector.load %arg33[%c0_103, %c1] : memref<2x128xf32, #tpu.memory_space<vmem>>, vector<2x32xf32>
    tpu.vector_store %arg33[%c0_103, %c1], %197 {strides = array<i32>} : memref<2x128xf32, #tpu.memory_space<vmem>>, vector<2x32xf32>,
    %c0_104 = arith.constant 0 : index
    %c33 = arith.constant 33 : index
    %207 = vector.load %arg33[%c0_104, %c33] : memref<2x128xf32, #tpu.memory_space<vmem>>, vector<2x8xf32>
    tpu.vector_store %arg33[%c0_104, %c33], %201 {strides = array<i32>} : memref<2x128xf32, #tpu.memory_space<vmem>>, vector<2x8xf32>,
    %c0_105 = arith.constant 0 : index
    %c41 = arith.constant 41 : index
    %208 = vector.load %arg33[%c0_105, %c41] : memref<2x128xf32, #tpu.memory_space<vmem>>, vector<2x32xf32>
    tpu.vector_store %arg33[%c0_105, %c41], %60 {strides = array<i32>} : memref<2x128xf32, #tpu.memory_space<vmem>>, vector<2x32xf32>,
    %209 = arith.truncf %60 : vector<2x32xf32> to vector<2x32xbf16>
    %c0_106 = arith.constant 0 : index
    %c0_107 = arith.constant 0 : index
    %210 = vector.load %arg31[%c0_106, %c0_107] : memref<32x6272xbf16, #tpu.memory_space<vmem>>, vector<32x6272xbf16>
    %cst_108 = arith.constant dense<0.000000e+00> : vector<2x6272xf32>
    %211 = tpu.matmul %209, %210, %cst_108 {dimension_numbers = #tpu.dot_dimension_numbers<[1], [0], [0], [1], [0, 0, 1, 1], [], []>} : vector<2x32xbf16>, vector<32x6272xbf16>, vector<2x6272xf32> -> vector<2x6272xf32>
    %c0_109 = arith.constant 0 : index
    %c0_110 = arith.constant 0 : index
    %212 = vector.load %arg32[%c0_109, %c0_110] : memref<1x6272xf32, #tpu.memory_space<vmem>>, vector<1x6272xf32>
    %213 = vector.broadcast %212 : vector<1x6272xf32> to vector<2x6272xf32>
    %214 = arith.addf %211, %213 : vector<2x6272xf32>
    %c0_111 = arith.constant 0 : index
    %c0_112 = arith.constant 0 : index
    %215 = vector.load %arg34[%c0_111, %c0_112] : memref<2x6272xf32, #tpu.memory_space<vmem>>, vector<2x6272xf32>
    tpu.vector_store %arg34[%c0_111, %c0_112], %214 {strides = array<i32>} : memref<2x6272xf32, #tpu.memory_space<vmem>>, vector<2x6272xf32>,
    return
  }
  func.func @transform_0(%arg0: i32) -> (i32, i32) {
    %c0_i32 = arith.constant 0 : i32
    %c0_i32_0 = arith.constant 0 : i32
    %c0_i32_1 = arith.constant 0 : i32
    return %c0_i32, %c0_i32_0 : i32, i32
  }
  func.func @transform_1(%arg0: i32) -> (i32, i32) {
    %c0_i32 = arith.constant 0 : i32
    %c0_i32_0 = arith.constant 0 : i32
    %c0_i32_1 = arith.constant 0 : i32
    return %c0_i32, %c0_i32_0 : i32, i32
  }
  func.func @transform_2(%arg0: i32) -> (i32, i32) {
    %c0_i32 = arith.constant 0 : i32
    %c0_i32_0 = arith.constant 0 : i32
    %c0_i32_1 = arith.constant 0 : i32
    return %c0_i32, %c0_i32_0 : i32, i32
  }
  func.func @transform_3(%arg0: i32) -> (i32, i32) {
    %c0_i32 = arith.constant 0 : i32
    %c0_i32_0 = arith.constant 0 : i32
    %c0_i32_1 = arith.constant 0 : i32
    return %c0_i32, %c0_i32_0 : i32, i32
  }
  func.func @transform_4(%arg0: i32) -> (i32, i32) {
    %c0_i32 = arith.constant 0 : i32
    %c0_i32_0 = arith.constant 0 : i32
    %c0_i32_1 = arith.constant 0 : i32
    return %c0_i32, %c0_i32_0 : i32, i32
  }
  func.func @transform_5(%arg0: i32) -> (i32, i32) {
    %c0_i32 = arith.constant 0 : i32
    %c0_i32_0 = arith.constant 0 : i32
    %c0_i32_1 = arith.constant 0 : i32
    return %c0_i32, %c0_i32_0 : i32, i32
  }
  func.func @transform_6(%arg0: i32) -> (i32, i32) {
    %c0_i32 = arith.constant 0 : i32
    %c0_i32_0 = arith.constant 0 : i32
    %c0_i32_1 = arith.constant 0 : i32
    return %c0_i32, %c0_i32_0 : i32, i32
  }
  func.func @transform_7(%arg0: i32) -> (i32, i32) {
    %c0_i32 = arith.constant 0 : i32
    %c0_i32_0 = arith.constant 0 : i32
    %c0_i32_1 = arith.constant 0 : i32
    return %c0_i32, %c0_i32_0 : i32, i32
  }
  func.func @transform_8(%arg0: i32) -> (i32, i32) {
    %c0_i32 = arith.constant 0 : i32
    %c0_i32_0 = arith.constant 0 : i32
    %c0_i32_1 = arith.constant 0 : i32
    return %c0_i32, %c0_i32_0 : i32, i32
  }
  func.func @transform_9(%arg0: i32) -> (i32, i32) {
    %c0_i32 = arith.constant 0 : i32
    %c0_i32_0 = arith.constant 0 : i32
    %c0_i32_1 = arith.constant 0 : i32
    return %c0_i32, %c0_i32_0 : i32, i32
  }
  func.func @transform_10(%arg0: i32) -> (i32, i32) {
    %c0_i32 = arith.constant 0 : i32
    %c0_i32_0 = arith.constant 0 : i32
    %c0_i32_1 = arith.constant 0 : i32
    return %c0_i32, %c0_i32_0 : i32, i32
  }
  func.func @transform_11(%arg0: i32) -> (i32, i32) {
    %c0_i32 = arith.constant 0 : i32
    %c0_i32_0 = arith.constant 0 : i32
    %c0_i32_1 = arith.constant 0 : i32
    return %c0_i32, %c0_i32_0 : i32, i32
  }
  func.func @transform_12(%arg0: i32) -> (i32, i32) {
    %c0_i32 = arith.constant 0 : i32
    %c0_i32_0 = arith.constant 0 : i32
    %c0_i32_1 = arith.constant 0 : i32
    return %c0_i32, %c0_i32_0 : i32, i32
  }
  func.func @transform_13(%arg0: i32) -> (i32, i32) {
    %c0_i32 = arith.constant 0 : i32
    %c0_i32_0 = arith.constant 0 : i32
    %c0_i32_1 = arith.constant 0 : i32
    return %c0_i32, %c0_i32_0 : i32, i32
  }
  func.func @transform_14(%arg0: i32) -> (i32, i32) {
    %c0_i32 = arith.constant 0 : i32
    %c0_i32_0 = arith.constant 0 : i32
    %c0_i32_1 = arith.constant 0 : i32
    return %c0_i32, %c0_i32_0 : i32, i32
  }
  func.func @transform_15(%arg0: i32) -> (i32, i32) {
    %c0_i32 = arith.constant 0 : i32
    %c0_i32_0 = arith.constant 0 : i32
    %c0_i32_1 = arith.constant 0 : i32
    return %c0_i32, %c0_i32_0 : i32, i32
  }
  func.func @transform_16(%arg0: i32) -> (i32, i32) {
    %c0_i32 = arith.constant 0 : i32
    %c0_i32_0 = arith.constant 0 : i32
    %c0_i32_1 = arith.constant 0 : i32
    return %c0_i32, %c0_i32_0 : i32, i32
  }
  func.func @transform_17(%arg0: i32) -> (i32, i32) {
    %c0_i32 = arith.constant 0 : i32
    %c0_i32_0 = arith.constant 0 : i32
    %c0_i32_1 = arith.constant 0 : i32
    return %c0_i32, %c0_i32_0 : i32, i32
  }
  func.func @transform_18(%arg0: i32) -> (i32, i32) {
    %c0_i32 = arith.constant 0 : i32
    %c0_i32_0 = arith.constant 0 : i32
    %c0_i32_1 = arith.constant 0 : i32
    return %c0_i32, %c0_i32_0 : i32, i32
  }
  func.func @transform_19(%arg0: i32) -> (i32, i32) {
    %c0_i32 = arith.constant 0 : i32
    %c0_i32_0 = arith.constant 0 : i32
    %c0_i32_1 = arith.constant 0 : i32
    return %c0_i32, %c0_i32_0 : i32, i32
  }
  func.func @transform_20(%arg0: i32) -> (i32, i32) {
    %c0_i32 = arith.constant 0 : i32
    %c0_i32_0 = arith.constant 0 : i32
    %c0_i32_1 = arith.constant 0 : i32
    return %c0_i32, %c0_i32_0 : i32, i32
  }
  func.func @transform_21(%arg0: i32) -> (i32, i32) {
    %c0_i32 = arith.constant 0 : i32
    %c0_i32_0 = arith.constant 0 : i32
    %c0_i32_1 = arith.constant 0 : i32
    return %c0_i32, %c0_i32_0 : i32, i32
  }
  func.func @transform_22(%arg0: i32) -> (i32, i32) {
    %c0_i32 = arith.constant 0 : i32
    %c0_i32_0 = arith.constant 0 : i32
    %c0_i32_1 = arith.constant 0 : i32
    return %c0_i32, %c0_i32_0 : i32, i32
  }
  func.func @transform_23(%arg0: i32) -> (i32, i32) {
    %c0_i32 = arith.constant 0 : i32
    %c0_i32_0 = arith.constant 0 : i32
    %c0_i32_1 = arith.constant 0 : i32
    return %c0_i32, %c0_i32_0 : i32, i32
  }
  func.func @transform_24(%arg0: i32) -> (i32, i32) {
    %c0_i32 = arith.constant 0 : i32
    %c0_i32_0 = arith.constant 0 : i32
    %c0_i32_1 = arith.constant 0 : i32
    return %c0_i32, %c0_i32_0 : i32, i32
  }
  func.func @transform_25(%arg0: i32) -> (i32, i32) {
    %c0_i32 = arith.constant 0 : i32
    %c0_i32_0 = arith.constant 0 : i32
    %c0_i32_1 = arith.constant 0 : i32
    return %c0_i32, %c0_i32_0 : i32, i32
  }
  func.func @transform_26(%arg0: i32) -> (i32, i32) {
    %c0_i32 = arith.constant 0 : i32
    %c0_i32_0 = arith.constant 0 : i32
    %c0_i32_1 = arith.constant 0 : i32
    return %c0_i32, %c0_i32_0 : i32, i32
  }
  func.func @transform_27(%arg0: i32) -> (i32, i32) {
    %c0_i32 = arith.constant 0 : i32
    %c0_i32_0 = arith.constant 0 : i32
    %c0_i32_1 = arith.constant 0 : i32
    return %c0_i32, %c0_i32_0 : i32, i32
  }
  func.func @transform_28(%arg0: i32) -> (i32, i32) {
    %c0_i32 = arith.constant 0 : i32
    %c0_i32_0 = arith.constant 0 : i32
    %c0_i32_1 = arith.constant 0 : i32
    return %c0_i32, %c0_i32_0 : i32, i32
  }
  func.func @transform_29(%arg0: i32) -> (i32, i32) {
    %c0_i32 = arith.constant 0 : i32
    %c0_i32_0 = arith.constant 0 : i32
    %c0_i32_1 = arith.constant 0 : i32
    return %c0_i32, %c0_i32_0 : i32, i32
  }
  func.func @transform_30(%arg0: i32) -> (i32, i32) {
    %c0_i32 = arith.constant 0 : i32
    %c0_i32_0 = arith.constant 0 : i32
    %c0_i32_1 = arith.constant 0 : i32
    return %c0_i32, %c0_i32_0 : i32, i32
  }
  func.func @transform_31(%arg0: i32) -> (i32, i32) {
    %c0_i32 = arith.constant 0 : i32
    %c0_i32_0 = arith.constant 0 : i32
    %c0_i32_1 = arith.constant 0 : i32
    return %c0_i32, %c0_i32_0 : i32, i32
  }
  func.func @transform_32(%arg0: i32) -> (i32, i32) {
    %c0_i32 = arith.constant 0 : i32
    %c0_i32_0 = arith.constant 0 : i32
    %c0_i32_1 = arith.constant 0 : i32
    return %c0_i32, %c0_i32_0 : i32, i32
  }
  func.func @transform_33(%arg0: i32) -> (i32, i32) {
    %c0_i32 = arith.constant 0 : i32
    %c0_i32_0 = arith.constant 0 : i32
    %c0_i32_1 = arith.constant 0 : i32
    return %c0_i32, %c0_i32_0 : i32, i32
  }
}

</mosaic_0001>

<bundles_post_ra>
// kernel: forward.1
= control target key start
LH: loop header
LB: loop body
LE: loop exit
PB: predicated region body
PF: predicated region fallthrough
CT: control target
= control target key end

     0   :  { %s5651_s6 = smov 1   ;;  %s5652_s10 = smov 2   ;;  %s6620_s0 = inlined_call_operand.smem [shape: u32[34], index: -1, kind: input, shape index: {}] }
   0x1   :  { %s5704_s5 = sld [smem:[%s6620_s0]]   ;;  %s5653_s14 = smov 3  }
   0x2   :  { %s5709_s9 = sld [smem:[%s6620_s0 + %s5651_s6]]   ;;  %s5654_s18 = smov 4  }
   0x3   :  { %s5714_s13 = sld [smem:[%s6620_s0 + %s5652_s10]]   ;;  %s5655_s22 = smov 5  }
   0x4   :  { %s5719_s17 = sld [smem:[%s6620_s0 + %s5653_s14]]   ;;  %s5656_s26 = smov 6  }
   0x5   :  { %s5724_s21 = sld [smem:[%s6620_s0 + %s5654_s18]]   ;;  %s5657_s30 = smov 7  }
   0x6   :  { %s5729_s25 = sld [smem:[%s6620_s0 + %s5655_s22]]   ;;  %s5658_s4 = smov 8  }
   0x7   :  { %s5734_s29 = sld [smem:[%s6620_s0 + %s5656_s26]]   ;;  %s5659_s10 = smov 9  }
   0x8   :  { %s5739_s3 = sld [smem:[%s6620_s0 + %s5657_s30]]   ;;  %s5660_s15 = smov 10  }
   0x9   :  { %s5744_s8 = sld [smem:[%s6620_s0 + %s5658_s4]]   ;;  %s5661_s20 = smov 11  }
   0xa   :  { %s5749_s14 = sld [smem:[%s6620_s0 + %s5659_s10]]   ;;  %s5662_s26 = smov 12  }
   0xb   :  { %6626 = sst [smem:[#allocation5_spill]] %s5724_s21  ;;  %s5663_s1 = smov 13  }
   0xc   :  { %s5754_s19 = sld [smem:[%s6620_s0 + %s5660_s15]]   ;;  %s5664_s7 = smov 14  }
   0xd   :  { %6627 = sst [smem:[#allocation6_spill]] %s5734_s29  ;;  %s5665_s15 = smov 15  }
   0xe   :  { %s5759_s24 = sld [smem:[%s6620_s0 + %s5661_s20]]   ;;  %s5666_s22 = smov 16  }
   0xf   :  { %s5764_s30 = sld [smem:[%s6620_s0 + %s5662_s26]]   ;;  %s5667_s28 = smov 17  }
  0x10   :  { %s5769_s6 = sld [smem:[%s6620_s0 + %s5663_s1]]   ;;  %s5681_s16 = smov 31  }
  0x11   :  { %s5774_s12 = sld [smem:[%s6620_s0 + %s5664_s7]]   ;;  %s5668_s7 = smov 18  }
  0x12   :  { %s5779_s20 = sld [smem:[%s6620_s0 + %s5665_s15]]   ;;  %s5669_s15 = smov 19  }
  0x13   :  { %s5784_s27 = sld [smem:[%s6620_s0 + %s5666_s22]]   ;;  %s5670_s22 = smov 20  }
  0x14   :  { %s5789_s4 = sld [smem:[%s6620_s0 + %s5667_s28]]   ;;  %s5671_s28 = smov 21  }
  0x15   :  { %s5794_s29 = sld [smem:[%s6620_s0 + %s5668_s7]]   ;;  %s5672_s7 = smov 22  }
  0x16   :  { %s5799_s21 = sld [smem:[%s6620_s0 + %s5669_s15]]   ;;  %s5673_s15 = smov 23  }
  0x17   :  { %s5682_s23 = smov 32   ;;  %s5683_s1 = smov 33  }
  0x18   :  { %6628 = sst [smem:[#allocation7_spill]] %s5779_s20 }
  0x19   :  { %s5804_s20 = sld [smem:[%s6620_s0 + %s5670_s22]]   ;;  %s5674_s22 = smov 24  }
  0x1a   :  { %6629 = sst [smem:[#allocation8_spill]] %s5789_s4 }
  0x1b   :  { %6630 = sst [smem:[#allocation9_spill]] %s5794_s29 }
  0x1c   :  { %6631 = sst [smem:[#allocation10_spill]] %s5799_s21 }
  0x1d   :  { %s5809_s4 = sld [smem:[%s6620_s0 + %s5671_s28]]   ;;  %s5675_s28 = smov 25  }
  0x1e   :  { %s5814_s29 = sld [smem:[%s6620_s0 + %s5672_s7]]   ;;  %s5676_s7 = smov 26  }
  0x1f   :  { %6632 = sst [smem:[#allocation11_spill]] %s5804_s20 }
  0x20   :  { %s5819_s21 = sld [smem:[%s6620_s0 + %s5673_s15]]   ;;  %s5677_s15 = smov 27  }
  0x21   :  { %s5824_s20 = sld [smem:[%s6620_s0 + %s5674_s22]]   ;;  %s5678_s22 = smov 28  }
  0x23   :  { %6633 = sst [smem:[#allocation12_spill]] %s5809_s4 }
  0x24   :  { %6634 = sst [smem:[#allocation13_spill]] %s5814_s29 }
  0x25   :  { %s5829_s4 = sld [smem:[%s6620_s0 + %s5675_s28]]   ;;  %s5679_s28 = smov 29  }
  0x26   :  { %6635 = sst [smem:[#allocation14_spill]] %s5819_s21 }
  0x27   :  { %6636 = sst [smem:[#allocation15_spill]] %s5824_s20 }
  0x28   :  { %s5834_s29 = sld [smem:[%s6620_s0 + %s5676_s7]]   ;;  %s5680_s7 = smov 30  }
  0x29   :  { %s5839_s21 = sld [smem:[%s6620_s0 + %s5677_s15]]  }
  0x2a   :  { %s5844_s20 = sld [smem:[%s6620_s0 + %s5678_s22]]  }
  0x2b   :  { %6637 = sst [smem:[#allocation16_spill]] %s5829_s4 }
  0x2c   :  { %s5849_s4 = sld [smem:[%s6620_s0 + %s5679_s28]]  }
  0x2e   :  { %6638 = sst [smem:[#allocation17_spill]] %s5834_s29 }
  0x2f   :  { %6639 = sst [smem:[#allocation18_spill]] %s5839_s21 }
  0x30   :  { %6640 = sst [smem:[#allocation19_spill]] %s5844_s20 }
  0x31   :  { %s4794_s29 = sld [smem:[%s6620_s0 + %s5680_s7]]  }
  0x32   :  { %6641 = sst [smem:[#allocation20_spill]] %s5849_s4 }
  0x33   :  { %s5857_s21 = sld [smem:[%s6620_s0 + %s5681_s16]]  }
  0x34   :  { %s5862_s20 = sld [smem:[%s6620_s0 + %s5682_s23]]  }
  0x35   :  { %s5867_s4 = sld [smem:[%s6620_s0 + %s5683_s1]]  }
  0x36   :  { %73 = vsyncpa [#allocation3], 0  ;;  %s5684_s7 = smov [#allocation2]  }
  0x37   :  { %s139_s10 = sshll.u32 %s5684_s7, 4  ;;  %s140_s10 = int_to_ptr.vmem [resolvable:$true] %s139_s10 }
  0x38   :  { %s5637_s11 = scalar_lea.vmem %s140_s10, 12544  ;;  %p5642_p1 = scmp.lt.s32.totalorder %s140_s10, %s140_s10 }
  0x39   :  { %p5638_p0 = scmp.ne.s32.totalorder %s140_s10, %s5637_s11  ;;  %p5643_p2 = scmp.lt.s32.totalorder %s5637_s11, %s5637_s11 }
  0x3b   :  { %p5644_p3 = por %p5643_p2, %p5642_p1 }
  0x3d   :  { %p5645_p4 = pnand %p5644_p3, %p5638_p0 }
  0x3f   :  { %5648 = shalt.err (!%p5645_p4)
}
  0x40   :  { %s5685_s16 = smov 3136   ;;  %s5686_s15 = smov 196  }
  0x41   :  { %145 = dma.hbm_to_vmem [thread:$0]  %s4794_s29, 12544, %s140_s10, [#allocation3], %s5685_s16, %s5685_s16, %s5686_s15  }
  0x42   :  { %5649 = dma.done.wait [#allocation3], 12544  }
  0x43   :  { %5650 = vsyncadd [#allocation3], 4294954752  ;;  %v152_v0 = vld [vmem:[%s5704_s5] sm:$0xff]  ;;  %v153_v1 = vld [vmem:[%s5704_s5 + $0x8] sm:$0xff]  ;;  %s5687_s0 = smov 127   ;;  %s5688_s18 = smov 1   ;;  %v211_v36 = vlaneseq }
  0x44   :  { %156 = vrot.lane.b32.xlu0 %v152_v0, %s5687_s0  ;;  %v5689_v14 = vmov 0   ;;  %v5690_v31 = vmov 1   ;;  %v198_v40 = vld [vmem:[%s5744_s8] sm:$0x3]  ;;  %vm256_vm0 = vcmask 261120   ;;  %vm5692_vm1 = vmmov 0  }
  0x45   :  { %5364 = vset.pattern.permute.xlu0 %v5689_v14  ;;  %5365 = vset.pattern.permute.xlu1 %v5689_v14  ;;  %v5879_v37 = vshrl.u32 %v211_v36, 7  ;;  %v4798_v48 = vld [vmem:[%s5749_s14] ss:$0 sm:$0xff]  ;;  %vm353_vm2 = vcmask 130048   ;;  %v433_v36 = vld [vmem:[%s5714_s13 + $0x10] sm:$0xff]  ;;  %s6642_s5 = sld [smem:[#allocation7_spill]] }
  0x46   :  { %s6646_s29 = sld [smem:[#allocation10_spill]]  ;;  %vm2571_vm3 = vcmask 1024   ;;  %vm2577_vm4 = vcmask 263176   ;;  %vm2583_vm5 = vcmask 328968   ;;  %vm2589_vm6 = vcmask 591176  }
  0x47   :  { %v5882_v38 = vsub.s32 0, %v5879_v37  ;;  %v5885_v39 = vsub.s32 1, %v5879_v37  ;;  %s6648_s8 = sld [smem:[#allocation15_spill]] }
  0x48   :  { %158 = vrot.lane.b32.xlu0 %v153_v1, %s5687_s0  ;;  %s6649_s14 = sld [smem:[#allocation17_spill]] }
  0x49   :  { %v214_v42 = vrot.slane %v198_v40, %v5882_v38  ;;  %v240_v43 = vrot.slane %v198_v40, %v5885_v39  ;;  %v434_v40 = vld [vmem:[%s5714_s13 + $0x18] sm:$0xff]  ;;  %s6656_s23 = sld [smem:[#allocation20_spill]] }
  0x4a   :  { %s6657_s22 = sld [smem:[#allocation6_spill]] }
  0xb6   :  { %v157_v2 = vpop.permute.xlu0 %156 }
  0xb7   :  { %v162_v3 = vadd.f32 %v157_v2, %v152_v0 }
  0xb9   :  { %v164_v4 = vmul.f32 0.5, %v162_v3 }
  0xba   :  { %v159_v5 = vpop.permute.xlu0 %158 }
  0xbb   :  { %v163_v6 = vadd.f32 %v159_v5, %v153_v1  ;;  %172 = vrot.lane.b32.xlu1 %v164_v4, %s5688_s18  ;;  %v166_v15 = vsub.f32 %v152_v0, %v164_v4 }
  0xbd   :  { %v165_v7 = vmul.f32 0.5, %v163_v6  ;;  %v168_v17 = vmul.f32 %v166_v15, %v166_v15  ;;  %v427_v6 = vld [vmem:[%s5729_s25] sm:$0xff] }
  0xbf   :  { %174 = vrot.lane.b32.xlu1 %v165_v7, %s5688_s18  ;;  %v167_v16 = vsub.f32 %v153_v1, %v165_v7  ;;  %v429_v7 = vld [vmem:[%s5729_s25 + $0x10] sm:$0xff] }
  0xc1   :  { %v169_v21 = vmul.f32 %v167_v16, %v167_v16 }
 0x12d   :  { %v173_v8 = vpop.permute.xlu1 %172 }
 0x12e   :  { %v178_v9 = vsub.f32 %v152_v0, %v173_v8  ;;  %v430_v8 = vld [vmem:[%s5729_s25 + $0x18] sm:$0xff] }
 0x130   :  { %v180_v10 = vmul.f32 %v178_v9, %v178_v9 }
 0x131   :  { %v175_v11 = vpop.permute.xlu1 %174 }
 0x132   :  { %v179_v12 = vsub.f32 %v153_v1, %v175_v11  ;;  %184 = vrot.lane.b32.xlu0 %v180_v10, %s5687_s0  ;;  %v428_v10 = vld [vmem:[%s5729_s25 + $0x8] sm:$0xff]  ;;  %v5691_v11 = vmov 0.0  }
 0x133   :  { %5215 = vmatprep.subr.bf16.mxu0 %v5691_v11  ;;  %2570 = vst [vmem:[%s5862_s20] sm:$0x3] %v5691_v11  ;;  %5219 = vmatprep.mubr.msk.bf16.mxu0 %vm5692_vm1, %v5691_v11 }
 0x134   :  { %v181_v13 = vmul.f32 %v179_v12, %v179_v12  ;;  %5223 = vmatprep.subr.mxu1 %v5691_v11  ;;  %5227 = vmatprep.mubr.msk.f32.mxu1 %vm5692_vm1, %v5691_v11 }
 0x136   :  { %186 = vrot.lane.b32.xlu1 %v181_v13, %s5687_s0 }
 0x1a4   :  { %v185_v18 = vpop.permute.xlu0 %184 }
 0x1a5   :  { %v190_v19 = vadd.f32 %v185_v18, %v168_v17 }
 0x1a7   :  { %v192_v20 = vmul.f32 0.5, %v190_v19 }
 0x1a8   :  { %v187_v22 = vpop.permute.xlu1 %186 }
 0x1a9   :  { %v194_v23 = vadd.f32 1e-05, %v192_v20  ;;  %v191_v24 = vadd.f32 %v187_v22, %v169_v21 }
 0x1ab   :  { %5593 = vrsqrt.f32 %v194_v23  ;;  %v193_v25 = vmul.f32 0.5, %v191_v24 }
 0x1ad   :  { %v195_v26 = vadd.f32 1e-05, %v193_v25 }
 0x1af   :  { %5595 = vrsqrt.f32 %v195_v26 }
 0x1b8   :  { %v5594_v27 = vpop.eup %5593 }
 0x1b9   :  { %219 = vrot.lane.b32.xlu0 %v5594_v27, %s5688_s18  ;;  %v199_v28 = vmul.f32 %v5594_v27, %v166_v15  ;;  %v4799_v27 = vld [vmem:[%s5759_s24] ss:$0 sm:$0xff]  ;;  %s6651_s24 = sld [smem:[#allocation14_spill]] }
 0x1bc   :  { %v5596_v29 = vpop.eup %5595 }
 0x1bd   :  { %221 = vrot.lane.b32.xlu1 %v5596_v29, %s5688_s18  ;;  %203 = vperm.xlu0 %5364, %v199_v28   ;;  %v200_v30 = vmul.f32 %v5596_v29, %v167_v16 }
 0x1c1   :  { %208 = vperm.xlu1 %5365, %v200_v30   ;;  %5367 = vset.pattern.permute.xlu0 %v5690_v31 }
 0x1c5   :  { %5366 = vset.pattern.permute.xlu1 %v5690_v31 }
 0x22b   :  { %v220_v32 = vpop.permute.xlu0 %219 }
 0x22c   :  { %v225_v33 = vmul.f32 %v220_v32, %v178_v9  ;;  %v5372_v9 = vld [vmem:[%s5754_s19 + $0x8] sm:$0xff]  }
 0x22d   :  { %5216 = vmatpush3.bf16.msra.mxu0 %v5372_v9 }
 0x22e   :  { %229 = vperm.xlu1 %5366, %v225_v33   ;;  %5217 = vmatprep.subr.bf16.mxu0 %v5691_v11  ;;  %v352_v33 = vld [vmem:[%s5719_s17] sm:$0x3]  ;;  %s6645_s17 = sld [smem:[#allocation11_spill]] }
 0x22f   :  { %v222_v34 = vpop.permute.xlu1 %221 }
 0x230   :  { %v226_v35 = vmul.f32 %v222_v34, %v179_v12  ;;  %v5373_v12 = vld [vmem:[%s5754_s19] sm:$0xff]   ;;  %s5693_s19 = smov 41  }
 0x231   :  { %5218 = vmatpush3.bf16.msra.mxu0 %v5373_v12  ;;  %v431_v34 = vld [vmem:[%s5714_s13] sm:$0xff] }
 0x232   :  { %234 = vperm.xlu0 %5367, %v226_v35   ;;  %v432_v35 = vld [vmem:[%s5714_s13 + $0x8] sm:$0xff]  ;;  %s6643_s13 = sld [smem:[#allocation8_spill]] }
 0x238   :  { %v204_v44 = vpop.permute.xlu0 %203 }
 0x239   :  { %v215_v46 = vmul.f32 %v214_v42, %v204_v44  ;;  %v4804_v44 = vld [vmem:[%s5739_s3] ss:$0 sm:$0xff]  ;;  %s6647_s3 = sld [smem:[#allocation12_spill]] }
 0x23c   :  { %v209_v41 = vpop.permute.xlu1 %208 }
 0x23d   :  { %v216_v51 = vmul.f32 %v214_v42, %v209_v41 }
 0x2a9   :  { %v230_v45 = vpop.permute.xlu1 %229 }
 0x2aa   :  { %v241_v47 = vmul.f32 %v240_v43, %v230_v45 }
 0x2ac   :  { %v243_v49 = vadd.f32 %v241_v47, %v215_v46 }
 0x2ad   :  { %v235_v50 = vpop.permute.xlu0 %234 }
 0x2ae   :  { %v242_v52 = vmul.f32 %v240_v43, %v235_v50  ;;  %v252_v53 = vadd.f32 %v4798_v48, %v243_v49 }
 0x2b0   :  { %v244_v54 = vadd.f32 %v242_v52, %v216_v51  ;;  %v254_v55 = vmax.f32 %v252_v53, 0.0 }
 0x2b2   :  { %v257_v56 = vsel %vm256_vm0, %v254_v55, 0.0  ;;  %v253_v57 = vadd.f32 %v4798_v48, %v244_v54 }
 0x2b3   :  { %258 = vadd.xlane.f32.xlu1 %v257_v56 }
 0x2b4   :  { %v255_v58 = vmax.f32 %v253_v57, 0.0 }
 0x2b6   :  { %v260_v59 = vsel %vm256_vm0, %v255_v58, 0.0 }
 0x2b7   :  { %261 = vadd.xlane.f32.xlu0 %v260_v59 }
 0x33c   :  { %v259_v60 = vpop.xlane.xlu1 %258 }
 0x33d   :  { %v264_v61 = vmul.f32 0.03125, %v259_v60 }
 0x33f   :  { %v266_v62 = vsub.f32 %v254_v55, %v264_v61 }
 0x340   :  { %v262_v63 = vpop.xlane.xlu0 %261 }
 0x341   :  { %v265_v0 = vmul.f32 0.03125, %v262_v63  ;;  %v268_v1 = vmul.f32 %v266_v62, %v266_v62 }
 0x343   :  { %v267_v2 = vsub.f32 %v255_v58, %v265_v0  ;;  %v270_v3 = vsel %vm256_vm0, %v268_v1, 0.0 }
 0x344   :  { %271 = vadd.xlane.f32.xlu1 %v270_v3 }
 0x345   :  { %v269_v4 = vmul.f32 %v267_v2, %v267_v2 }
 0x347   :  { %v273_v5 = vsel %vm256_vm0, %v269_v4, 0.0 }
 0x348   :  { %274 = vadd.xlane.f32.xlu0 %v273_v5 }
 0x355   :  { %438 = vperm.xlu1 %5366, %v427_v6  }
 0x359   :  { %448 = vperm.xlu1 %5366, %v429_v7  }
 0x35d   :  { %453 = vperm.xlu1 %5366, %v430_v8  }
 0x35e   :  { %443 = vperm.xlu0 %5367, %v428_v10  }
 0x361   :  { %5368 = vset.pattern.permute.xlu1 %v5689_v14 }
 0x362   :  { %5369 = vset.pattern.permute.xlu0 %v5689_v14 }
 0x3cd   :  { %v272_v13 = vpop.xlane.xlu1 %271 }
 0x3ce   :  { %v276_v15 = vmul.f32 0.03125, %v272_v13 }
 0x3d0   :  { %v278_v16 = vadd.f32 1e-05, %v276_v15 }
 0x3d1   :  { %v275_v17 = vpop.xlane.xlu0 %274  ;;  %v439_v41 = vpop.permute.xlu1 %438 }
 0x3d2   :  { %v277_v18 = vmul.f32 0.03125, %v275_v17  ;;  %5597 = vrsqrt.f32 %v278_v16  ;;  %v462_v49 = vmul.f32 %v4804_v44, %v439_v41  ;;  %v4809_v41 = vld [vmem:[%s5764_s30] ss:$0 sm:$0xff]  ;;  %s6652_s30 = sld [smem:[#allocation16_spill]] }
 0x3d4   :  { %v279_v19 = vadd.f32 1e-05, %v277_v18 }
 0x3d5   :  { %v449_v45 = vpop.permute.xlu1 %448 }
 0x3d6   :  { %5599 = vrsqrt.f32 %v279_v19  ;;  %v464_v56 = vmul.f32 %v4804_v44, %v449_v45  ;;  %v4810_v45 = vld [vmem:[%s5769_s6] ss:$0 sm:$0xff]  ;;  %s6653_s6 = sld [smem:[#allocation19_spill]] }
 0x3d9   :  { %v444_v42 = vpop.permute.xlu0 %443  ;;  %v454_v54 = vpop.permute.xlu1 %453 }
 0x3da   :  { %v463_v47 = vmul.f32 %v4804_v44, %v444_v42  ;;  %v465_v59 = vmul.f32 %v4804_v44, %v454_v54  ;;  %v638_v54 = vld [vmem:[%s5709_s9 + $0x8] sm:$0xff] }
 0x3df   :  { %v5598_v20 = vpop.eup %5597 }
 0x3e0   :  { %v282_v22 = vmul.f32 %v5598_v20, %v266_v62 }
 0x3e3   :  { %v5600_v21 = vpop.eup %5599 }
 0x3e4   :  { %v283_v23 = vmul.f32 %v5600_v21, %v267_v2 }
 0x3e6   :  { %v284_v24 = vpack.c.bf16 %v283_v23, %v282_v22  ;;  %v5374_v22 = vld [vmem:[%s5774_s12 + $0x8] sm:$0xff]   ;;  %v5375_v23 = vld [vmem:[%s5774_s12] sm:$0xff]   ;;  %s6654_s12 = sld [smem:[#allocation18_spill]] }
 0x3e7   :  { %5240 = vmatprep.subr.bf16.mxu0 %v5374_v22 }
 0x3e8   :  { %5220 = vmatmul.mubr.msk.bf16.vlgmr.msra.gmra.mxu0 %vm256_vm0, %v284_v24 }
 0x3e9   :  { %5241 = vmatpush3.bf16.msra.mxu0 %v5374_v22 }
 0x3ea   :  { %5242 = vmatprep.subr.bf16.mxu0 %v5375_v23 }
 0x3ed   :  { %5243 = vmatpush3.bf16.msra.mxu0 %v5375_v23 }
 0x4a8   :  { %v345_v25 = vpop.f32.mrf.mxu0 }
 0x4a9   :  { %v346_v32 = vadd.f32 %v4799_v27, %v345_v25 }
 0x4aa   :  { %v5221_v26 = vpop.f32.mrf.mxu0 }
 0x4ac   :  { %v348_v28 = vpop.f32.mrf.mxu0 }
 0x4ad   :  { %v349_v29 = vadd.f32 %v4799_v27, %v348_v28 }
 0x4ae   :  { %v5222_v30 = vpop.f32.mrf.mxu0 }
 0x4af   :  { %5224 = vmatpush3.msra.mxu1 %v349_v29 }
 0x4b0   :  { %5225 = vmatprep.subr.mxu1 %v5691_v11 }
 0x4b1   :  { %5226 = vmatpush3.msra.mxu1 %v346_v32 }
 0x4b2   :  { %5228 = vmatmul.mubr.msk.f32.vlgmr.msra.gmra.mxu1 %vm353_vm2, %v352_v33  ;;  %5230 = vmatprep.subr.mxu1 %v349_v29 }
 0x4b3   :  { %5231 = vmatpush3.msra.mxu1 %v349_v29  ;;  %5234 = vmatprep.mubr.msk.f32.mxu1 %vm353_vm2, %v431_v34 }
 0x4b4   :  { %5232 = vmatprep.subr.mxu1 %v346_v32 }
 0x4b5   :  { %5233 = vmatpush3.msra.mxu1 %v346_v32 }
 0x4b6   :  { %5235 = vmatmul.mubr.msk.f32.vlgmr.msra.gmra.mxu1 %vm353_vm2, %v432_v35 }
 0x4b7   :  { %5237 = vmatprep.mubr.msk.f32.mxu1 %vm353_vm2, %v433_v36 }
 0x4ba   :  { %5238 = vmatmul.mubr.msk.f32.gmra.mxu1 %vm353_vm2, %v434_v40 }
 0x572   :  { %v5925_v43 = vpop.f32.mrf.mxu1 }
 0x574   :  { %v5229_v46 = vpop.f32.mrf.mxu1 }
 0x576   :  { %v5236_v48 = vpop.f32.mrf.mxu1 }
 0x577   :  { %v5928_v50 = vadd.f32 %v5236_v48, %v463_v47 }
 0x578   :  { %v544_v51 = vpop.f32.mrf.mxu1 }
 0x579   :  { %v5930_v52 = vadd.f32 %v544_v51, %v462_v49  ;;  %v568_v53 = vsel %vm256_vm0, %v5928_v50, 0.0 }
 0x57a   :  { %v5239_v55 = vpop.f32.mrf.mxu1  ;;  %569 = vadd.xlane.f32.xlu1 %v568_v53  ;;  %v637_v53 = vld [vmem:[%s5709_s9] sm:$0xff] }
 0x57b   :  { %v565_v57 = vsel %vm256_vm0, %v5930_v52, 0.0  ;;  %v5938_v61 = vadd.f32 %v5239_v55, %v465_v59 }
 0x57c   :  { %v554_v58 = vpop.f32.mrf.mxu1  ;;  %566 = vadd.xlane.f32.xlu0 %v565_v57 }
 0x57d   :  { %v5936_v60 = vadd.f32 %v554_v58, %v464_v56  ;;  %v574_v63 = vsel %vm256_vm0, %v5938_v61, 0.0 }
 0x57f   :  { %v571_v62 = vsel %vm256_vm0, %v5936_v60, 0.0 }
 0x580   :  { %572 = vadd.xlane.f32.xlu0 %v571_v62 }
 0x584   :  { %575 = vadd.xlane.f32.xlu0 %v574_v63 }
 0x603   :  { %v570_v0 = vpop.xlane.xlu1 %569 }
 0x604   :  { %v578_v1 = vmul.f32 0.03125, %v570_v0 }
 0x605   :  { %v567_v2 = vpop.xlane.xlu0 %566 }
 0x606   :  { %v582_v3 = vsub.f32 %v5928_v50, %v578_v1  ;;  %v577_v4 = vmul.f32 0.03125, %v567_v2 }
 0x608   :  { %v581_v5 = vsub.f32 %v5930_v52, %v577_v4  ;;  %v586_v6 = vmul.f32 %v582_v3, %v582_v3  ;;  %v640_v4 = vld [vmem:[%s5709_s9 + $0x18] sm:$0xff] }
 0x609   :  { %v573_v7 = vpop.xlane.xlu0 %572 }
 0x60a   :  { %v579_v8 = vmul.f32 0.03125, %v573_v7  ;;  %v592_v9 = vsel %vm256_vm0, %v586_v6, 0.0  ;;  %v585_v10 = vmul.f32 %v581_v5, %v581_v5 }
 0x60b   :  { %593 = vadd.xlane.f32.xlu0 %v592_v9  ;;  %v5376_v9 = vld [vmem:[%s5784_s27 + $0x8] sm:$0xff]  }
 0x60c   :  { %v583_v12 = vsub.f32 %v5936_v60, %v579_v8  ;;  %v589_v13 = vsel %vm256_vm0, %v585_v10, 0.0  ;;  %5248 = vmatprep.subr.bf16.mxu1 %v5376_v9  ;;  %v5377_v10 = vld [vmem:[%s5784_s27] sm:$0xff]   ;;  %s6655_s27 = sld [smem:[#allocation5_spill]] }
 0x60d   :  { %590 = vadd.xlane.f32.xlu1 %v589_v13  ;;  %v576_v15 = vpop.xlane.xlu0 %575  ;;  %5249 = vmatpush3.bf16.msra.mxu1 %v5376_v9 }
 0x60e   :  { %v580_v16 = vmul.f32 0.03125, %v576_v15  ;;  %v587_v17 = vmul.f32 %v583_v12, %v583_v12  ;;  %5250 = vmatprep.subr.bf16.mxu1 %v5377_v10 }
 0x610   :  { %v584_v18 = vsub.f32 %v5938_v61, %v580_v16  ;;  %v595_v19 = vsel %vm256_vm0, %v587_v17, 0.0  ;;  %v4811_v16 = vld [vmem:[%s6642_s5] ss:$0 sm:$0xff] }
 0x611   :  { %596 = vadd.xlane.f32.xlu1 %v595_v19  ;;  %5251 = vmatpush3.bf16.msra.mxu1 %v5377_v10 }
 0x612   :  { %v588_v20 = vmul.f32 %v584_v18, %v584_v18 }
 0x614   :  { %v598_v21 = vsel %vm256_vm0, %v588_v20, 0.0 }
 0x615   :  { %599 = vadd.xlane.f32.xlu0 %v598_v21 }
 0x694   :  { %v594_v24 = vpop.xlane.xlu0 %593 }
 0x695   :  { %v602_v25 = vmul.f32 0.03125, %v594_v24  ;;  %v4816_v24 = vld [vmem:[%s6643_s13] ss:$0 sm:$0xff] }
 0x696   :  { %v591_v26 = vpop.xlane.xlu1 %590 }
 0x697   :  { %v606_v27 = vadd.f32 1e-05, %v602_v25  ;;  %v601_v28 = vmul.f32 0.03125, %v591_v26 }
 0x699   :  { %5601 = vrsqrt.f32 %v606_v27  ;;  %v605_v29 = vadd.f32 1e-05, %v601_v28 }
 0x69a   :  { %v597_v30 = vpop.xlane.xlu1 %596 }
 0x69b   :  { %5603 = vrsqrt.f32 %v605_v29  ;;  %v603_v32 = vmul.f32 0.03125, %v597_v30 }
 0x69d   :  { %v607_v33 = vadd.f32 1e-05, %v603_v32 }
 0x69e   :  { %v600_v34 = vpop.xlane.xlu0 %599 }
 0x69f   :  { %5605 = vrsqrt.f32 %v607_v33  ;;  %v604_v35 = vmul.f32 0.03125, %v600_v34 }
 0x6a1   :  { %v608_v36 = vadd.f32 1e-05, %v604_v35 }
 0x6a3   :  { %5607 = vrsqrt.f32 %v608_v36 }
 0x6a6   :  { %v5602_v40 = vpop.eup %5601 }
 0x6a7   :  { %v614_v42 = vmul.f32 %v5602_v40, %v582_v3  ;;  %v639_v3 = vld [vmem:[%s5709_s9 + $0x10] sm:$0xff]  ;;  %s6644_s9 = sld [smem:[#allocation9_spill]] }
 0x6a8   :  { %v5604_v44 = vpop.eup %5603 }
 0x6a9   :  { %v613_v46 = vmul.f32 %v5604_v44, %v581_v5  ;;  %v624_v47 = vmul.f32 %v4809_v41, %v614_v42 }
 0x6ab   :  { %v623_v48 = vmul.f32 %v4809_v41, %v613_v46  ;;  %v634_v49 = vadd.f32 %v4810_v45, %v624_v47 }
 0x6ac   :  { %v5606_v51 = vpop.eup %5605 }
 0x6ad   :  { %v615_v55 = vmul.f32 %v5606_v51, %v583_v12  ;;  %v633_v56 = vadd.f32 %v4810_v45, %v623_v48  ;;  %v642_v59 = vadd.f32 %v638_v54, %v634_v49 }
 0x6af   :  { %v625_v57 = vmul.f32 %v4809_v41, %v615_v55  ;;  %v641_v58 = vadd.f32 %v637_v53, %v633_v56 }
 0x6b0   :  { %v5608_v62 = vpop.eup %5607 }
 0x6b1   :  { %v616_v63 = vmul.f32 %v5608_v62, %v584_v18  ;;  %v645_v0 = vpack.c.bf16 %v642_v59, %v641_v58  ;;  %v635_v2 = vadd.f32 %v4810_v45, %v625_v57 }
 0x6b3   :  { %v626_v1 = vmul.f32 %v4809_v41, %v616_v63  ;;  %5244 = vmatprep.mubr.msk.bf16.mxu0 %vm256_vm0, %v645_v0  ;;  %v643_v6 = vadd.f32 %v639_v3, %v635_v2 }
 0x6b5   :  { %v636_v5 = vadd.f32 %v4810_v45, %v626_v1 }
 0x6b7   :  { %v644_v7 = vadd.f32 %v640_v4, %v636_v5 }
 0x6b9   :  { %v646_v8 = vpack.c.bf16 %v644_v7, %v643_v6 }
 0x6bb   :  { %5245 = vmatmul.mubr.msk.bf16.vlgmr.msra.gmra.mxu0 %vm256_vm0, %v646_v8  ;;  %v876_v8 = vld [vmem:[%s6644_s9 + $0x48] sm:$0xff] }
 0x6bc   :  { %1043 = vmatprep.mubr.bf16.mxu0 %v5689_v14 }
 0x77b   :  { %v5246_v12 = vpop.f32.mrf.mxu0 }
 0x77c   :  { %v719_v21 = vadd.f32 %v5246_v12, %v4811_v16  ;;  %v880_v12 = vld [vmem:[%s6644_s9 + $0x68] sm:$0xff] }
 0x77d   :  { %v710_v13 = vpop.f32.mrf.mxu0 }
 0x77e   :  { %v711_v19 = vadd.f32 %v4811_v16, %v710_v13  ;;  %v867_v13 = vld [vmem:[%s6644_s9] sm:$0xff] }
 0x77f   :  { %v5247_v15 = vpop.f32.mrf.mxu0 }
 0x780   :  { %v722_v17 = vadd.f32 %v5247_v15, %v4811_v16  ;;  %v871_v15 = vld [vmem:[%s6644_s9 + $0x20] sm:$0xff] }
 0x781   :  { %v713_v18 = vpop.f32.mrf.mxu0 }
 0x782   :  { %v714_v20 = vadd.f32 %v4811_v16, %v713_v18  ;;  %v726_v23 = vpack.c.bf16 %v722_v17, %v719_v21  ;;  %v4831_v16 = vcombine.low %v876_v8, %v880_v12  ;;  %v4832_v17 = vcombine.high %v876_v8, %v880_v12  ;;  %v5379_v8 = vld [vmem:[%s6645_s17 + $0xf8] sm:$0xff]  }
 0x783   :  { %v4822_v18 = vcombine.high %v867_v13, %v871_v15  ;;  %v5381_v12 = vld [vmem:[%s6645_s17 + $0xb8] sm:$0xff]  }
 0x784   :  { %v725_v22 = vpack.c.bf16 %v714_v20, %v711_v19  ;;  %v868_v19 = vld [vmem:[%s6644_s9 + $0x8] sm:$0xff]  ;;  %1076 = vmatprep.subr.bf16.mxu1 %v4832_v17 }
 0x785   :  { %v872_v20 = vld [vmem:[%s6644_s9 + $0x28] sm:$0xff] }
 0x786   :  { %5252 = vmatprep.mubr.msk.bf16.mxu1 %vm256_vm0, %v725_v22  ;;  %v4824_v21 = vcombine.high %v868_v19, %v872_v20  ;;  %v4821_v22 = vcombine.low %v867_v13, %v871_v15  ;;  %v5383_v13 = vld [vmem:[%s6645_s17 + $0xf0] sm:$0xff]   ;;  %v5386_v17 = vld [vmem:[%s6645_s17 + $0x68] sm:$0xff]  }
 0x787   :  { %5253 = vmatmul.mubr.msk.bf16.vlgmr.msra.gmra.mxu1 %vm256_vm0, %v726_v23  ;;  %v4823_v23 = vcombine.low %v868_v19, %v872_v20  ;;  %v5384_v15 = vld [vmem:[%s6645_s17 + $0x30] sm:$0xff]   ;;  %v5388_v19 = vld [vmem:[%s6645_s17 + $0x28] sm:$0xff]  }
 0x788   :  { %1096 = vmatprep.mubr.bf16.mxu1 %v5689_v14  ;;  %1077 = vmatpush1.bf16.msra.mxu1 %v4831_v16  ;;  %v5385_v16 = vld [vmem:[%s6645_s17 + $0xb0] sm:$0xff]   ;;  %v5389_v20 = vld [vmem:[%s6645_s17 + $0xa8] sm:$0xff]  }
 0x789   :  { %1078 = vmatprep.subr.bf16.mxu1 %v4824_v21  ;;  %v5390_v21 = vld [vmem:[%s6645_s17 + $0x60] sm:$0xff]  }
 0x78c   :  { %1079 = vmatpush1.bf16.msra.mxu1 %v4823_v23  ;;  %v5392_v23 = vld [vmem:[%s6645_s17 + $0x20] sm:$0xff]  }
 0x847   :  { %v5254_v25 = vpop.f32.mrf.mxu1 }
 0x848   :  { %v799_v26 = vadd.f32 %v5254_v25, %v4816_v24  ;;  %v881_v25 = vld [vmem:[%s6644_s9 + $0x70] sm:$0xff] }
 0x849   :  { %v790_v27 = vpop.f32.mrf.mxu1 }
 0x84a   :  { %v791_v28 = vadd.f32 %v4816_v24, %v790_v27  ;;  %v807_v30 = vadd.f32 %v799_v26, %v643_v6  ;;  %v875_v6 = vld [vmem:[%s6644_s9 + $0x40] sm:$0xff]  ;;  %v878_v26 = vld [vmem:[%s6644_s9 + $0x58] sm:$0xff] }
 0x84b   :  { %v5255_v29 = vpop.f32.mrf.mxu1 }
 0x84c   :  { %v805_v32 = vadd.f32 %v791_v28, %v641_v58  ;;  %v802_v33 = vadd.f32 %v5255_v29, %v4816_v24  ;;  %v5974_v40 = vadd.f32 %v807_v30, %v5936_v60  ;;  %v882_v28 = vld [vmem:[%s6644_s9 + $0x78] sm:$0xff] }
 0x84d   :  { %v793_v34 = vpop.f32.mrf.mxu1  ;;  %v4835_v30 = vcombine.low %v878_v26, %v882_v28 }
 0x84e   :  { %v5971_v35 = vadd.f32 %v805_v32, %v5930_v52  ;;  %v794_v36 = vadd.f32 %v4816_v24, %v793_v34  ;;  %v808_v41 = vadd.f32 %v802_v33, %v644_v7  ;;  %v819_v47 = vsel %vm256_vm0, %v5974_v40, 0.0  ;;  %v879_v7 = vld [vmem:[%s6644_s9 + $0x60] sm:$0xff]  ;;  %v877_v24 = vld [vmem:[%s6644_s9 + $0x50] sm:$0xff] }
 0x84f   :  { %v4829_v9 = vcombine.low %v875_v6, %v879_v7  ;;  %v4830_v10 = vcombine.high %v875_v6, %v879_v7  ;;  %v4834_v27 = vcombine.high %v877_v24, %v881_v25  ;;  %v4833_v29 = vcombine.low %v877_v24, %v881_v25  ;;  %v5378_v7 = vld [vmem:[%s6645_s17 + $0x78] sm:$0xff]   ;;  %v5393_v24 = vld [vmem:[%s6645_s17 + $0xa0] sm:$0xff]  }
 0x850   :  { %v806_v42 = vadd.f32 %v794_v36, %v642_v59  ;;  %v813_v44 = vsel %vm256_vm0, %v5971_v35, 0.0  ;;  %v5982_v46 = vadd.f32 %v808_v41, %v5938_v61  ;;  %v4836_v32 = vcombine.high %v878_v26, %v882_v28  ;;  %v5394_v25 = vld [vmem:[%s6645_s17 + $0x58] sm:$0xff]  }
 0x851   :  { %814 = vadd.xlane.f32.xlu1 %v813_v44  ;;  %1023 = vmatprep.subr.bf16.mxu0 %v4830_v10  ;;  %v5395_v26 = vld [vmem:[%s6645_s17 + $0xd8] sm:$0xff]  }
 0x852   :  { %v5979_v45 = vadd.f32 %v806_v42, %v5928_v50  ;;  %v822_v60 = vsel %vm256_vm0, %v5982_v46, 0.0  ;;  %1024 = vmatpush1.bf16.msra.mxu0 %v4829_v9  ;;  %1182 = vmatprep.subr.bf16.mxu1 %v4836_v32  ;;  %v5397_v28 = vld [vmem:[%s6645_s17 + $0x98] sm:$0xff]   ;;  %v5400_v32 = vld [vmem:[%s6645_s17 + $0x10] sm:$0xff]  }
 0x853   :  { %1025 = vmatprep.subr.bf16.mxu0 %v4822_v18  ;;  %v5387_v18 = vld [vmem:[%s6645_s17 + $0xe8] sm:$0xff]  }
 0x854   :  { %v816_v52 = vsel %vm256_vm0, %v5979_v45, 0.0 }
 0x855   :  { %817 = vadd.xlane.f32.xlu0 %v816_v52  ;;  %820 = vadd.xlane.f32.xlu1 %v819_v47 }
 0x856   :  { %1026 = vmatpush1.bf16.msra.mxu0 %v4821_v22  ;;  %v5391_v22 = vld [vmem:[%s6645_s17 + $0xe0] sm:$0xff]  }
 0x857   :  { %1129 = vmatprep.subr.bf16.mxu0 %v4834_v27  ;;  %v5396_v27 = vld [vmem:[%s6645_s17 + $0x18] sm:$0xff]  }
 0x859   :  { %823 = vadd.xlane.f32.xlu0 %v822_v60 }
 0x8da   :  { %v815_v48 = vpop.xlane.xlu1 %814 }
 0x8db   :  { %v825_v49 = vmul.f32 0.03125, %v815_v48 }
 0x8dd   :  { %v5991_v50 = vsub.f32 %v5971_v35, %v825_v49 }
 0x8de   :  { %v818_v51 = vpop.xlane.xlu0 %817  ;;  %v821_v61 = vpop.xlane.xlu1 %820 }
 0x8df   :  { %v826_v53 = vmul.f32 0.03125, %v818_v51  ;;  %v827_v54 = vmul.f32 0.03125, %v821_v61  ;;  %v833_v55 = vmul.f32 %v5991_v50, %v5991_v50 }
 0x8e1   :  { %v5996_v56 = vsub.f32 %v5979_v45, %v826_v53  ;;  %v5999_v57 = vsub.f32 %v5974_v40, %v827_v54  ;;  %v837_v58 = vsel %vm256_vm0, %v833_v55, 0.0  ;;  %v869_v54 = vld [vmem:[%s6644_s9 + $0x10] sm:$0xff] }
 0x8e2   :  { %v824_v59 = vpop.xlane.xlu0 %823  ;;  %838 = vadd.xlane.f32.xlu1 %v837_v58 }
 0x8e3   :  { %v828_v62 = vmul.f32 0.03125, %v824_v59  ;;  %v834_v63 = vmul.f32 %v5996_v56, %v5996_v56  ;;  %v835_v0 = vmul.f32 %v5999_v57, %v5999_v57  ;;  %v873_v59 = vld [vmem:[%s6644_s9 + $0x30] sm:$0xff] }
 0x8e5   :  { %v6007_v1 = vsub.f32 %v5982_v46, %v828_v62  ;;  %v840_v2 = vsel %vm256_vm0, %v834_v63, 0.0  ;;  %v843_v3 = vsel %vm256_vm0, %v835_v0, 0.0  ;;  %v870_v62 = vld [vmem:[%s6644_s9 + $0x18] sm:$0xff] }
 0x8e6   :  { %841 = vadd.xlane.f32.xlu0 %v840_v2  ;;  %844 = vadd.xlane.f32.xlu1 %v843_v3  ;;  %v874_v63 = vld [vmem:[%s6644_s9 + $0x38] sm:$0xff]  ;;  %v4826_v3 = vcombine.high %v869_v54, %v873_v59 }
 0x8e7   :  { %v836_v4 = vmul.f32 %v6007_v1, %v6007_v1  ;;  %v4827_v6 = vcombine.low %v870_v62, %v874_v63 }
 0x8e9   :  { %v846_v5 = vsel %vm256_vm0, %v836_v4, 0.0  ;;  %v4828_v4 = vcombine.high %v870_v62, %v874_v63 }
 0x8ea   :  { %847 = vadd.xlane.f32.xlu0 %v846_v5 }
 0x96b   :  { %v839_v33 = vpop.xlane.xlu1 %838 }
 0x96c   :  { %v849_v34 = vmul.f32 0.03125, %v839_v33  ;;  %v5401_v33 = vld [vmem:[%s6645_s17 + $0x90] sm:$0xff]  }
 0x96e   :  { %v853_v36 = vadd.f32 1e-05, %v849_v34  ;;  %v5402_v34 = vld [vmem:[%s6645_s17 + $0x48] sm:$0xff]  }
 0x96f   :  { %v842_v41 = vpop.xlane.xlu0 %841  ;;  %v845_v42 = vpop.xlane.xlu1 %844 }
 0x970   :  { %v850_v44 = vmul.f32 0.03125, %v842_v41  ;;  %5609 = vrsqrt.f32 %v853_v36  ;;  %v851_v47 = vmul.f32 0.03125, %v845_v42  ;;  %v5403_v36 = vld [vmem:[%s6645_s17 + $0xc8] sm:$0xff]  }
 0x971   :  { %v5404_v41 = vld [vmem:[%s6645_s17 + $0x8] sm:$0xff]  }
 0x972   :  { %v854_v52 = vadd.f32 1e-05, %v850_v44  ;;  %v855_v49 = vadd.f32 1e-05, %v851_v47  ;;  %v5405_v42 = vld [vmem:[%s6645_s17 + $0x88] sm:$0xff]   ;;  %v5406_v44 = vld [vmem:[%s6645_s17 + $0x40] sm:$0xff]  }
 0x973   :  { %v848_v60 = vpop.xlane.xlu0 %847  ;;  %v5408_v47 = vld [vmem:[%s6645_s17] sm:$0xff]  }
 0x974   :  { %5611 = vrsqrt.f32 %v854_v52  ;;  %v852_v48 = vmul.f32 0.03125, %v848_v60  ;;  %v5407_v52 = vld [vmem:[%s6645_s17 + $0xc0] sm:$0xff]  }
 0x975   :  { %v5409_v60 = vld [vmem:[%s6645_s17 + $0x80] sm:$0xff]  }
 0x976   :  { %v856_v51 = vadd.f32 1e-05, %v852_v48  ;;  %v5410_v48 = vld [vmem:[%s6645_s17 + $0x178] sm:$0xff]  }
 0x978   :  { %5613 = vrsqrt.f32 %v856_v51  ;;  %v6083_v51 = vsub.s32 3, %v5879_v37 }
 0x979   :  { %5615 = vrsqrt.f32 %v855_v49  ;;  %v5411_v49 = vld [vmem:[%s6645_s17 + $0x1f8] sm:$0xff]  }
 0x97d   :  { %v5610_v61 = vpop.eup %5609 }
 0x97e   :  { %v861_v55 = vmul.f32 %v5610_v61, %v5991_v50  ;;  %v6086_v61 = vsub.s32 2, %v5879_v37 }
 0x981   :  { %v5612_v53 = vpop.eup %5611 }
 0x982   :  { %v862_v58 = vmul.f32 %v5612_v53, %v5996_v56  ;;  %v4825_v56 = vcombine.low %v869_v54, %v873_v59  ;;  %v6089_v53 = vld [vmem:[%s6646_s29] sm:$0xff] }
 0x983   :  { %v900_v59 = vrot.slane %v6089_v53, %v6083_v51  ;;  %v888_v62 = vrot.slane %v6089_v53, %v5882_v38  ;;  %v896_v63 = vrot.slane %v6089_v53, %v6086_v61 }
 0x984   :  { %v865_v0 = vpack.c.bf16 %v862_v58, %v861_v55  ;;  %v892_v58 = vrot.slane %v6089_v53, %v5885_v39 }
 0x985   :  { %v5614_v2 = vpop.eup %5613 }
 0x986   :  { %4837 = vmatmul.mubr.msk.bf16.vlgmr.msra.gmra.mxu0 %vm256_vm0, %v865_v0  ;;  %4839 = vmatmul.mubr.msk.bf16.vlgmr.msra.gmra.mxu1 %vm256_vm0, %v865_v0  ;;  %v5616_v5 = vpop.eup %5615  ;;  %v864_v50 = vmul.f32 %v5614_v2, %v6007_v1  ;;  %v5380_v1 = vld [vmem:[%s6645_s17 + $0x38] sm:$0xff]  }
 0x987   :  { %1053 = vmatprep.mubr.bf16.mxu0 %v5689_v14  ;;  %1106 = vmatprep.mubr.bf16.mxu1 %v5689_v14  ;;  %v863_v9 = vmul.f32 %v5616_v5, %v5999_v57  ;;  %v5382_v57 = vld [vmem:[%s6645_s17 + $0x70] sm:$0xff]  }
 0x988   :  { %1130 = vmatpush1.bf16.msra.mxu0 %v4833_v29  ;;  %1183 = vmatpush1.bf16.msra.mxu1 %v4835_v30  ;;  %v5398_v29 = vld [vmem:[%s6645_s17 + $0x50] sm:$0xff]  }
 0x989   :  { %1131 = vmatprep.subr.bf16.mxu0 %v4826_v3  ;;  %1184 = vmatprep.subr.bf16.mxu1 %v4828_v4  ;;  %v866_v10 = vpack.c.bf16 %v864_v50, %v863_v9  ;;  %v5399_v30 = vld [vmem:[%s6645_s17 + $0xd0] sm:$0xff]  }
 0x98c   :  { %1132 = vmatpush1.bf16.msra.mxu0 %v4825_v56  ;;  %1185 = vmatpush1.bf16.msra.mxu1 %v4827_v6 }
 0x98d   :  { %5074 = vmatprep.subr.bf16.mxu0 %v5378_v7  ;;  %5102 = vmatprep.subr.bf16.mxu1 %v5379_v8 }
 0x98e   :  { %4838 = vmatmul.mubr.msk.bf16.gmra.mxu0 %vm256_vm0, %v866_v10  ;;  %4840 = vmatmul.mubr.msk.bf16.gmra.mxu1 %vm256_vm0, %v866_v10 }
 0x98f   :  { %1149 = vmatprep.mubr.bf16.mxu0 %v5689_v14  ;;  %1202 = vmatprep.mubr.bf16.mxu1 %v5689_v14 }
 0x996   :  { %4841 = vmatmul.mubr.msk.bf16.vlgmr.msra.gmra.mxu0 %vm256_vm0, %v865_v0  ;;  %4843 = vmatmul.mubr.msk.bf16.vlgmr.msra.gmra.mxu1 %vm256_vm0, %v865_v0 }
 0x997   :  { %1159 = vmatprep.mubr.bf16.mxu0 %v5689_v14  ;;  %1212 = vmatprep.mubr.bf16.mxu1 %v5689_v14 }
 0x998   :  { %5075 = vmatpush3.bf16.msra.mxu0 %v5380_v1  ;;  %5103 = vmatpush3.bf16.msra.mxu1 %v5381_v12 }
 0x999   :  { %5076 = vmatprep.subr.bf16.mxu0 %v5382_v57  ;;  %5104 = vmatprep.subr.bf16.mxu1 %v5383_v13 }
 0x99c   :  { %5077 = vmatpush3.bf16.msra.mxu0 %v5384_v15  ;;  %5105 = vmatpush3.bf16.msra.mxu1 %v5385_v16 }
 0x99d   :  { %5078 = vmatprep.subr.bf16.mxu0 %v5386_v17  ;;  %5106 = vmatprep.subr.bf16.mxu1 %v5387_v18 }
 0x99e   :  { %4842 = vmatmul.mubr.msk.bf16.gmra.mxu0 %vm256_vm0, %v866_v10  ;;  %4844 = vmatmul.mubr.msk.bf16.gmra.mxu1 %vm256_vm0, %v866_v10 }
 0x9a0   :  { %5079 = vmatpush3.bf16.msra.mxu0 %v5388_v19  ;;  %5107 = vmatpush3.bf16.msra.mxu1 %v5389_v20 }
 0x9a1   :  { %5080 = vmatprep.subr.bf16.mxu0 %v5390_v21  ;;  %5108 = vmatprep.subr.bf16.mxu1 %v5391_v22 }
 0x9a4   :  { %5081 = vmatpush3.bf16.msra.mxu0 %v5392_v23  ;;  %5109 = vmatpush3.bf16.msra.mxu1 %v5393_v24 }
 0x9a5   :  { %5082 = vmatprep.subr.bf16.mxu0 %v5394_v25  ;;  %5110 = vmatprep.subr.bf16.mxu1 %v5395_v26 }
 0x9a8   :  { %5083 = vmatpush3.bf16.msra.mxu0 %v5396_v27  ;;  %5111 = vmatpush3.bf16.msra.mxu1 %v5397_v28  ;;  %v5412_v27 = vld [vmem:[%s6645_s17 + $0x138] sm:$0xff]  }
 0x9a9   :  { %5084 = vmatprep.subr.bf16.mxu0 %v5398_v29  ;;  %5112 = vmatprep.subr.bf16.mxu1 %v5399_v30  ;;  %v5413_v28 = vld [vmem:[%s6645_s17 + $0x1b8] sm:$0xff]   ;;  %v6102_v29 = vsub.s32 5, %v5879_v37 }
 0x9ac   :  { %5085 = vmatpush3.bf16.msra.mxu0 %v5400_v32  ;;  %5113 = vmatpush3.bf16.msra.mxu1 %v5401_v33 }
 0x9ad   :  { %5086 = vmatprep.subr.bf16.mxu0 %v5402_v34  ;;  %5114 = vmatprep.subr.bf16.mxu1 %v5403_v36 }
 0x9b0   :  { %5087 = vmatpush3.bf16.msra.mxu0 %v5404_v41  ;;  %5115 = vmatpush3.bf16.msra.mxu1 %v5405_v42  ;;  %v5414_v41 = vld [vmem:[%s6645_s17 + $0x170] sm:$0xff]  }
 0x9b1   :  { %5088 = vmatprep.subr.bf16.mxu0 %v5406_v44  ;;  %5116 = vmatprep.subr.bf16.mxu1 %v5407_v52  ;;  %v5415_v42 = vld [vmem:[%s6645_s17 + $0x1f0] sm:$0xff]   ;;  %v6107_v44 = vsub.s32 7, %v5879_v37 }
 0x9b4   :  { %5089 = vmatpush3.bf16.msra.mxu0 %v5408_v47  ;;  %5117 = vmatpush3.bf16.msra.mxu1 %v5409_v60 }
 0x9b5   :  { %5130 = vmatprep.subr.bf16.mxu0 %v5410_v48  ;;  %5158 = vmatprep.subr.bf16.mxu1 %v5411_v49 }
 0xa46   :  { %v1045_v54 = vpop.f32.mrf.mxu0  ;;  %v1098_v55 = vpop.f32.mrf.mxu1 }
 0xa47   :  { %v1046_v7 = vadd.f32 %v1045_v54, %v888_v62  ;;  %v1099_v8 = vadd.f32 %v1098_v55, %v896_v63 }
 0xa48   :  { %v1047_v0 = vpop.f32.mrf.mxu0  ;;  %v1100_v2 = vpop.f32.mrf.mxu1 }
 0xa49   :  { %v1048_v5 = vadd.f32 %v1047_v0, %v892_v58  ;;  %v1101_v50 = vadd.f32 %v1100_v2, %v900_v59  ;;  %v1223_v21 = vmax.f32 %v1046_v7, 0.0  ;;  %v1225_v22 = vmax.f32 %v1099_v8, 0.0 }
 0xa4a   :  { %v1049_v3 = vpop.f32.mrf.mxu0  ;;  %v1102_v4 = vpop.f32.mrf.mxu1 }
 0xa4b   :  { %v1050_v56 = vadd.f32 %v1049_v3, %v888_v62  ;;  %v1103_v6 = vadd.f32 %v1102_v4, %v896_v63  ;;  %v1224_v17 = vmax.f32 %v1048_v5, 0.0  ;;  %v1226_v18 = vmax.f32 %v1101_v50, 0.0  ;;  %v5416_v3 = vld [vmem:[%s6645_s17 + $0x130] sm:$0xff]  }
 0xa4c   :  { %v1051_v9 = vpop.f32.mrf.mxu0  ;;  %v1104_v10 = vpop.f32.mrf.mxu1 }
 0xa4d   :  { %v1052_v1 = vadd.f32 %v1051_v9, %v892_v58  ;;  %v1105_v12 = vadd.f32 %v1104_v10, %v900_v59  ;;  %v1231_v57 = vmax.f32 %v1050_v56, 0.0  ;;  %v1233_v13 = vmax.f32 %v1103_v6, 0.0 }
 0xa4e   :  { %v1055_v15 = vpop.f32.mrf.mxu0  ;;  %v1108_v16 = vpop.f32.mrf.mxu1 }
 0xa4f   :  { %v1232_v19 = vmax.f32 %v1052_v1, 0.0  ;;  %v1234_v20 = vmax.f32 %v1105_v12, 0.0  ;;  %v1255_v30 = vpack.c.bf16 %v1231_v57, %v1223_v21  ;;  %v1257_v32 = vpack.c.bf16 %v1233_v13, %v1225_v22  ;;  %v5419_v57 = vld [vmem:[%s6645_s17 + $0x1e8] sm:$0xff]   ;;  %v5422_v22 = vld [vmem:[%s6645_s17 + $0x160] sm:$0xff]  }
 0xa50   :  { %v1057_v23 = vpop.f32.mrf.mxu0  ;;  %v1110_v24 = vpop.f32.mrf.mxu1  ;;  %v1056_v48 = vadd.f32 %v1055_v15, %v888_v62  ;;  %v1109_v55 = vadd.f32 %v1108_v16, %v896_v63  ;;  %v5421_v21 = vld [vmem:[%s6645_s17 + $0x1a8] sm:$0xff]  }
 0xa51   :  { %v1256_v25 = vpack.c.bf16 %v1232_v19, %v1224_v17  ;;  %v1258_v26 = vpack.c.bf16 %v1234_v20, %v1226_v18  ;;  %v1058_v33 = vadd.f32 %v1057_v23, %v892_v58  ;;  %v1111_v52 = vadd.f32 %v1110_v24, %v900_v59  ;;  %v5420_v17 = vld [vmem:[%s6645_s17 + $0x128] sm:$0xff]  }
 0xa52   :  { %v1059_v34 = vpop.f32.mrf.mxu0  ;;  %v1112_v36 = vpop.f32.mrf.mxu1  ;;  %v1239_v10 = vmax.f32 %v1056_v48, 0.0  ;;  %v1241_v13 = vmax.f32 %v1109_v55, 0.0 }
 0xa53   :  { %v1060_v47 = vadd.f32 %v1059_v34, %v888_v62  ;;  %v1113_v60 = vadd.f32 %v1112_v36, %v896_v63  ;;  %1822 = vmatprep.mubr.bf16.mxu0 %v1256_v25  ;;  %1871 = vmatprep.mubr.bf16.mxu1 %v1258_v26  ;;  %v1240_v4 = vmax.f32 %v1058_v33, 0.0  ;;  %v6116_v62 = vrot.slane %v6089_v53, %v6102_v29  ;;  %v5418_v63 = vld [vmem:[%s6645_s17 + $0x168] sm:$0xff]   ;;  %v5423_v26 = vld [vmem:[%s6645_s17 + $0x1e0] sm:$0xff]  }
 0xa54   :  { %v1061_v49 = vpop.f32.mrf.mxu0  ;;  %v1114_v54 = vpop.f32.mrf.mxu1  ;;  %1823 = vmatmul.mubr.bf16.vlgmr.msra.gmra.mxu0 %v1255_v30  ;;  %1872 = vmatmul.mubr.bf16.vlgmr.msra.gmra.mxu1 %v1257_v32  ;;  %v1242_v6 = vmax.f32 %v1111_v52, 0.0  ;;  %v5424_v33 = vld [vmem:[%s6645_s17 + $0x120] sm:$0xff]  }
 0xa55   :  { %v1062_v0 = vadd.f32 %v1061_v49, %v892_v58  ;;  %v1115_v2 = vadd.f32 %v1114_v54, %v900_v59  ;;  %5131 = vmatpush3.bf16.msra.mxu0 %v5412_v27  ;;  %5159 = vmatpush3.bf16.msra.mxu1 %v5413_v28  ;;  %v1247_v5 = vmax.f32 %v1060_v47, 0.0  ;;  %v6120_v58 = vrot.slane %v6089_v53, %v6107_v44  ;;  %v5417_v59 = vld [vmem:[%s6645_s17 + $0x1b0] sm:$0xff]   ;;  %v5427_v49 = vld [vmem:[%s6645_s17 + $0x1d8] sm:$0xff]  }
 0xa56   :  { %v6110_v50 = vpop.f32.mrf.mxu0  ;;  %v6112_v56 = vpop.f32.mrf.mxu1  ;;  %5132 = vmatprep.subr.bf16.mxu0 %v5414_v41  ;;  %5160 = vmatprep.subr.bf16.mxu1 %v5415_v42  ;;  %v1249_v7 = vmax.f32 %v1113_v60, 0.0  ;;  %v5425_v41 = vld [vmem:[%s6645_s17 + $0x1a0] sm:$0xff]   ;;  %v5426_v42 = vld [vmem:[%s6645_s17 + $0x158] sm:$0xff]  }
 0xa57   :  { %v1248_v8 = vmax.f32 %v1062_v0, 0.0  ;;  %v1250_v9 = vmax.f32 %v1115_v2, 0.0  ;;  %v1263_v18 = vpack.c.bf16 %v1247_v5, %v1239_v10  ;;  %v5430_v5 = vld [vmem:[%s6645_s17 + $0x150] sm:$0xff]  }
 0xa58   :  { %v1153_v1 = vpop.f32.mrf.mxu0  ;;  %v1206_v12 = vpop.f32.mrf.mxu1  ;;  %v1265_v23 = vpack.c.bf16 %v1249_v7, %v1241_v13  ;;  %v6153_v7 = vsub.s32 6, %v5879_v37  ;;  %v5433_v10 = vld [vmem:[%s6645_s17 + $0x190] sm:$0xff]  }
 0xa59   :  { %v1264_v15 = vpack.c.bf16 %v1248_v8, %v1240_v4  ;;  %v1266_v16 = vpack.c.bf16 %v1250_v9, %v1242_v6  ;;  %5133 = vmatpush3.bf16.msra.mxu0 %v5416_v3  ;;  %5161 = vmatpush3.bf16.msra.mxu1 %v5417_v59  ;;  %v1154_v24 = vadd.f32 %v1153_v1, %v6116_v62  ;;  %v5428_v3 = vld [vmem:[%s6645_s17 + $0x118] sm:$0xff]   ;;  %v5431_v59 = vld [vmem:[%s6645_s17 + $0x1d0] sm:$0xff]   ;;  %v5434_v1 = vld [vmem:[%s6645_s17 + $0x148] sm:$0xff]  }
 0xa5a   :  { %v6126_v19 = vpop.f32.mrf.mxu0  ;;  %v6128_v20 = vpop.f32.mrf.mxu1  ;;  %5134 = vmatprep.subr.bf16.mxu0 %v5418_v63  ;;  %v1207_v25 = vadd.f32 %v1206_v12, %v6120_v58  ;;  %5162 = vmatprep.subr.bf16.mxu1 %v5419_v57  ;;  %v5429_v4 = vld [vmem:[%s6645_s17 + $0x198] sm:$0xff]   ;;  %v6150_v63 = vsub.s32 4, %v5879_v37  ;;  %v5432_v9 = vld [vmem:[%s6645_s17 + $0x110] sm:$0xff]   ;;  %v5435_v12 = vld [vmem:[%s6645_s17 + $0x1c8] sm:$0xff]  }
 0xa5b   :  { %1830 = vmatprep.mubr.bf16.mxu0 %v1264_v15  ;;  %1879 = vmatprep.mubr.bf16.mxu1 %v1266_v16  ;;  %v1228_v52 = vmax.f32 %v1154_v24, 0.0  ;;  %v912_v15 = vrot.slane %v6089_v53, %v6153_v7 }
 0xa5c   :  { %v1157_v27 = vpop.f32.mrf.mxu0  ;;  %v1210_v28 = vpop.f32.mrf.mxu1  ;;  %1831 = vmatmul.mubr.bf16.gmra.mxu0 %v1263_v18  ;;  %1880 = vmatmul.mubr.bf16.gmra.mxu1 %v1265_v23  ;;  %v1230_v47 = vmax.f32 %v1207_v25, 0.0  ;;  %v904_v57 = vrot.slane %v6089_v53, %v6150_v63  ;;  %v5439_v25 = vld [vmem:[%s6645_s17 + $0x1c0] sm:$0xff]  }
 0xa5d   :  { %v1158_v30 = vadd.f32 %v1157_v27, %v6116_v62  ;;  %v1211_v32 = vadd.f32 %v1210_v28, %v6120_v58  ;;  %5135 = vmatpush3.bf16.msra.mxu0 %v5420_v17  ;;  %5163 = vmatpush3.bf16.msra.mxu1 %v5421_v21  ;;  %v5436_v17 = vld [vmem:[%s6645_s17 + $0x108] sm:$0xff]   ;;  %v1209_v23 = vadd.f32 %v6128_v20, %v912_v15  ;;  %v5441_v20 = vld [vmem:[%s6645_s17 + $0x180] sm:$0xff]  }
 0xa5e   :  { %v6138_v34 = vpop.f32.mrf.mxu0  ;;  %v6140_v36 = vpop.f32.mrf.mxu1  ;;  %5136 = vmatprep.subr.bf16.mxu0 %v5422_v22  ;;  %5164 = vmatprep.subr.bf16.mxu1 %v5423_v26  ;;  %v1156_v18 = vadd.f32 %v6126_v19, %v904_v57  ;;  %v5437_v21 = vld [vmem:[%s6645_s17 + $0x188] sm:$0xff]   ;;  %v5438_v22 = vld [vmem:[%s6645_s17 + $0x140] sm:$0xff]   ;;  %v1152_v26 = vadd.f32 %v6110_v50, %v904_v57  ;;  %v1205_v27 = vadd.f32 %v6112_v56, %v912_v15 }
 0xa5f   :  { %v1236_v60 = vmax.f32 %v1158_v30, 0.0  ;;  %v1238_v48 = vmax.f32 %v1211_v32, 0.0  ;;  %v5440_v19 = vld [vmem:[%s6645_s17 + $0x100] sm:$0xff]  }
 0xa60   :  { %v1163_v54 = vpop.f32.mrf.mxu0  ;;  %v1216_v2 = vpop.f32.mrf.mxu1  ;;  %v1235_v30 = vmax.f32 %v1156_v18, 0.0  ;;  %v1229_v50 = vmax.f32 %v1205_v27, 0.0 }
 0xa61   :  { %v1260_v55 = vpack.c.bf16 %v1236_v60, %v1228_v52  ;;  %v1262_v0 = vpack.c.bf16 %v1238_v48, %v1230_v47  ;;  %5137 = vmatpush3.bf16.msra.mxu0 %v5424_v33  ;;  %5165 = vmatpush3.bf16.msra.mxu1 %v5425_v41  ;;  %v1164_v28 = vadd.f32 %v1163_v54, %v6116_v62  ;;  %v1237_v33 = vmax.f32 %v1209_v23, 0.0  ;;  %v4845_v23 = vld [vmem:[%s6647_s3] ss:$0 sm:$0xff] }
 0xa62   :  { %5138 = vmatprep.subr.bf16.mxu0 %v5426_v42  ;;  %5166 = vmatprep.subr.bf16.mxu1 %v5427_v49  ;;  %v1165_v6 = vpop.f32.mrf.mxu0  ;;  %v1218_v8 = vpop.f32.mrf.mxu1  ;;  %v1217_v32 = vadd.f32 %v1216_v2, %v6120_v58  ;;  %v1227_v42 = vmax.f32 %v1152_v26, 0.0 }
 0xa63   :  { %1920 = vmatprep.mubr.bf16.mxu0 %v1260_v55  ;;  %1969 = vmatprep.mubr.bf16.mxu1 %v1262_v0  ;;  %v1244_v47 = vmax.f32 %v1164_v28, 0.0  ;;  %v1166_v48 = vadd.f32 %v1165_v6, %v904_v57  ;;  %v1219_v49 = vadd.f32 %v1218_v8, %v912_v15  ;;  %v1215_v0 = vadd.f32 %v6140_v36, %v912_v15 }
 0xa64   :  { %v1167_v13 = vpop.f32.mrf.mxu0  ;;  %v1220_v16 = vpop.f32.mrf.mxu1  ;;  %v1259_v60 = vpack.c.bf16 %v1235_v30, %v1227_v42  ;;  %v1246_v56 = vmax.f32 %v1217_v32, 0.0 }
 0xa65   :  { %5139 = vmatpush3.bf16.msra.mxu0 %v5428_v3  ;;  %5167 = vmatpush3.bf16.msra.mxu1 %v5429_v4  ;;  %v1168_v24 = vadd.f32 %v1167_v13, %v6116_v62  ;;  %v1221_v53 = vadd.f32 %v1220_v16, %v6120_v58  ;;  %v1261_v62 = vpack.c.bf16 %v1237_v33, %v1229_v50  ;;  %v1251_v2 = vmax.f32 %v1166_v48, 0.0 }
 0xa66   :  { %5140 = vmatprep.subr.bf16.mxu0 %v5430_v5  ;;  %5168 = vmatprep.subr.bf16.mxu1 %v5431_v59  ;;  %v1162_v58 = vadd.f32 %v6138_v34, %v904_v57  ;;  %v1253_v3 = vmax.f32 %v1219_v49, 0.0  ;;  %v1245_v5 = vmax.f32 %v1215_v0, 0.0 }
 0xa67   :  { %v1252_v41 = vmax.f32 %v1168_v24, 0.0  ;;  %v1254_v52 = vmax.f32 %v1221_v53, 0.0 }
 0xa68   :  { %v1243_v4 = vmax.f32 %v1162_v58, 0.0 }
 0xa69   :  { %5141 = vmatpush3.bf16.msra.mxu0 %v5432_v9  ;;  %5169 = vmatpush3.bf16.msra.mxu1 %v5433_v10  ;;  %v1268_v54 = vpack.c.bf16 %v1252_v41, %v1244_v47  ;;  %v1270_v55 = vpack.c.bf16 %v1254_v52, %v1246_v56  ;;  %v1269_v9 = vpack.c.bf16 %v1253_v3, %v1245_v5 }
 0xa6a   :  { %5142 = vmatprep.subr.bf16.mxu0 %v5434_v1  ;;  %5170 = vmatprep.subr.bf16.mxu1 %v5435_v12  ;;  %v1267_v59 = vpack.c.bf16 %v1251_v2, %v1243_v4 }
 0xa6d   :  { %5143 = vmatpush3.bf16.msra.mxu0 %v5436_v17  ;;  %5171 = vmatpush3.bf16.msra.mxu1 %v5437_v21 }
 0xa6e   :  { %5144 = vmatprep.subr.bf16.mxu0 %v5438_v22  ;;  %5172 = vmatprep.subr.bf16.mxu1 %v5439_v25 }
 0xa71   :  { %5145 = vmatpush3.bf16.msra.mxu0 %v5440_v19  ;;  %5173 = vmatpush3.bf16.msra.mxu1 %v5441_v20 }
 0xa74   :  { %1921 = vmatmul.mubr.bf16.vlgmr.msra.gmra.mxu0 %v1259_v60  ;;  %1970 = vmatmul.mubr.bf16.vlgmr.msra.gmra.mxu1 %v1261_v62 }
 0xa75   :  { %1928 = vmatprep.mubr.bf16.mxu0 %v1268_v54  ;;  %1977 = vmatprep.mubr.bf16.mxu1 %v1270_v55 }
 0xa7c   :  { %1929 = vmatmul.mubr.bf16.gmra.mxu0 %v1267_v59  ;;  %1978 = vmatmul.mubr.bf16.gmra.mxu1 %v1269_v9 }
 0xb14   :  { %v5090_v6 = vpop.f32.mrf.mxu0  ;;  %v5118_v8 = vpop.f32.mrf.mxu1 }
 0xb16   :  { %v5091_v10 = vpop.f32.mrf.mxu0  ;;  %v5119_v34 = vpop.f32.mrf.mxu1 }
 0xb17   :  { %v5092_v21 = vadd.f32 %v5091_v10, %v5090_v6  ;;  %v5120_v28 = vadd.f32 %v5119_v34, %v5118_v8 }
 0xb18   :  { %v5093_v1 = vpop.f32.mrf.mxu0  ;;  %v5121_v12 = vpop.f32.mrf.mxu1 }
 0xb19   :  { %v1825_v25 = vadd.f32 %v5092_v21, %v4845_v23 }
 0xb1a   :  { %v5094_v57 = vpop.f32.mrf.mxu0  ;;  %v5122_v36 = vpop.f32.mrf.mxu1 }
 0xb1b   :  { %v5095_v26 = vadd.f32 %v5094_v57, %v5093_v1  ;;  %v1874_v20 = vadd.f32 %v5120_v28, %v1825_v25  ;;  %v5123_v50 = vadd.f32 %v5122_v36, %v5121_v12 }
 0xb1c   :  { %v5096_v13 = vpop.f32.mrf.mxu0  ;;  %v5124_v15 = vpop.f32.mrf.mxu1 }
 0xb1d   :  { %v1828_v33 = vadd.f32 %v5095_v26, %v4845_v23 }
 0xb1e   :  { %v5097_v16 = vpop.f32.mrf.mxu0  ;;  %v5125_v17 = vpop.f32.mrf.mxu1 }
 0xb1f   :  { %v5098_v30 = vadd.f32 %v5097_v16, %v5096_v13  ;;  %v1877_v49 = vadd.f32 %v5123_v50, %v1828_v33  ;;  %v5126_v2 = vadd.f32 %v5125_v17, %v5124_v15 }
 0xb20   :  { %v5099_v18 = vpop.f32.mrf.mxu0  ;;  %v5127_v22 = vpop.f32.mrf.mxu1 }
 0xb21   :  { %v1833_v48 = vadd.f32 %v5098_v30, %v4845_v23 }
 0xb22   :  { %v5100_v24 = vpop.f32.mrf.mxu0  ;;  %v5128_v53 = vpop.f32.mrf.mxu1 }
 0xb23   :  { %v5101_v54 = vadd.f32 %v5100_v24, %v5099_v18  ;;  %v1882_v6 = vadd.f32 %v5126_v2, %v1833_v48  ;;  %v5129_v13 = vadd.f32 %v5128_v53, %v5127_v22 }
 0xb25   :  { %v1836_v10 = vadd.f32 %v5101_v54, %v4845_v23 }
 0xb27   :  { %v1885_v24 = vadd.f32 %v5129_v13, %v1836_v10 }
 0xb34   :  { %v5146_v27 = vpop.f32.mrf.mxu0  ;;  %v5174_v19 = vpop.f32.mrf.mxu1 }
 0xb36   :  { %v5147_v32 = vpop.f32.mrf.mxu0  ;;  %v5175_v42 = vpop.f32.mrf.mxu1 }
 0xb37   :  { %v5148_v41 = vadd.f32 %v5147_v32, %v5146_v27  ;;  %v5176_v60 = vadd.f32 %v5175_v42, %v5174_v19 }
 0xb38   :  { %v5149_v52 = vpop.f32.mrf.mxu0  ;;  %v5177_v56 = vpop.f32.mrf.mxu1 }
 0xb39   :  { %v1923_v47 = vadd.f32 %v5148_v41, %v1874_v20 }
 0xb3a   :  { %v5150_v62 = vpop.f32.mrf.mxu0  ;;  %v5178_v0 = vpop.f32.mrf.mxu1 }
 0xb3b   :  { %v1972_v58 = vadd.f32 %v5176_v60, %v1923_v47  ;;  %v5151_v55 = vadd.f32 %v5150_v62, %v5149_v52  ;;  %v5179_v5 = vadd.f32 %v5178_v0, %v5177_v56 }
 0xb3c   :  { %v5152_v3 = vpop.f32.mrf.mxu0  ;;  %v5180_v59 = vpop.f32.mrf.mxu1 }
 0xb3d   :  { %v1926_v4 = vadd.f32 %v5151_v55, %v1877_v49  ;;  %v1986_v9 = vadd.f32 %v1972_v58, %v5971_v35 }
 0xb3e   :  { %v5153_v8 = vpop.f32.mrf.mxu0  ;;  %v5181_v12 = vpop.f32.mrf.mxu1 }
 0xb3f   :  { %v1975_v34 = vadd.f32 %v5179_v5, %v1926_v4  ;;  %v5154_v1 = vadd.f32 %v5153_v8, %v5152_v3  ;;  %v1992_v57 = vsel %vm256_vm0, %v1986_v9, 0.0  ;;  %v5182_v18 = vadd.f32 %v5181_v12, %v5180_v59  ;;  %v5625_v3 = vld [vmem:[%s5729_s25 + $0x18] sm:$0xff]  ;;  %v5626_v4 = vld [vmem:[%s5729_s25 + $0x8] sm:$0xff]  ;;  %v5627_v5 = vld [vmem:[%s5729_s25] sm:$0xff] }
 0xb40   :  { %v5155_v36 = vpop.f32.mrf.mxu0  ;;  %1993 = vadd.xlane.f32.xlu1 %v1992_v57  ;;  %v5183_v15 = vpop.f32.mrf.mxu1  ;;  %v5628_v59 = vld [vmem:[%s5729_s25 + $0x10] sm:$0xff]  ;;  %v5444_v8 = vld [vmem:[%s6649_s14 + $0x8] sm:$0xff]   ;;  %s6650_s25 = sld [smem:[#allocation13_spill]] }
 0xb41   :  { %v1931_v16 = vadd.f32 %v5154_v1, %v1882_v6  ;;  %v1987_v17 = vadd.f32 %v1975_v34, %v5979_v45  ;;  %v5443_v6 = vld [vmem:[%s6648_s8] sm:$0xff]   ;;  %5264 = vmatprep.subr.bf16.mxu1 %v5444_v8 }
 0xb42   :  { %v5156_v21 = vpop.f32.mrf.mxu0  ;;  %v5184_v26 = vpop.f32.mrf.mxu1  ;;  %5265 = vmatpush3.bf16.msra.mxu1 %v5444_v8  ;;  %v4917_v8 = vld [vmem:[%s6654_s12] ss:$0 sm:$0xff] }
 0xb43   :  { %v1980_v25 = vadd.f32 %v5182_v18, %v1931_v16  ;;  %v5157_v35 = vadd.f32 %v5156_v21, %v5155_v36  ;;  %v1995_v23 = vsel %vm256_vm0, %v1987_v17, 0.0  ;;  %v5185_v28 = vadd.f32 %v5184_v26, %v5183_v15 }
 0xb44   :  { %1996 = vadd.xlane.f32.xlu0 %v1995_v23 }
 0xb45   :  { %v1934_v27 = vadd.f32 %v5157_v35, %v1885_v24  ;;  %v1988_v19 = vadd.f32 %v1980_v25, %v5974_v40 }
 0xb46   :  { %v4910_v25 = vld [vmem:[%s6650_s25] ss:$0 sm:$0xff] }
 0xb47   :  { %v1983_v30 = vadd.f32 %v5185_v28, %v1934_v27  ;;  %v1998_v22 = vsel %vm256_vm0, %v1988_v19, 0.0  ;;  %v4911_v27 = vld [vmem:[%s6651_s24] ss:$0 sm:$0xff] }
 0xb48   :  { %1999 = vadd.xlane.f32.xlu1 %v1998_v22 }
 0xb49   :  { %v1989_v53 = vadd.f32 %v1983_v30, %v5982_v46 }
 0xb4b   :  { %v2001_v45 = vsel %vm256_vm0, %v1989_v53, 0.0 }
 0xb4c   :  { %2002 = vadd.xlane.f32.xlu0 %v2001_v45 }
 0xbc9   :  { %v1994_v32 = vpop.xlane.xlu1 %1993 }
 0xbca   :  { %v2004_v20 = vmul.f32 0.03125, %v1994_v32 }
 0xbcc   :  { %v2008_v33 = vsub.f32 %v1986_v9, %v2004_v20  ;;  %v5442_v9 = vld [vmem:[%s6648_s8 + $0x8] sm:$0xff]  }
 0xbcd   :  { %v1997_v41 = vpop.xlane.xlu0 %1996  ;;  %5256 = vmatprep.subr.bf16.mxu0 %v5442_v9 }
 0xbce   :  { %v2005_v42 = vmul.f32 0.03125, %v1997_v41  ;;  %v2012_v52 = vmul.f32 %v2008_v33, %v2008_v33  ;;  %5257 = vmatpush3.bf16.msra.mxu0 %v5442_v9 }
 0xbcf   :  { %5258 = vmatprep.subr.bf16.mxu0 %v5443_v6 }
 0xbd0   :  { %v2009_v50 = vsub.f32 %v1987_v17, %v2005_v42  ;;  %v2016_v47 = vsel %vm256_vm0, %v2012_v52, 0.0 }
 0xbd1   :  { %2017 = vadd.xlane.f32.xlu1 %v2016_v47  ;;  %v2000_v40 = vpop.xlane.xlu1 %1999  ;;  %v5445_v47 = vld [vmem:[%s6649_s14] sm:$0xff]  }
 0xbd2   :  { %v2006_v60 = vmul.f32 0.03125, %v2000_v40  ;;  %v2013_v56 = vmul.f32 %v2009_v50, %v2009_v50  ;;  %5259 = vmatpush3.bf16.msra.mxu0 %v5443_v6  ;;  %5266 = vmatprep.subr.bf16.mxu1 %v5445_v47 }
 0xbd3   :  { %5267 = vmatpush3.bf16.msra.mxu1 %v5445_v47  ;;  %v5464_v47 = vld [vmem:[#allocation2 + $0x24] ss:$196 sps:$4 sm:$0xff]  }
 0xbd4   :  { %v2010_v48 = vsub.f32 %v1988_v19, %v2006_v60  ;;  %v2019_v46 = vsel %vm256_vm0, %v2013_v56, 0.0  ;;  %5278 = vmatprep.subr.mxu1 %v5691_v11  ;;  %v4912_v56 = vld [vmem:[%s6652_s30] ss:$0 sm:$0xff] }
 0xbd5   :  { %2020 = vadd.xlane.f32.xlu0 %v2019_v46  ;;  %v2003_v62 = vpop.xlane.xlu0 %2002 }
 0xbd6   :  { %v2007_v49 = vmul.f32 0.03125, %v2003_v62  ;;  %v2014_v54 = vmul.f32 %v2010_v48, %v2010_v48 }
 0xbd8   :  { %v2011_v58 = vsub.f32 %v1989_v53, %v2007_v49  ;;  %v2022_v55 = vsel %vm256_vm0, %v2014_v54, 0.0 }
 0xbd9   :  { %2023 = vadd.xlane.f32.xlu1 %v2022_v55 }
 0xbda   :  { %v2015_v0 = vmul.f32 %v2011_v58, %v2011_v58 }
 0xbdc   :  { %v2025_v2 = vsel %vm256_vm0, %v2015_v0, 0.0 }
 0xbdd   :  { %2026 = vadd.xlane.f32.xlu0 %v2025_v2 }
 0xbea   :  { %2318 = vperm.xlu1 %5368, %v5625_v3  }
 0xbee   :  { %2310 = vperm.xlu1 %5368, %v5626_v4  }
 0xbf2   :  { %2306 = vperm.xlu1 %5368, %v5627_v5  }
 0xbf3   :  { %2314 = vperm.xlu0 %5369, %v5628_v59   ;;  %v5446_v59 = vld [vmem:[%s6653_s6] sm:$0xff]  }
 0xbf4   :  { %5272 = vmatprep.subr.bf16.mxu0 %v5446_v59 }
 0xbf6   :  { %5370 = vset.pattern.permute.xlu1 %v5690_v31 }
 0xbf7   :  { %2586 = vrot.lane.b32.xlu0 %v5925_v43, %s5693_s19 }
 0xbf8   :  { %5371 = vset.pattern.permute.xlu0 %v5690_v31 }
 0xc5a   :  { %v2018_v10 = vpop.xlane.xlu1 %2017 }
 0xc5b   :  { %v2028_v34 = vmul.f32 0.03125, %v2018_v10 }
 0xc5d   :  { %v2032_v1 = vadd.f32 1e-05, %v2028_v34 }
 0xc5e   :  { %v2021_v12 = vpop.xlane.xlu0 %2020 }
 0xc5f   :  { %5617 = vrsqrt.f32 %v2032_v1  ;;  %v2029_v57 = vmul.f32 0.03125, %v2021_v12 }
 0xc61   :  { %v2033_v36 = vadd.f32 1e-05, %v2029_v57 }
 0xc62   :  { %v2024_v13 = vpop.xlane.xlu1 %2023 }
 0xc63   :  { %5619 = vrsqrt.f32 %v2033_v36  ;;  %v2030_v31 = vmul.f32 0.03125, %v2024_v13 }
 0xc65   :  { %v2034_v16 = vadd.f32 1e-05, %v2030_v31 }
 0xc66   :  { %v2027_v18 = vpop.xlane.xlu0 %2026  ;;  %v6222_v10 = vpop.permute.xlu1 %2318 }
 0xc67   :  { %5621 = vrsqrt.f32 %v2034_v16  ;;  %v2031_v15 = vmul.f32 0.03125, %v2027_v18 }
 0xc69   :  { %v2035_v17 = vadd.f32 1e-05, %v2031_v15 }
 0xc6a   :  { %v6224_v15 = vpop.permute.xlu1 %2310 }
 0xc6b   :  { %5623 = vrsqrt.f32 %v2035_v17 }
 0xc6c   :  { %v5618_v21 = vpop.eup %5617 }
 0xc6d   :  { %v2040_v24 = vmul.f32 %v5618_v21, %v2008_v33 }
 0xc6f   :  { %v2050_v23 = vmul.f32 %v4910_v25, %v2040_v24 }
 0xc70   :  { %v5620_v35 = vpop.eup %5619 }
 0xc71   :  { %v2041_v26 = vmul.f32 %v5620_v35, %v2009_v50  ;;  %v6206_v53 = vadd.f32 %v4911_v27, %v2050_v23  ;;  %v6228_v35 = vpop.permute.xlu0 %2314  ;;  %v6234_v23 = vpop.permute.xlu1 %2306 }
 0xc73   :  { %v2051_v28 = vmul.f32 %v4910_v25, %v2041_v26 }
 0xc74   :  { %v5622_v19 = vpop.eup %5621 }
 0xc75   :  { %v2042_v30 = vmul.f32 %v5622_v19, %v2010_v48  ;;  %v6204_v22 = vadd.f32 %v4911_v27, %v2051_v28  ;;  %v5449_v28 = vld [vmem:[#allocation2 + $0x18c] ss:$196 sps:$4 sm:$0xff]   ;;  %v2398_v19 = vmul.f32 %v6234_v23, %v6206_v53 }
 0xc77   :  { %v2064_v45 = vpack.c.bf16 %v6204_v22, %v6206_v53  ;;  %v2052_v33 = vmul.f32 %v4910_v25, %v2042_v30  ;;  %v5447_v30 = vld [vmem:[#allocation2 + $0x188] ss:$196 sps:$4 sm:$0xff]   ;;  %v5453_v53 = vld [vmem:[#allocation2 + $0x198] ss:$196 sps:$4 sm:$0xff]  }
 0xc78   :  { %v5624_v32 = vpop.eup %5623 }
 0xc79   :  { %v2043_v20 = vmul.f32 %v5624_v32, %v2011_v58  ;;  %5260 = vmatprep.mubr.msk.bf16.mxu0 %vm256_vm0, %v2064_v45  ;;  %v2062_v52 = vadd.f32 %v4911_v27, %v2052_v33  ;;  %v6243_v45 = vld [vmem:[%s6655_s27] sm:$0x3]  ;;  %v5452_v32 = vld [vmem:[#allocation2 + $0x4] ss:$196 sps:$4 sm:$0xff]   ;;  %v6251_v33 = vpack.c.bf16 %v5925_v43, %v5925_v43 }
 0xc7a   :  { %v5462_v43 = vld [vmem:[#allocation2 + $0x20] ss:$196 sps:$4 sm:$0xff]  }
 0xc7b   :  { %v2053_v41 = vmul.f32 %v4910_v25, %v2043_v20  ;;  %v2400_v26 = vmul.f32 %v6228_v35, %v2062_v52  ;;  %v5455_v20 = vld [vmem:[#allocation2 + $0x19c] ss:$196 sps:$4 sm:$0xff]  }
 0xc7d   :  { %v2063_v42 = vadd.f32 %v4911_v27, %v2053_v41  ;;  %v2399_v27 = vmul.f32 %v6224_v15, %v6204_v22  ;;  %v5450_v22 = vld [vmem:[#allocation2] ss:$196 sps:$4 sm:$0xff]   ;;  %v5458_v41 = vld [vmem:[#allocation2 + $0x14] ss:$196 sps:$4 sm:$0xff]  }
 0xc7f   :  { %v2065_v50 = vpack.c.bf16 %v2063_v42, %v2062_v52  ;;  %v2401_v25 = vmul.f32 %v6222_v10, %v2063_v42  ;;  %v5456_v42 = vld [vmem:[#allocation2 + $0x10] ss:$196 sps:$4 sm:$0xff]  }
 0xc80   :  { %v5461_v52 = vld [vmem:[#allocation2 + $0x1ac] ss:$196 sps:$4 sm:$0xff]  }
 0xc81   :  { %5261 = vmatmul.mubr.msk.bf16.vlgmr.msra.gmra.mxu0 %vm256_vm0, %v2065_v50  ;;  %v5459_v50 = vld [vmem:[#allocation2 + $0x1a8] ss:$196 sps:$4 sm:$0xff]  }
 0xc82   :  { %5273 = vmatpush3.bf16.msra.mxu0 %v5446_v59  ;;  %v5486_v59 = vld [vmem:[#allocation2 + $0x60] ss:$196 sps:$4 sm:$0xff]  }
 0xc83   :  { %5289 = vmatprep.subr.mxu0 %v5691_v11 }
 0xd41   :  { %v5262_v40 = vpop.f32.mrf.mxu0 }
 0xd42   :  { %v2138_v49 = vadd.f32 %v5262_v40, %v4912_v56  ;;  %v5467_v40 = vld [vmem:[#allocation2 + $0x1bc] ss:$196 sps:$4 sm:$0xff]  }
 0xd43   :  { %v2129_v60 = vpop.f32.mrf.mxu0 }
 0xd44   :  { %v2130_v46 = vadd.f32 %v4912_v56, %v2129_v60  ;;  %v2146_v3 = vmax.f32 %v2138_v49, 0.0  ;;  %v5465_v60 = vld [vmem:[#allocation2 + $0x1b8] ss:$196 sps:$4 sm:$0xff]   ;;  %v5476_v49 = vld [vmem:[#allocation2 + $0x44] ss:$196 sps:$4 sm:$0xff]  }
 0xd45   :  { %v5263_v48 = vpop.f32.mrf.mxu0 }
 0xd46   :  { %v2141_v62 = vadd.f32 %v5263_v48, %v4912_v56  ;;  %v2144_v0 = vmax.f32 %v2130_v46, 0.0  ;;  %v5468_v48 = vld [vmem:[#allocation2 + $0x30] ss:$196 sps:$4 sm:$0xff]  }
 0xd47   :  { %v2132_v54 = vpop.f32.mrf.mxu0  ;;  %v5473_v46 = vld [vmem:[#allocation2 + $0x1cc] ss:$196 sps:$4 sm:$0xff]  }
 0xd48   :  { %v2133_v58 = vadd.f32 %v4912_v56, %v2132_v54  ;;  %v2147_v55 = vmax.f32 %v2141_v62, 0.0  ;;  %v5470_v56 = vld [vmem:[#allocation2 + $0x34] ss:$196 sps:$4 sm:$0xff]   ;;  %v5471_v62 = vld [vmem:[#allocation2 + $0x1c8] ss:$196 sps:$4 sm:$0xff]  }
 0xd49   :  { %v5474_v54 = vld [vmem:[#allocation2 + $0x40] ss:$196 sps:$4 sm:$0xff]  }
 0xd4a   :  { %v2145_v2 = vmax.f32 %v2133_v58, 0.0  ;;  %v2149_v5 = vpack.c.bf16 %v2147_v55, %v2146_v3  ;;  %v5479_v58 = vld [vmem:[#allocation2 + $0x1dc] ss:$196 sps:$4 sm:$0xff]   ;;  %v5485_v3 = vld [vmem:[#allocation2 + $0x1ec] ss:$196 sps:$4 sm:$0xff]  }
 0xd4b   :  { %v5477_v55 = vld [vmem:[#allocation2 + $0x1d8] ss:$196 sps:$4 sm:$0xff]  }
 0xd4c   :  { %v2148_v4 = vpack.c.bf16 %v2145_v2, %v2144_v0  ;;  %v5482_v0 = vld [vmem:[#allocation2 + $0x54] ss:$196 sps:$4 sm:$0xff]  }
 0xd4d   :  { %v5480_v2 = vld [vmem:[#allocation2 + $0x50] ss:$196 sps:$4 sm:$0xff]  }
 0xd4e   :  { %5268 = vmatprep.mubr.msk.bf16.mxu1 %vm256_vm0, %v2148_v4  ;;  %v5483_v4 = vld [vmem:[#allocation2 + $0x1e8] ss:$196 sps:$4 sm:$0xff]  }
 0xd4f   :  { %5269 = vmatmul.mubr.msk.bf16.vlgmr.msra.gmra.mxu1 %vm256_vm0, %v2149_v5  ;;  %v5488_v5 = vld [vmem:[#allocation2 + $0x64] ss:$196 sps:$4 sm:$0xff]  }
 0xd50   :  { %5286 = vmatprep.mubr.msk.f32.mxu1 %vm5692_vm1, %v5691_v11 }
 0xe0f   :  { %v5270_v9 = vpop.f32.mrf.mxu1 }
 0xe10   :  { %v2222_v57 = vadd.f32 %v5270_v9, %v4917_v8  ;;  %v5491_v9 = vld [vmem:[#allocation2 + $0x1fc] ss:$196 sps:$4 sm:$0xff]  }
 0xe11   :  { %v2213_v6 = vpop.f32.mrf.mxu1 }
 0xe12   :  { %v2214_v1 = vadd.f32 %v4917_v8, %v2213_v6  ;;  %v2230_v17 = vmax.f32 %v2222_v57, 0.0  ;;  %v5489_v6 = vld [vmem:[#allocation2 + $0x1f8] ss:$196 sps:$4 sm:$0xff]   ;;  %v5500_v57 = vld [vmem:[#allocation2 + $0x84] ss:$196 sps:$4 sm:$0xff]  }
 0xe13   :  { %v5271_v34 = vpop.f32.mrf.mxu1 }
 0xe14   :  { %v2225_v12 = vadd.f32 %v5271_v34, %v4917_v8  ;;  %v2228_v16 = vmax.f32 %v2214_v1, 0.0  ;;  %v5492_v34 = vld [vmem:[#allocation2 + $0x70] ss:$196 sps:$4 sm:$0xff]  }
 0xe15   :  { %v2216_v36 = vpop.f32.mrf.mxu1  ;;  %v5497_v1 = vld [vmem:[#allocation2 + $0x20c] ss:$196 sps:$4 sm:$0xff]  }
 0xe16   :  { %v2217_v13 = vadd.f32 %v4917_v8, %v2216_v36  ;;  %v2231_v31 = vmax.f32 %v2225_v12, 0.0  ;;  %v5494_v8 = vld [vmem:[#allocation2 + $0x74] ss:$196 sps:$4 sm:$0xff]   ;;  %v5495_v12 = vld [vmem:[#allocation2 + $0x208] ss:$196 sps:$4 sm:$0xff]  }
 0xe17   :  { %v5498_v36 = vld [vmem:[#allocation2 + $0x80] ss:$196 sps:$4 sm:$0xff]  }
 0xe18   :  { %v2229_v18 = vmax.f32 %v2217_v13, 0.0  ;;  %v2233_v24 = vpack.c.bf16 %v2231_v31, %v2230_v17  ;;  %v5503_v13 = vld [vmem:[#allocation2 + $0x21c] ss:$196 sps:$4 sm:$0xff]   ;;  %v5509_v17 = vld [vmem:[#allocation2 + $0x22c] ss:$196 sps:$4 sm:$0xff]  }
 0xe19   :  { %v5501_v31 = vld [vmem:[#allocation2 + $0x218] ss:$196 sps:$4 sm:$0xff]  }
 0xe1a   :  { %v2232_v21 = vpack.c.bf16 %v2229_v18, %v2228_v16  ;;  %v5506_v16 = vld [vmem:[#allocation2 + $0x94] ss:$196 sps:$4 sm:$0xff]  }
 0xe1b   :  { %v5504_v18 = vld [vmem:[#allocation2 + $0x90] ss:$196 sps:$4 sm:$0xff]  }
 0xe1c   :  { %5274 = vmatprep.mubr.msk.bf16.mxu0 %vm353_vm2, %v2232_v21  ;;  %v5507_v21 = vld [vmem:[#allocation2 + $0x228] ss:$196 sps:$4 sm:$0xff]  }
 0xe1d   :  { %5275 = vmatmul.mubr.msk.bf16.vlgmr.msra.gmra.mxu0 %vm353_vm2, %v2233_v24  ;;  %v5512_v24 = vld [vmem:[#allocation2 + $0xa4] ss:$196 sps:$4 sm:$0xff]  }
 0xe1e   :  { %5290 = vmatpush3.msra.mxu0 %v2401_v25  ;;  %5297 = vmatprep.mubr.msk.f32.mxu0 %vm5692_vm1, %v5691_v11  ;;  %v5510_v25 = vld [vmem:[#allocation2 + $0xa0] ss:$196 sps:$4 sm:$0xff]  }
 0xe1f   :  { %5291 = vmatprep.subr.mxu0 %v5691_v11 }
 0xe20   :  { %5292 = vmatpush3.msra.mxu0 %v2400_v26  ;;  %v5515_v26 = vld [vmem:[#allocation2 + $0x23c] ss:$196 sps:$4 sm:$0xff]  }
 0xe21   :  { %5293 = vmatprep.subr.mxu0 %v5691_v11 }
 0xe22   :  { %5294 = vmatpush3.msra.mxu0 %v2399_v27  ;;  %v5513_v27 = vld [vmem:[#allocation2 + $0x238] ss:$196 sps:$4 sm:$0xff]  }
 0xe23   :  { %5295 = vmatprep.subr.mxu0 %v5691_v11 }
 0xe24   :  { %5296 = vmatpush3.msra.mxu0 %v2398_v19  ;;  %v5516_v19 = vld [vmem:[#allocation2 + $0xb0] ss:$196 sps:$4 sm:$0xff]  }
 0xe25   :  { %3458 = vmatprep.subr.bf16.mxu0 %v5449_v28  ;;  %5298 = vmatmul.mubr.msk.f32.vlgmr.msra.gmra.mxu0 %vm256_vm0, %v6243_v45  ;;  %v5518_v28 = vld [vmem:[#allocation2 + $0xb4] ss:$196 sps:$4 sm:$0xff]  }
 0xe26   :  { %3459 = vmatpush1.bf16.msra.mxu0 %v5447_v30  ;;  %3478 = vmatprep.mubr.bf16.mxu0 %v5689_v14  ;;  %v5519_v30 = vld [vmem:[#allocation2 + $0x248] ss:$196 sps:$4 sm:$0xff]  }
 0xe27   :  { %3460 = vmatprep.subr.bf16.mxu0 %v5452_v32  ;;  %v5520_v32 = vld [vmem:[#allocation2 + $0xc0] ss:$196 sps:$4 sm:$0xff]  }
 0xe2a   :  { %3461 = vmatpush1.bf16.msra.mxu0 %v5450_v22  ;;  %v4922_v22 = vld [vmem:[%s6656_s23] ss:$0 sm:$0xff] }
 0xe2b   :  { %3540 = vmatprep.subr.bf16.mxu0 %v5455_v20 }
 0xe2d   :  { %5028 = vmatmul.mubr.msk.bf16.vlgmr.msra.gmra.mxu0 %vm256_vm0, %v6251_v33 }
 0xe2e   :  { %3541 = vmatpush1.bf16.msra.mxu0 %v5453_v53  ;;  %3560 = vmatprep.mubr.bf16.mxu0 %v5689_v14 }
 0xe2f   :  { %3542 = vmatprep.subr.bf16.mxu0 %v5458_v41 }
 0xe32   :  { %3543 = vmatpush1.bf16.msra.mxu0 %v5456_v42 }
 0xe33   :  { %3622 = vmatprep.subr.bf16.mxu0 %v5461_v52 }
 0xe35   :  { %5030 = vmatmul.mubr.msk.bf16.vlgmr.msra.gmra.mxu0 %vm256_vm0, %v6251_v33 }
 0xe36   :  { %3623 = vmatpush1.bf16.msra.mxu0 %v5459_v50  ;;  %3642 = vmatprep.mubr.bf16.mxu0 %v5689_v14 }
 0xe37   :  { %3624 = vmatprep.subr.bf16.mxu0 %v5464_v47 }
 0xe3a   :  { %3625 = vmatpush1.bf16.msra.mxu0 %v5462_v43 }
 0xe3b   :  { %3704 = vmatprep.subr.bf16.mxu0 %v5467_v40 }
 0xe3d   :  { %5032 = vmatmul.mubr.msk.bf16.vlgmr.msra.gmra.mxu0 %vm256_vm0, %v6251_v33 }
 0xe3e   :  { %3705 = vmatpush1.bf16.msra.mxu0 %v5465_v60  ;;  %3724 = vmatprep.mubr.bf16.mxu0 %v5689_v14 }
 0xe3f   :  { %3706 = vmatprep.subr.bf16.mxu0 %v5470_v56 }
 0xe42   :  { %3707 = vmatpush1.bf16.msra.mxu0 %v5468_v48 }
 0xe43   :  { %3786 = vmatprep.subr.bf16.mxu0 %v5473_v46 }
 0xe45   :  { %5034 = vmatmul.mubr.msk.bf16.vlgmr.msra.gmra.mxu0 %vm256_vm0, %v6251_v33 }
 0xe46   :  { %3787 = vmatpush1.bf16.msra.mxu0 %v5471_v62  ;;  %3806 = vmatprep.mubr.bf16.mxu0 %v5689_v14  ;;  %v6301_v62 = vld [vmem:[%s5857_s21] sm:$0xff] }
 0xe47   :  { %3788 = vmatprep.subr.bf16.mxu0 %v5476_v49  ;;  %v2713_v49 = vrot.slane %v6301_v62, %v5885_v39 }
 0xe4a   :  { %3789 = vmatpush1.bf16.msra.mxu0 %v5474_v54 }
 0xe4b   :  { %3868 = vmatprep.subr.bf16.mxu0 %v5479_v58 }
 0xe4d   :  { %5036 = vmatmul.mubr.msk.bf16.vlgmr.msra.gmra.mxu0 %vm256_vm0, %v6251_v33 }
 0xe4e   :  { %3869 = vmatpush1.bf16.msra.mxu0 %v5477_v55  ;;  %3888 = vmatprep.mubr.bf16.mxu0 %v5689_v14 }
 0xe4f   :  { %3870 = vmatprep.subr.bf16.mxu0 %v5482_v0 }
 0xe52   :  { %3871 = vmatpush1.bf16.msra.mxu0 %v5480_v2 }
 0xe53   :  { %3950 = vmatprep.subr.bf16.mxu0 %v5485_v3  ;;  %v2725_v3 = vrot.slane %v6301_v62, %v6150_v63 }
 0xe55   :  { %5038 = vmatmul.mubr.msk.bf16.vlgmr.msra.gmra.mxu0 %vm256_vm0, %v6251_v33 }
 0xe56   :  { %3951 = vmatpush1.bf16.msra.mxu0 %v5483_v4  ;;  %3970 = vmatprep.mubr.bf16.mxu0 %v5689_v14  ;;  %v2729_v4 = vrot.slane %v6301_v62, %v6102_v29 }
 0xe57   :  { %3952 = vmatprep.subr.bf16.mxu0 %v5488_v5 }
 0xe5a   :  { %3953 = vmatpush1.bf16.msra.mxu0 %v5486_v59 }
 0xe5b   :  { %4032 = vmatprep.subr.bf16.mxu0 %v5491_v9 }
 0xe5d   :  { %5040 = vmatmul.mubr.msk.bf16.vlgmr.msra.gmra.mxu0 %vm256_vm0, %v6251_v33 }
 0xe5e   :  { %4033 = vmatpush1.bf16.msra.mxu0 %v5489_v6  ;;  %4052 = vmatprep.mubr.bf16.mxu0 %v5689_v14 }
 0xe5f   :  { %4034 = vmatprep.subr.bf16.mxu0 %v5494_v8 }
 0xe62   :  { %4035 = vmatpush1.bf16.msra.mxu0 %v5492_v34  ;;  %v6330_v34 = vld [vmem:[%s5857_s21 + $0x8] sm:$0xff] }
 0xe63   :  { %4114 = vmatprep.subr.bf16.mxu0 %v5497_v1 }
 0xe65   :  { %5042 = vmatmul.mubr.msk.bf16.vlgmr.msra.gmra.mxu0 %vm256_vm0, %v6251_v33 }
 0xe66   :  { %4115 = vmatpush1.bf16.msra.mxu0 %v5495_v12  ;;  %4134 = vmatprep.mubr.bf16.mxu0 %v5689_v14 }
 0xe67   :  { %4116 = vmatprep.subr.bf16.mxu0 %v5500_v57  ;;  %v2741_v57 = vrot.slane %v6330_v34, %v5882_v38 }
 0xe6a   :  { %4117 = vmatpush1.bf16.msra.mxu0 %v5498_v36  ;;  %v2745_v36 = vrot.slane %v6330_v34, %v5885_v39 }
 0xe6b   :  { %4196 = vmatprep.subr.bf16.mxu0 %v5503_v13 }
 0xe6d   :  { %5044 = vmatmul.mubr.msk.bf16.vlgmr.msra.gmra.mxu0 %vm256_vm0, %v6251_v33 }
 0xe6e   :  { %4197 = vmatpush1.bf16.msra.mxu0 %v5501_v31  ;;  %4216 = vmatprep.mubr.bf16.mxu0 %v5689_v14 }
 0xe6f   :  { %4198 = vmatprep.subr.bf16.mxu0 %v5506_v16 }
 0xe72   :  { %4199 = vmatpush1.bf16.msra.mxu0 %v5504_v18 }
 0xe73   :  { %4278 = vmatprep.subr.bf16.mxu0 %v5509_v17 }
 0xe75   :  { %5046 = vmatmul.mubr.msk.bf16.vlgmr.msra.gmra.mxu0 %vm256_vm0, %v6251_v33 }
 0xe76   :  { %4279 = vmatpush1.bf16.msra.mxu0 %v5507_v21  ;;  %4298 = vmatprep.mubr.bf16.mxu0 %v5689_v14 }
 0xe77   :  { %4280 = vmatprep.subr.bf16.mxu0 %v5512_v24 }
 0xe7a   :  { %4281 = vmatpush1.bf16.msra.mxu0 %v5510_v25  ;;  %v2757_v25 = vrot.slane %v6330_v34, %v6150_v63 }
 0xe7b   :  { %4360 = vmatprep.subr.bf16.mxu0 %v5515_v26  ;;  %v2761_v26 = vrot.slane %v6330_v34, %v6102_v29 }
 0xe7d   :  { %5048 = vmatmul.mubr.msk.bf16.vlgmr.msra.gmra.mxu0 %vm256_vm0, %v6251_v33 }
 0xe7e   :  { %4361 = vmatpush1.bf16.msra.mxu0 %v5513_v27  ;;  %4380 = vmatprep.mubr.bf16.mxu0 %v5689_v14 }
 0xe7f   :  { %4362 = vmatprep.subr.bf16.mxu0 %v5518_v28 }
 0xe82   :  { %4363 = vmatpush1.bf16.msra.mxu0 %v5516_v19 }
 0xe83   :  { %5311 = vmatprep.subr.bf16.mxu0 %v5691_v11 }
 0xe85   :  { %5050 = vmatmul.mubr.msk.bf16.vlgmr.msra.gmra.mxu0 %vm256_vm0, %v6251_v33 }
 0xe86   :  { %5312 = vmatpush3.bf16.msra.mxu0 %v5519_v30  ;;  %5315 = vmatprep.mubr.msk.bf16.mxu0 %vm5692_vm1, %v5691_v11 }
 0xe87   :  { %5313 = vmatprep.subr.bf16.mxu0 %v5691_v11 }
 0xe8a   :  { %5314 = vmatpush3.bf16.msra.mxu0 %v5520_v32 }
 0xe8d   :  { %5316 = vmatmul.mubr.msk.bf16.vlgmr.msra.gmra.mxu0 %vm256_vm0, %v6251_v33 }
 0xedd   :  { %v5276_v20 = vpop.f32.mrf.mxu0 }
 0xede   :  { %v2298_v53 = vadd.f32 %v5276_v20, %v4922_v22 }
 0xedf   :  { %v2289_v41 = vpop.f32.mrf.mxu0 }
 0xee0   :  { %2488 = vperm.xlu1 %5370, %v2298_v53   ;;  %v2323_v60 = vmul.f32 %v6228_v35, %v2298_v53  ;;  %v2290_v56 = vadd.f32 %v4922_v22, %v2289_v41  ;;  %v2709_v35 = vrot.slane %v6301_v62, %v5882_v38 }
 0xee1   :  { %v5277_v42 = vpop.f32.mrf.mxu0 }
 0xee2   :  { %v2301_v52 = vadd.f32 %v5277_v42, %v4922_v22 }
 0xee3   :  { %v2292_v50 = vpop.f32.mrf.mxu0 }
 0xee4   :  { %v2324_v47 = vmul.f32 %v6222_v10, %v2301_v52  ;;  %v2293_v43 = vadd.f32 %v4922_v22, %v2292_v50  ;;  %2493 = vperm.xlu1 %5370, %v2301_v52   ;;  %v2321_v10 = vmul.f32 %v6234_v23, %v2290_v56  ;;  %v6353_v22 = vld [vmem:[%s5857_s21 + $0x10] sm:$0xff] }
 0xee5   :  { %v2468_v40 = vpop.f32.mrf.mxu0  ;;  %v2773_v41 = vrot.slane %v6353_v22, %v5882_v38  ;;  %v2777_v42 = vrot.slane %v6353_v22, %v5885_v39 }
 0xee6   :  { %5279 = vmatpush3.msra.mxu1 %v2324_v47  ;;  %v2322_v46 = vmul.f32 %v6224_v15, %v2293_v43 }
 0xee7   :  { %5280 = vmatprep.subr.mxu1 %v5691_v11  ;;  %v5299_v48 = vpop.f32.mrf.mxu0 }
 0xee8   :  { %2483 = vperm.xlu1 %5370, %v2293_v43   ;;  %5281 = vmatpush3.msra.mxu1 %v2323_v60  ;;  %v2789_v48 = vrot.slane %v6353_v22, %v6150_v63 }
 0xee9   :  { %5282 = vmatprep.subr.mxu1 %v5691_v11 }
 0xeea   :  { %5283 = vmatpush3.msra.mxu1 %v2322_v46  ;;  %v2793_v46 = vrot.slane %v6353_v22, %v6102_v29 }
 0xeeb   :  { %5284 = vmatprep.subr.mxu1 %v5691_v11 }
 0xeec   :  { %2478 = vperm.xlu1 %5370, %v2290_v56   ;;  %5285 = vmatpush3.msra.mxu1 %v2321_v10 }
 0xeed   :  { %v3480_v15 = vpop.f32.mrf.mxu0  ;;  %5300 = vmatprep.subr.mxu1 %v5691_v11  ;;  %5287 = vmatmul.mubr.msk.f32.vlgmr.msra.gmra.mxu1 %vm256_vm0, %v6243_v45 }
 0xeee   :  { %5308 = vmatprep.mubr.msk.f32.mxu1 %vm5692_vm1, %v5691_v11  ;;  %v6314_v54 = vadd.f32 %v3480_v15, %v2709_v35 }
 0xeef   :  { %v3482_v23 = vpop.f32.mrf.mxu0 }
 0xef0   :  { %v6316_v58 = vadd.f32 %v3482_v23, %v2713_v49  ;;  %2574 = vrot.lane.b32.xlu1 %v2468_v40, %s5688_s18 }
 0xef1   :  { %v3484_v55 = vpop.f32.mrf.mxu0 }
 0xef2   :  { %v4519_v0 = vcombine.low %v6314_v54, %v6316_v58  ;;  %v6376_v55 = vld [vmem:[%s5857_s21 + $0x18] sm:$0xff] }
 0xef3   :  { %v3485_v2 = vpop.f32.mrf.mxu0 }
 0xef5   :  { %v3562_v5 = vpop.f32.mrf.mxu0 }
 0xef6   :  { %v6325_v9 = vadd.f32 %v3562_v5, %v2725_v3  ;;  %v2809_v5 = vrot.slane %v6376_v55, %v5885_v39 }
 0xef7   :  { %v3564_v59 = vpop.f32.mrf.mxu0 }
 0xef8   :  { %v6327_v6 = vadd.f32 %v3564_v59, %v2729_v4  ;;  %v2805_v4 = vrot.slane %v6376_v55, %v5882_v38 }
 0xef9   :  { %v3566_v8 = vpop.f32.mrf.mxu0 }
 0xefa   :  { %v4536_v1 = vcombine.low %v6325_v9, %v6327_v6 }
 0xefb   :  { %v3567_v12 = vpop.f32.mrf.mxu0 }
 0xefd   :  { %v3644_v13 = vpop.f32.mrf.mxu0 }
 0xefe   :  { %v6338_v16 = vadd.f32 %v3644_v13, %v2741_v57 }
 0xeff   :  { %v3646_v31 = vpop.f32.mrf.mxu0 }
 0xf00   :  { %v6340_v18 = vadd.f32 %v3646_v31, %v2745_v36 }
 0xf01   :  { %v3648_v17 = vpop.f32.mrf.mxu0 }
 0xf02   :  { %v4553_v21 = vcombine.low %v6338_v16, %v6340_v18  ;;  %v2821_v17 = vrot.slane %v6376_v55, %v6150_v63 }
 0xf03   :  { %v3649_v24 = vpop.f32.mrf.mxu0 }
 0xf04   :  { %v2825_v24 = vrot.slane %v6376_v55, %v6102_v29 }
 0xf05   :  { %v3726_v27 = vpop.f32.mrf.mxu0 }
 0xf06   :  { %v6348_v19 = vadd.f32 %v3726_v27, %v2757_v25 }
 0xf07   :  { %v3728_v28 = vpop.f32.mrf.mxu0 }
 0xf08   :  { %v6350_v30 = vadd.f32 %v3728_v28, %v2761_v26 }
 0xf09   :  { %v3730_v32 = vpop.f32.mrf.mxu0 }
 0xf0a   :  { %v4570_v20 = vcombine.low %v6348_v19, %v6350_v30 }
 0xf0b   :  { %v3731_v53 = vpop.f32.mrf.mxu0 }
 0xf0c   :  { %v6399_v53 = vld [vmem:[%s5857_s21 + $0x20] sm:$0xff] }
 0xf0d   :  { %v3808_v52 = vpop.f32.mrf.mxu0 }
 0xf0e   :  { %v6361_v47 = vadd.f32 %v3808_v52, %v2773_v41  ;;  %v2837_v52 = vrot.slane %v6399_v53, %v5882_v38 }
 0xf0f   :  { %v3810_v50 = vpop.f32.mrf.mxu0 }
 0xf10   :  { %v6363_v43 = vadd.f32 %v3810_v50, %v2777_v42  ;;  %v2841_v50 = vrot.slane %v6399_v53, %v5885_v39 }
 0xf11   :  { %v3812_v40 = vpop.f32.mrf.mxu0 }
 0xf12   :  { %v4587_v60 = vcombine.low %v6361_v47, %v6363_v43 }
 0xf13   :  { %v3813_v56 = vpop.f32.mrf.mxu0 }
 0xf15   :  { %v3890_v10 = vpop.f32.mrf.mxu0 }
 0xf16   :  { %v6371_v49 = vadd.f32 %v3890_v10, %v2789_v48 }
 0xf17   :  { %v3892_v35 = vpop.f32.mrf.mxu0 }
 0xf18   :  { %v6373_v15 = vadd.f32 %v3892_v35, %v2793_v46 }
 0xf19   :  { %v3894_v23 = vpop.f32.mrf.mxu0 }
 0xf1a   :  { %v4604_v2 = vcombine.low %v6371_v49, %v6373_v15 }
 0xf1b   :  { %v3895_v3 = vpop.f32.mrf.mxu0 }
 0xf1c   :  { %v2853_v3 = vrot.slane %v6399_v53, %v6150_v63 }
 0xf1d   :  { %v3972_v59 = vpop.f32.mrf.mxu0 }
 0xf1e   :  { %v6384_v12 = vadd.f32 %v3972_v59, %v2805_v4  ;;  %v2857_v4 = vrot.slane %v6399_v53, %v6102_v29 }
 0xf1f   :  { %v3974_v8 = vpop.f32.mrf.mxu0 }
 0xf20   :  { %v6386_v57 = vadd.f32 %v3974_v8, %v2809_v5 }
 0xf21   :  { %v3976_v36 = vpop.f32.mrf.mxu0 }
 0xf22   :  { %v4621_v13 = vcombine.low %v6384_v12, %v6386_v57 }
 0xf23   :  { %v3977_v31 = vpop.f32.mrf.mxu0 }
 0xf25   :  { %v4054_v25 = vpop.f32.mrf.mxu0 }
 0xf26   :  { %v6394_v27 = vadd.f32 %v4054_v25, %v2821_v17  ;;  %v6422_v17 = vld [vmem:[%s5857_s21 + $0x28] sm:$0xff] }
 0xf27   :  { %v4056_v26 = vpop.f32.mrf.mxu0 }
 0xf28   :  { %v6396_v28 = vadd.f32 %v4056_v26, %v2825_v24  ;;  %v2869_v26 = vrot.slane %v6422_v17, %v5882_v38  ;;  %v2889_v38 = vrot.slane %v6422_v17, %v6102_v29 }
 0xf29   :  { %v4058_v32 = vpop.f32.mrf.mxu0 }
 0xf2a   :  { %v4638_v41 = vcombine.low %v6394_v27, %v6396_v28  ;;  %v2873_v32 = vrot.slane %v6422_v17, %v5885_v39 }
 0xf2b   :  { %v4059_v42 = vpop.f32.mrf.mxu0 }
 0xf2d   :  { %v4136_v40 = vpop.f32.mrf.mxu0 }
 0xf2e   :  { %v6407_v48 = vadd.f32 %v4136_v40, %v2837_v52 }
 0xf2f   :  { %v4138_v56 = vpop.f32.mrf.mxu0 }
 0xf30   :  { %v6409_v46 = vadd.f32 %v4138_v56, %v2841_v50 }
 0xf31   :  { %v4140_v10 = vpop.f32.mrf.mxu0 }
 0xf32   :  { %v4655_v35 = vcombine.low %v6407_v48, %v6409_v46  ;;  %v2475_v10 = vld [vmem:[%s6657_s22 + $0x18] sm:$0xff] }
 0xf33   :  { %v4141_v23 = vpop.f32.mrf.mxu0 }
 0xf35   :  { %v4218_v5 = vpop.f32.mrf.mxu0 }
 0xf36   :  { %v6417_v8 = vadd.f32 %v4218_v5, %v2853_v3  ;;  %v2885_v3 = vrot.slane %v6422_v17, %v6150_v63 }
 0xf37   :  { %v4220_v59 = vpop.f32.mrf.mxu0 }
 0xf38   :  { %v6419_v36 = vadd.f32 %v4220_v59, %v2857_v4 }
 0xf39   :  { %v4222_v31 = vpop.f32.mrf.mxu0 }
 0xf3a   :  { %v6658_v48 = vcombine.low %v6417_v8, %v6419_v36 }
 0xf3b   :  { %v4223_v25 = vpop.f32.mrf.mxu0 }
 0xf3d   :  { %v4300_v42 = vpop.f32.mrf.mxu0 }
 0xf3e   :  { %v6430_v50 = vadd.f32 %v4300_v42, %v2869_v26 }
 0xf3f   :  { %v4302_v52 = vpop.f32.mrf.mxu0 }
 0xf40   :  { %v6432_v40 = vadd.f32 %v4302_v52, %v2873_v32  ;;  %v4929_v32 = vld [vmem:[%s5857_s21 + $0x30] ss:$0 sm:$0xff]  ;;  %s5694_s21 = smov 33  }
 0xf41   :  { %v4304_v56 = vpop.f32.mrf.mxu0 }
 0xf42   :  { %v6659_v8 = vcombine.low %v6430_v50, %v6432_v40 }
 0xf43   :  { %v4305_v23 = vpop.f32.mrf.mxu0 }
 0xf45   :  { %v4382_v39 = vpop.f32.mrf.mxu0 }
 0xf46   :  { %v6440_v5 = vadd.f32 %v4382_v39, %v2885_v3  ;;  %v2474_v3 = vld [vmem:[%s6657_s22 + $0x10] sm:$0xff] }
 0xf47   :  { %v4384_v4 = vpop.f32.mrf.mxu0 }
 0xf48   :  { %v6442_v59 = vadd.f32 %v4384_v4, %v2889_v38  ;;  %v2473_v4 = vld [vmem:[%s6657_s22 + $0x8] sm:$0xff] }
 0xf49   :  { %v4386_v31 = vpop.f32.mrf.mxu0 }
 0xf4a   :  { %v4706_v25 = vcombine.low %v6440_v5, %v6442_v59 }
 0xf4b   :  { %v4387_v26 = vpop.f32.mrf.mxu0 }
 0xf4d   :  { %v4464_v42 = vpop.f32.mrf.mxu0 }
 0xf4e   :  { %v4465_v63 = vadd.f32 %v4929_v32, %v4464_v42  ;;  %v2472_v32 = vld [vmem:[%s6657_s22] sm:$0xff] }
 0xf4f   :  { %v5317_v52 = vpop.f32.mrf.mxu0 }
 0xf50   :  { %5053 = vst.sshfl [vmem:[%s5867_s4 + $0x60] sm:$0x3 pattern:$0x76325410] %v4465_v63  ;;  %v5523_v63 = vld [vmem:[#allocation2 + $0x194] ss:$196 sps:$4 sm:$0xff]  }
 0xf51   :  { %v4467_v29 = vpop.f32.mrf.mxu0 }
 0xf52   :  { %v5521_v29 = vld [vmem:[#allocation2 + $0x190] ss:$196 sps:$4 sm:$0xff]  }
 0xf53   :  { %v5318_v56 = vpop.f32.mrf.mxu0 }
 0xf54   :  { %v5526_v56 = vld [vmem:[#allocation2 + $0xc] ss:$196 sps:$4 sm:$0xff]  }
 0xf5b   :  { %v2489_v23 = vpop.permute.xlu1 %2488 }
 0xf5c   :  { %v2498_v24 = vmul.f32 %v2489_v23, %v2474_v3  ;;  %v5527_v23 = vld [vmem:[#allocation2 + $0x1a0] ss:$196 sps:$4 sm:$0xff]  }
 0xf5d   :  { %v5532_v3 = vld [vmem:[#allocation2 + $0x1c] ss:$196 sps:$4 sm:$0xff]  }
 0xf5f   :  { %v2494_v39 = vpop.permute.xlu1 %2493 }
 0xf60   :  { %v2499_v38 = vmul.f32 %v2494_v39, %v2475_v10  ;;  %v5524_v10 = vld [vmem:[#allocation2 + $0x8] ss:$196 sps:$4 sm:$0xff]   ;;  %v5533_v39 = vld [vmem:[#allocation2 + $0x1b0] ss:$196 sps:$4 sm:$0xff]  }
 0xf62   :  { %5301 = vmatpush3.msra.mxu1 %v2499_v38  ;;  %v5538_v38 = vld [vmem:[#allocation2 + $0x2c] ss:$196 sps:$4 sm:$0xff]  }
 0xf63   :  { %5302 = vmatprep.subr.mxu1 %v5691_v11  ;;  %v2484_v31 = vpop.permute.xlu1 %2483 }
 0xf64   :  { %v2497_v26 = vmul.f32 %v2484_v31, %v2473_v4  ;;  %5303 = vmatpush3.msra.mxu1 %v2498_v24  ;;  %v5529_v24 = vld [vmem:[#allocation2 + $0x1a4] ss:$196 sps:$4 sm:$0xff]  }
 0xf65   :  { %5304 = vmatprep.subr.mxu1 %v5691_v11  ;;  %v5536_v4 = vld [vmem:[#allocation2 + $0x28] ss:$196 sps:$4 sm:$0xff]  }
 0xf66   :  { %5305 = vmatpush3.msra.mxu1 %v2497_v26  ;;  %v5541_v31 = vld [vmem:[#allocation2 + $0x1c4] ss:$196 sps:$4 sm:$0xff]  }
 0xf67   :  { %v2479_v42 = vpop.permute.xlu1 %2478  ;;  %5306 = vmatprep.subr.mxu1 %v5691_v11  ;;  %v5530_v11 = vld [vmem:[#allocation2 + $0x18] ss:$196 sps:$4 sm:$0xff]   ;;  %v5539_v26 = vld [vmem:[#allocation2 + $0x1c0] ss:$196 sps:$4 sm:$0xff]  }
 0xf68   :  { %v2496_v52 = vmul.f32 %v2479_v42, %v2472_v32  ;;  %v5544_v32 = vld [vmem:[#allocation2 + $0x3c] ss:$196 sps:$4 sm:$0xff]  }
 0xf69   :  { %v5542_v42 = vld [vmem:[#allocation2 + $0x38] ss:$196 sps:$4 sm:$0xff]  }
 0xf6a   :  { %5307 = vmatpush3.msra.mxu1 %v2496_v52  ;;  %v5545_v52 = vld [vmem:[#allocation2 + $0x1d0] ss:$196 sps:$4 sm:$0xff]  }
 0xf6b   :  { %5309 = vmatmul.mubr.msk.f32.vlgmr.msra.gmra.mxu1 %vm256_vm0, %v6243_v45  ;;  %3499 = vmatprep.subr.bf16.mxu1 %v5523_v63  ;;  %v5535_v45 = vld [vmem:[#allocation2 + $0x1b4] ss:$196 sps:$4 sm:$0xff]  }
 0xf6c   :  { %3500 = vmatpush1.bf16.msra.mxu1 %v5521_v29  ;;  %3519 = vmatprep.mubr.bf16.mxu1 %v5689_v14  ;;  %v5547_v63 = vld [vmem:[#allocation2 + $0x1d4] ss:$196 sps:$4 sm:$0xff]   ;;  %v5550_v29 = vld [vmem:[#allocation2 + $0x4c] ss:$196 sps:$4 sm:$0xff]  }
 0xf6d   :  { %3501 = vmatprep.subr.bf16.mxu1 %v5526_v56  ;;  %v5548_v56 = vld [vmem:[#allocation2 + $0x48] ss:$196 sps:$4 sm:$0xff]  }
 0xf70   :  { %3502 = vmatpush1.bf16.msra.mxu1 %v5524_v10  ;;  %v5553_v10 = vld [vmem:[#allocation2 + $0x1e4] ss:$196 sps:$4 sm:$0xff]  }
 0xf71   :  { %3581 = vmatprep.subr.bf16.mxu1 %v5529_v24  ;;  %v5551_v24 = vld [vmem:[#allocation2 + $0x1e0] ss:$196 sps:$4 sm:$0xff]  }
 0xf73   :  { %5029 = vmatmul.mubr.msk.bf16.vlgmr.msra.gmra.mxu1 %vm256_vm0, %v6251_v33 }
 0xf74   :  { %3582 = vmatpush1.bf16.msra.mxu1 %v5527_v23  ;;  %3601 = vmatprep.mubr.bf16.mxu1 %v5689_v14  ;;  %v5556_v23 = vld [vmem:[#allocation2 + $0x5c] ss:$196 sps:$4 sm:$0xff]  }
 0xf75   :  { %3583 = vmatprep.subr.bf16.mxu1 %v5532_v3  ;;  %v5554_v3 = vld [vmem:[#allocation2 + $0x58] ss:$196 sps:$4 sm:$0xff]  }
 0xf78   :  { %3584 = vmatpush1.bf16.msra.mxu1 %v5530_v11  ;;  %v5559_v11 = vld [vmem:[#allocation2 + $0x1f4] ss:$196 sps:$4 sm:$0xff]  }
 0xf79   :  { %3663 = vmatprep.subr.bf16.mxu1 %v5535_v45  ;;  %v5557_v45 = vld [vmem:[#allocation2 + $0x1f0] ss:$196 sps:$4 sm:$0xff]  }
 0xf7b   :  { %5031 = vmatmul.mubr.msk.bf16.vlgmr.msra.gmra.mxu1 %vm256_vm0, %v6251_v33 }
 0xf7c   :  { %3664 = vmatpush1.bf16.msra.mxu1 %v5533_v39  ;;  %3683 = vmatprep.mubr.bf16.mxu1 %v5689_v14  ;;  %v5562_v39 = vld [vmem:[#allocation2 + $0x6c] ss:$196 sps:$4 sm:$0xff]  }
 0xf7d   :  { %3665 = vmatprep.subr.bf16.mxu1 %v5538_v38  ;;  %v5560_v38 = vld [vmem:[#allocation2 + $0x68] ss:$196 sps:$4 sm:$0xff]  }
 0xf80   :  { %3666 = vmatpush1.bf16.msra.mxu1 %v5536_v4  ;;  %v5565_v4 = vld [vmem:[#allocation2 + $0x204] ss:$196 sps:$4 sm:$0xff]  }
 0xf81   :  { %3745 = vmatprep.subr.bf16.mxu1 %v5541_v31  ;;  %v5563_v31 = vld [vmem:[#allocation2 + $0x200] ss:$196 sps:$4 sm:$0xff]  }
 0xf83   :  { %5033 = vmatmul.mubr.msk.bf16.vlgmr.msra.gmra.mxu1 %vm256_vm0, %v6251_v33 }
 0xf84   :  { %3746 = vmatpush1.bf16.msra.mxu1 %v5539_v26  ;;  %3765 = vmatprep.mubr.bf16.mxu1 %v5689_v14  ;;  %v5568_v26 = vld [vmem:[#allocation2 + $0x7c] ss:$196 sps:$4 sm:$0xff]  }
 0xf85   :  { %3747 = vmatprep.subr.bf16.mxu1 %v5544_v32  ;;  %v5566_v32 = vld [vmem:[#allocation2 + $0x78] ss:$196 sps:$4 sm:$0xff]  }
 0xf88   :  { %3748 = vmatpush1.bf16.msra.mxu1 %v5542_v42  ;;  %v5571_v42 = vld [vmem:[#allocation2 + $0x214] ss:$196 sps:$4 sm:$0xff]  }
 0xf89   :  { %3827 = vmatprep.subr.bf16.mxu1 %v5547_v63  ;;  %v5569_v63 = vld [vmem:[#allocation2 + $0x210] ss:$196 sps:$4 sm:$0xff]  }
 0xf8b   :  { %5035 = vmatmul.mubr.msk.bf16.vlgmr.msra.gmra.mxu1 %vm256_vm0, %v6251_v33 }
 0xf8c   :  { %3828 = vmatpush1.bf16.msra.mxu1 %v5545_v52  ;;  %3847 = vmatprep.mubr.bf16.mxu1 %v5689_v14  ;;  %v5574_v52 = vld [vmem:[#allocation2 + $0x8c] ss:$196 sps:$4 sm:$0xff]  }
 0xf8d   :  { %3829 = vmatprep.subr.bf16.mxu1 %v5550_v29  ;;  %v5572_v29 = vld [vmem:[#allocation2 + $0x88] ss:$196 sps:$4 sm:$0xff]  }
 0xf90   :  { %3830 = vmatpush1.bf16.msra.mxu1 %v5548_v56  ;;  %v5577_v56 = vld [vmem:[#allocation2 + $0x224] ss:$196 sps:$4 sm:$0xff]  }
 0xf91   :  { %3909 = vmatprep.subr.bf16.mxu1 %v5553_v10 }
 0xf93   :  { %5037 = vmatmul.mubr.msk.bf16.vlgmr.msra.gmra.mxu1 %vm256_vm0, %v6251_v33 }
 0xf94   :  { %3910 = vmatpush1.bf16.msra.mxu1 %v5551_v24  ;;  %3929 = vmatprep.mubr.bf16.mxu1 %v5689_v14 }
 0xf95   :  { %3911 = vmatprep.subr.bf16.mxu1 %v5556_v23  ;;  %v5575_v23 = vld [vmem:[#allocation2 + $0x220] ss:$196 sps:$4 sm:$0xff]  }
 0xf98   :  { %3912 = vmatpush1.bf16.msra.mxu1 %v5554_v3  ;;  %v5580_v3 = vld [vmem:[#allocation2 + $0x9c] ss:$196 sps:$4 sm:$0xff]  }
 0xf99   :  { %3991 = vmatprep.subr.bf16.mxu1 %v5559_v11  ;;  %v5578_v11 = vld [vmem:[#allocation2 + $0x98] ss:$196 sps:$4 sm:$0xff]  }
 0xf9b   :  { %5039 = vmatmul.mubr.msk.bf16.vlgmr.msra.gmra.mxu1 %vm256_vm0, %v6251_v33 }
 0xf9c   :  { %3992 = vmatpush1.bf16.msra.mxu1 %v5557_v45  ;;  %4011 = vmatprep.mubr.bf16.mxu1 %v5689_v14  ;;  %v5583_v45 = vld [vmem:[#allocation2 + $0x234] ss:$196 sps:$4 sm:$0xff]  }
 0xf9d   :  { %3993 = vmatprep.subr.bf16.mxu1 %v5562_v39  ;;  %v5581_v39 = vld [vmem:[#allocation2 + $0x230] ss:$196 sps:$4 sm:$0xff]  }
 0xfa0   :  { %3994 = vmatpush1.bf16.msra.mxu1 %v5560_v38  ;;  %v5586_v38 = vld [vmem:[#allocation2 + $0xac] ss:$196 sps:$4 sm:$0xff]  }
 0xfa1   :  { %4073 = vmatprep.subr.bf16.mxu1 %v5565_v4  ;;  %v5584_v4 = vld [vmem:[#allocation2 + $0xa8] ss:$196 sps:$4 sm:$0xff]  }
 0xfa3   :  { %5041 = vmatmul.mubr.msk.bf16.vlgmr.msra.gmra.mxu1 %vm256_vm0, %v6251_v33 }
 0xfa4   :  { %4074 = vmatpush1.bf16.msra.mxu1 %v5563_v31  ;;  %4093 = vmatprep.mubr.bf16.mxu1 %v5689_v14  ;;  %v5589_v31 = vld [vmem:[#allocation2 + $0x244] ss:$196 sps:$4 sm:$0xff]  }
 0xfa5   :  { %4075 = vmatprep.subr.bf16.mxu1 %v5568_v26  ;;  %v5587_v26 = vld [vmem:[#allocation2 + $0x240] ss:$196 sps:$4 sm:$0xff]  }
 0xfa8   :  { %4076 = vmatpush1.bf16.msra.mxu1 %v5566_v32  ;;  %v5592_v32 = vld [vmem:[#allocation2 + $0xbc] ss:$196 sps:$4 sm:$0xff]  }
 0xfa9   :  { %4155 = vmatprep.subr.bf16.mxu1 %v5571_v42  ;;  %v5590_v42 = vld [vmem:[#allocation2 + $0xb8] ss:$196 sps:$4 sm:$0xff]  }
 0xfab   :  { %5043 = vmatmul.mubr.msk.bf16.vlgmr.msra.gmra.mxu1 %vm256_vm0, %v6251_v33 }
 0xfac   :  { %4156 = vmatpush1.bf16.msra.mxu1 %v5569_v63  ;;  %4175 = vmatprep.mubr.bf16.mxu1 %v5689_v14  ;;  %v2575_v63 = vpop.permute.xlu1 %2574 }
 0xfad   :  { %4157 = vmatprep.subr.bf16.mxu1 %v5574_v52  ;;  %v2394_v10 = vpop.f32.mrf.mxu1 }
 0xfae   :  { %2572 = vst.msk [vmem:[%s5862_s20] sm:$0x3] %vm2571_vm3, %v2394_v10 }
 0xfaf   :  { %v5288_v24 = vpop.f32.mrf.mxu1  ;;  %2578 = vst.msk [vmem:[%s5862_s20] sm:$0x3] %vm2577_vm4, %v2575_v63  ;;  %v2737_v63 = vrot.slane %v6301_v62, %v6107_v44 }
 0xfb0   :  { %4158 = vmatpush1.bf16.msra.mxu1 %v5572_v29 }
 0xfb1   :  { %4237 = vmatprep.subr.bf16.mxu1 %v5577_v56  ;;  %v5695_v56 = vmov 1983009808  }
 0xfb2   :  { %v4522_v10 = vunpack.c.l.s4 %v5695_v56 }
 0xfb3   :  { %5045 = vmatmul.mubr.msk.bf16.vlgmr.msra.gmra.mxu1 %vm256_vm0, %v6251_v33 }
 0xfb4   :  { %4238 = vmatpush1.bf16.msra.mxu1 %v5575_v23  ;;  %4257 = vmatprep.mubr.bf16.mxu1 %v5689_v14  ;;  %v4523_v24 = vunpack.c.0.s8 %v4522_v10  ;;  %v2717_v23 = vrot.slane %v6301_v62, %v6086_v61 }
 0xfb5   :  { %4239 = vmatprep.subr.bf16.mxu1 %v5580_v3 }
 0xfb8   :  { %4240 = vmatpush1.bf16.msra.mxu1 %v5578_v11 }
 0xfb9   :  { %4319 = vmatprep.subr.bf16.mxu1 %v5583_v45 }
 0xfbb   :  { %5047 = vmatmul.mubr.msk.bf16.vlgmr.msra.gmra.mxu1 %vm256_vm0, %v6251_v33 }
 0xfbc   :  { %4320 = vmatpush1.bf16.msra.mxu1 %v5581_v39  ;;  %4339 = vmatprep.mubr.bf16.mxu1 %v5689_v14 }
 0xfbd   :  { %4321 = vmatprep.subr.bf16.mxu1 %v5586_v38 }
 0xfc0   :  { %4322 = vmatpush1.bf16.msra.mxu1 %v5584_v4 }
 0xfc1   :  { %4401 = vmatprep.subr.bf16.mxu1 %v5589_v31 }
 0xfc3   :  { %5049 = vmatmul.mubr.msk.bf16.vlgmr.msra.gmra.mxu1 %vm256_vm0, %v6251_v33 }
 0xfc4   :  { %4402 = vmatpush1.bf16.msra.mxu1 %v5587_v26  ;;  %4421 = vmatprep.mubr.bf16.mxu1 %v5689_v14  ;;  %v2721_v14 = vrot.slane %v6301_v62, %v6083_v51 }
 0xfc5   :  { %4403 = vmatprep.subr.bf16.mxu1 %v5592_v32 }
 0xfc8   :  { %4404 = vmatpush1.bf16.msra.mxu1 %v5590_v42  ;;  %v2733_v42 = vrot.slane %v6301_v62, %v6153_v7  ;;  %v2749_v62 = vrot.slane %v6330_v34, %v6086_v61 }
 0xfcb   :  { %5051 = vmatmul.mubr.msk.bf16.vlgmr.msra.gmra.mxu1 %vm256_vm0, %v6251_v33  ;;  %v6500_v33 = vsub.s32 %v4523_v24, %v5879_v37 }
 0xfcd   :  { %v4527_v26 = vrot.slane %v4519_v0, %v6500_v33  ;;  %v4544_v54 = vrot.slane %v4536_v1, %v6500_v33  ;;  %v2753_v0 = vrot.slane %v6330_v34, %v6083_v51  ;;  %v4561_v9 = vrot.slane %v4553_v21, %v6500_v33 }
 0xfce   :  { %v2765_v1 = vrot.slane %v6330_v34, %v6153_v7  ;;  %v4578_v16 = vrot.slane %v4570_v20, %v6500_v33  ;;  %v2785_v21 = vrot.slane %v6353_v22, %v6083_v51  ;;  %v4595_v19 = vrot.slane %v4587_v60, %v6500_v33 }
 0xfcf   :  { %v2797_v20 = vrot.slane %v6353_v22, %v6153_v7  ;;  %v4612_v47 = vrot.slane %v4604_v2, %v6500_v33  ;;  %v2817_v60 = vrot.slane %v6376_v55, %v6083_v51  ;;  %v4629_v49 = vrot.slane %v4621_v13, %v6500_v33 }
 0xfd0   :  { %v2829_v2 = vrot.slane %v6376_v55, %v6153_v7  ;;  %v4646_v12 = vrot.slane %v4638_v41, %v6500_v33  ;;  %v2849_v13 = vrot.slane %v6399_v53, %v6083_v51  ;;  %v4663_v27 = vrot.slane %v4655_v35, %v6500_v33 }
 0xfd1   :  { %v2861_v41 = vrot.slane %v6399_v53, %v6153_v7  ;;  %v4680_v46 = vrot.slane %v6658_v48, %v6500_v33  ;;  %v4697_v36 = vrot.slane %v6659_v8, %v6500_v33 }
0x102b   :  { %v2566_v52 = vpop.f32.mrf.mxu1 }
0x102c   :  { %2580 = vrot.lane.b32.xlu1 %v2566_v52, %s5694_s21 }
0x102d   :  { %v5310_v29 = vpop.f32.mrf.mxu1 }
0x1033   :  { %v3521_v3 = vpop.f32.mrf.mxu1 }
0x1034   :  { %v3522_v45 = vadd.f32 %v3521_v3, %v2717_v23 }
0x1035   :  { %v3523_v11 = vpop.f32.mrf.mxu1 }
0x1036   :  { %v3524_v39 = vadd.f32 %v3523_v11, %v2721_v14 }
0x1037   :  { %v3525_v38 = vpop.f32.mrf.mxu1 }
0x1038   :  { %v4520_v4 = vcombine.low %v3522_v45, %v3524_v39 }
0x1039   :  { %v3526_v31 = vpop.f32.mrf.mxu1 }
0x103a   :  { %v4534_v32 = vrot.slane %v4520_v4, %v6500_v33 }
0x103b   :  { %v3603_v37 = vpop.f32.mrf.mxu1 }
0x103c   :  { %v4535_v52 = vcombine.low %v4527_v26, %v4534_v32  ;;  %v3604_v56 = vadd.f32 %v3603_v37, %v2733_v42  ;;  %v2769_v32 = vrot.slane %v6330_v34, %v6107_v44  ;;  %v2781_v34 = vrot.slane %v6353_v22, %v6086_v61 }
0x103d   :  { %v3605_v29 = vpop.f32.mrf.mxu1 }
0x103e   :  { %4743 = vst [vmem:[%s5867_s4] sm:$0xff] %v4535_v52  ;;  %v3606_v10 = vadd.f32 %v3605_v29, %v2737_v63 }
0x103f   :  { %v3607_v24 = vpop.f32.mrf.mxu1 }
0x1040   :  { %v4537_v23 = vcombine.low %v3604_v56, %v3606_v10 }
0x1041   :  { %v3608_v14 = vpop.f32.mrf.mxu1 }
0x1042   :  { %v4551_v58 = vrot.slane %v4537_v23, %v6500_v33 }
0x1043   :  { %v3685_v3 = vpop.f32.mrf.mxu1 }
0x1044   :  { %v4552_v11 = vcombine.low %v4544_v54, %v4551_v58  ;;  %v3686_v39 = vadd.f32 %v3685_v3, %v2749_v62 }
0x1045   :  { %v3687_v45 = vpop.f32.mrf.mxu1 }
0x1046   :  { %4744 = vst [vmem:[%s5867_s4 + $0x8] sm:$0xff] %v4552_v11  ;;  %v3688_v38 = vadd.f32 %v3687_v45, %v2753_v0  ;;  %v2801_v45 = vrot.slane %v6353_v22, %v6107_v44  ;;  %v2813_v22 = vrot.slane %v6376_v55, %v6086_v61 }
0x1047   :  { %v3689_v4 = vpop.f32.mrf.mxu1 }
0x1048   :  { %v4554_v31 = vcombine.low %v3686_v39, %v3688_v38 }
0x1049   :  { %v3690_v26 = vpop.f32.mrf.mxu1 }
0x104a   :  { %v4568_v6 = vrot.slane %v4554_v31, %v6500_v33 }
0x104b   :  { %v3767_v42 = vpop.f32.mrf.mxu1 }
0x104c   :  { %v4569_v63 = vcombine.low %v4561_v9, %v4568_v6  ;;  %v3768_v52 = vadd.f32 %v3767_v42, %v2765_v1 }
0x104d   :  { %v3769_v37 = vpop.f32.mrf.mxu1 }
0x104e   :  { %4745 = vst [vmem:[%s5867_s4 + $0x10] sm:$0xff] %v4569_v63  ;;  %v3770_v29 = vadd.f32 %v3769_v37, %v2769_v32 }
0x104f   :  { %v3771_v56 = vpop.f32.mrf.mxu1 }
0x1050   :  { %v4571_v10 = vcombine.low %v3768_v52, %v3770_v29 }
0x1051   :  { %v3772_v24 = vpop.f32.mrf.mxu1 }
0x1052   :  { %v4585_v18 = vrot.slane %v4571_v10, %v6500_v33  ;;  %v2833_v24 = vrot.slane %v6376_v55, %v6107_v44  ;;  %v2845_v55 = vrot.slane %v6399_v53, %v6086_v61 }
0x1053   :  { %v3849_v23 = vpop.f32.mrf.mxu1 }
0x1054   :  { %v4586_v14 = vcombine.low %v4578_v16, %v4585_v18  ;;  %v3850_v58 = vadd.f32 %v3849_v23, %v2781_v34 }
0x1055   :  { %v3851_v54 = vpop.f32.mrf.mxu1 }
0x1056   :  { %4746 = vst [vmem:[%s5867_s4 + $0x18] sm:$0xff] %v4586_v14  ;;  %v3852_v62 = vadd.f32 %v3851_v54, %v2785_v21 }
0x1057   :  { %v3853_v0 = vpop.f32.mrf.mxu1 }
0x1058   :  { %v4588_v3 = vcombine.low %v3850_v58, %v3852_v62 }
0x1059   :  { %v3854_v11 = vpop.f32.mrf.mxu1 }
0x105a   :  { %v4602_v30 = vrot.slane %v4588_v3, %v6500_v33 }
0x105b   :  { %v3931_v39 = vpop.f32.mrf.mxu1 }
0x105c   :  { %v4603_v38 = vcombine.low %v4595_v19, %v4602_v30  ;;  %v3932_v31 = vadd.f32 %v3931_v39, %v2797_v20  ;;  %v2865_v39 = vrot.slane %v6399_v53, %v6107_v44  ;;  %v2877_v53 = vrot.slane %v6422_v17, %v6086_v61 }
0x105d   :  { %v3933_v4 = vpop.f32.mrf.mxu1 }
0x105e   :  { %4747 = vst [vmem:[%s5867_s4 + $0x20] sm:$0xff] %v4603_v38  ;;  %v3934_v26 = vadd.f32 %v3933_v4, %v2801_v45 }
0x105f   :  { %v3935_v9 = vpop.f32.mrf.mxu1 }
0x1060   :  { %v4605_v6 = vcombine.low %v3932_v31, %v3934_v26 }
0x1061   :  { %v3936_v1 = vpop.f32.mrf.mxu1 }
0x1062   :  { %v4619_v43 = vrot.slane %v4605_v6, %v6500_v33 }
0x1063   :  { %v4013_v32 = vpop.f32.mrf.mxu1 }
0x1064   :  { %v4620_v42 = vcombine.low %v4612_v47, %v4619_v43  ;;  %v4014_v37 = vadd.f32 %v4013_v32, %v2813_v22  ;;  %v2881_v43 = vrot.slane %v6422_v17, %v6083_v51  ;;  %v2893_v51 = vrot.slane %v6422_v17, %v6153_v7 }
0x1065   :  { %v4015_v63 = vpop.f32.mrf.mxu1 }
0x1066   :  { %4748 = vst [vmem:[%s5867_s4 + $0x28] sm:$0xff] %v4620_v42  ;;  %v4016_v52 = vadd.f32 %v4015_v63, %v2817_v60 }
0x1067   :  { %v4017_v29 = vpop.f32.mrf.mxu1 }
0x1068   :  { %v4622_v56 = vcombine.low %v4014_v37, %v4016_v52 }
0x1069   :  { %v4018_v10 = vpop.f32.mrf.mxu1 }
0x106a   :  { %v4636_v15 = vrot.slane %v4622_v56, %v6500_v33  ;;  %v2897_v56 = vrot.slane %v6422_v17, %v6107_v44  ;;  %v2587_v17 = vpop.permute.xlu0 %2586 }
0x106b   :  { %v4095_v16 = vpop.f32.mrf.mxu1 }
0x106c   :  { %v4637_v18 = vcombine.low %v4629_v49, %v4636_v15  ;;  %v4096_v21 = vadd.f32 %v4095_v16, %v2829_v2 }
0x106d   :  { %v4097_v34 = vpop.f32.mrf.mxu1 }
0x106e   :  { %4749 = vst [vmem:[%s5867_s4 + $0x30] sm:$0xff] %v4637_v18  ;;  %v4098_v23 = vadd.f32 %v4097_v34, %v2833_v24  ;;  %v4714_v18 = vrot.slane %v4706_v25, %v6500_v33 }
0x106f   :  { %v4099_v14 = vpop.f32.mrf.mxu1 }
0x1070   :  { %v4639_v54 = vcombine.low %v4096_v21, %v4098_v23 }
0x1071   :  { %v4100_v58 = vpop.f32.mrf.mxu1 }
0x1072   :  { %v4653_v57 = vrot.slane %v4639_v54, %v6500_v33 }
0x1073   :  { %v4177_v62 = vpop.f32.mrf.mxu1 }
0x1074   :  { %v4654_v0 = vcombine.low %v4646_v12, %v4653_v57  ;;  %v4178_v11 = vadd.f32 %v4177_v62, %v2845_v55 }
0x1075   :  { %v4179_v3 = vpop.f32.mrf.mxu1 }
0x1076   :  { %4750 = vst [vmem:[%s5867_s4 + $0x38] sm:$0xff] %v4654_v0  ;;  %v4180_v19 = vadd.f32 %v4179_v3, %v2849_v13 }
0x1077   :  { %v4181_v30 = vpop.f32.mrf.mxu1 }
0x1078   :  { %v4656_v20 = vcombine.low %v4178_v11, %v4180_v19 }
0x1079   :  { %v4182_v45 = vpop.f32.mrf.mxu1 }
0x107a   :  { %v4670_v28 = vrot.slane %v4656_v20, %v6500_v33 }
0x107b   :  { %v4259_v38 = vpop.f32.mrf.mxu1 }
0x107c   :  { %v4671_v4 = vcombine.low %v4663_v27, %v4670_v28  ;;  %v4260_v26 = vadd.f32 %v4259_v38, %v2861_v41 }
0x107d   :  { %v4261_v31 = vpop.f32.mrf.mxu1 }
0x107e   :  { %4751 = vst [vmem:[%s5867_s4 + $0x40] sm:$0xff] %v4671_v4  ;;  %v4262_v9 = vadd.f32 %v4261_v31, %v2865_v39 }
0x107f   :  { %v4263_v6 = vpop.f32.mrf.mxu1 }
0x1080   :  { %v4673_v1 = vcombine.low %v4260_v26, %v4262_v9 }
0x1081   :  { %v4264_v47 = vpop.f32.mrf.mxu1 }
0x1082   :  { %v4687_v35 = vrot.slane %v4673_v1, %v6500_v33 }
0x1083   :  { %v4341_v22 = vpop.f32.mrf.mxu1 }
0x1084   :  { %v4688_v60 = vcombine.low %v4680_v46, %v4687_v35  ;;  %v4342_v42 = vadd.f32 %v4341_v22, %v2877_v53 }
0x1085   :  { %v4343_v32 = vpop.f32.mrf.mxu1 }
0x1086   :  { %4752 = vst [vmem:[%s5867_s4 + $0x48] sm:$0xff] %v4688_v60  ;;  %v4344_v63 = vadd.f32 %v4343_v32, %v2881_v43 }
0x1087   :  { %v4345_v37 = vpop.f32.mrf.mxu1 }
0x1088   :  { %v4690_v52 = vcombine.low %v4342_v42, %v4344_v63 }
0x1089   :  { %v4346_v29 = vpop.f32.mrf.mxu1 }
0x108a   :  { %v4704_v61 = vrot.slane %v4690_v52, %v6500_v33 }
0x108b   :  { %v4423_v10 = vpop.f32.mrf.mxu1 }
0x108c   :  { %v4705_v49 = vcombine.low %v4697_v36, %v4704_v61  ;;  %v4424_v2 = vadd.f32 %v4423_v10, %v2893_v51 }
0x108d   :  { %v4425_v15 = vpop.f32.mrf.mxu1 }
0x108e   :  { %4753 = vst [vmem:[%s5867_s4 + $0x50] sm:$0xff] %v4705_v49  ;;  %v4426_v24 = vadd.f32 %v4425_v15, %v2897_v56 }
0x108f   :  { %v4427_v16 = vpop.f32.mrf.mxu1 }
0x1090   :  { %v4707_v50 = vcombine.low %v4424_v2, %v4426_v24 }
0x1091   :  { %v4428_v40 = vpop.f32.mrf.mxu1 }
0x1092   :  { %v4721_v7 = vrot.slane %v4707_v50, %v6500_v33 }
0x1094   :  { %v4722_v34 = vcombine.low %v4714_v18, %v4721_v7 }
0x1096   :  { %4754 = vst [vmem:[%s5867_s4 + $0x58] sm:$0xff] %v4722_v34 }
0x109e   :  { %v2581_v44 = vpop.permute.xlu1 %2580 }
0x109f   :  { %2584 = vst.msk [vmem:[%s5862_s20] sm:$0x3] %vm2583_vm5, %v2581_v44 }
0x10a0   :  { %2590 = vst.msk [vmem:[%s5862_s20] sm:$0x3] %vm2589_vm6, %v2587_v17 }
0x10a1   :  { %4764 = vsyncpa [#allocation3], 1 }

</bundles_post_ra>
